<compile_context>
chip_gen: v7x
topology: tpu7x:2x2x1
jax: 0.10.0
libtpu: 0.0.40
codegen_flags: <defaults>
</compile_context>

<pallas_src>
import functools
import numpy as np
import jax
import jax.numpy as jnp
from jax import lax
from jax.experimental import pallas as pl
from jax.experimental.pallas import tpu as pltpu

# ----- module hyper-parameters (out_channels must be divisible by 3) -----
OUT_CHANNELS = 6          # conv1 output channels
KERNEL_SIZE = 3
POOL_SIZE = 2
IMG = 8                   # 8x8 digits images (matches the `x / 16.0` normalization)
NUM_CLASSES = 10
NC_PAD = 128              # fc output padded to a lane-dense 128 columns

CG = OUT_CHANNELS // 3                 # conv2 in-channels per group
OG = 4 * OUT_CHANNELS // 3             # conv2 out-channels per group
C2 = 4 * OUT_CHANNELS                  # conv2 total out channels
HP = IMG // POOL_SIZE                  # pooled spatial extent
NPOOL = HP * HP                        # pooled cells per image (16)
FEAT = C2 * NPOOL                      # 384: flattened pooled features (NCHW order)
NPIX = IMG * IMG                       # 64
K1 = KERNEL_SIZE * KERNEL_SIZE         # 9
A1W = OUT_CHANNELS * NPIX              # 384: conv1 activation width (c1*64 + pixel)
A2W = POOL_SIZE * POOL_SIZE * FEAT     # 1536: conv2 activation width (u*384 + c*16 + pc)
PAD = KERNEL_SIZE // 2


# ---------------------------------------------------------------------------
# Static 0/1 selector tensors (numpy, built once) used to unroll the convs into
# dense, lane-aligned weight matrices in the wrapper.
# ---------------------------------------------------------------------------
def _build_selectors():
    # s1[t, p_in, p_out] = 1 if input pixel p_in is tap t of output pixel p_out
    # for a 3x3 'same' conv on an 8x8 image.
    s1 = np.zeros((K1, NPIX, NPIX), np.float32)
    for ki in range(KERNEL_SIZE):
        for kj in range(KERNEL_SIZE):
            t = ki * KERNEL_SIZE + kj
            for h in range(IMG):
                for w in range(IMG):
                    hi, wi = h + ki - PAD, w + kj - PAD
                    if 0 <= hi < IMG and 0 <= wi < IMG:
                        s1[t, hi * IMG + wi, h * IMG + w] = 1.0
    # s2[t, p_in, u, pcell]: same, but output pixels re-indexed by pooled cell
    # (ph*4+pw) and within-pool offset u = dh*2+dw (so pooling = max over u).
    s2 = np.zeros((K1, NPIX, POOL_SIZE * POOL_SIZE, NPOOL), np.float32)
    for u in range(POOL_SIZE * POOL_SIZE):
        dh, dw = divmod(u, POOL_SIZE)
        for ph in range(HP):
            for pw in range(HP):
                o = (POOL_SIZE * ph + dh) * IMG + (POOL_SIZE * pw + dw)
                s2[:, :, u, ph * HP + pw] = s1[:, :, o]
    # e[c, j, a] = 1 if conv2 output channel c (group c//OG) reads conv1 channel a
    # as its j-th group input channel.
    e = np.zeros((C2, CG, OUT_CHANNELS), np.float32)
    for c in range(C2):
        g = c // OG
        for j in range(CG):
            e[c, j, g * CG + j] = 1.0
    return s1, s2, e


_S1, _S2, _E = _build_selectors()


# ---------------------------------------------------------------------------
# Fused Pallas kernel: conv1 + ReLU + grouped conv2 + ReLU + maxpool + fc
# ---------------------------------------------------------------------------
def _fused_cnn_kernel(x_ref, w1_ref, b1_ref, w2_ref, b2_ref, wfc_ref, bfc_ref,
                      o_ref, a1_ref, a2_ref):
    # conv1 (+bias, ReLU) as one matmul over flattened 8x8 spatial: (BT,64)@(64,384)
    a1_ref[...] = jnp.maximum(
        jnp.dot(x_ref[...], w1_ref[...], preferred_element_type=jnp.float32)
        + b1_ref[...], 0.0)
    # grouped conv2 (+bias, ReLU) as one block-diagonal matmul: (BT,384)@(384,1536)
    a2_ref[...] = jnp.maximum(
        jnp.dot(a1_ref[...], w2_ref[...], preferred_element_type=jnp.float32)
        + b2_ref[...], 0.0)
    # 2x2 max-pool: conv2 columns are ordered [u, c, ph, pw] -> max of four
    # 384-lane, 128-aligned slabs; result is already in NCHW flatten order.
    pooled = jnp.maximum(
        jnp.maximum(a2_ref[:, 0 * FEAT:1 * FEAT], a2_ref[:, 1 * FEAT:2 * FEAT]),
        jnp.maximum(a2_ref[:, 2 * FEAT:3 * FEAT], a2_ref[:, 3 * FEAT:4 * FEAT]))
    # fc, zero-padded to 128 classes for a lane-dense output store.
    o_ref[...] = (jnp.dot(pooled, wfc_ref[...], preferred_element_type=jnp.float32)
                  + bfc_ref[...])


# ---------------------------------------------------------------------------
# Wrapper: weight unrolling (a handful of XLA ops) + one gridded pallas_call
# ---------------------------------------------------------------------------
def _round_up(n, m):
    return ((n + m - 1) // m) * m


def _prep_weights(params):
    w1, b1, w2, b2, wfc, bfc = params
    hi = jax.lax.Precision.HIGHEST   # keep the 0/1-selector contractions exact (f32)
    s1, s2, e = jnp.asarray(_S1), jnp.asarray(_S2), jnp.asarray(_E)

    # conv1 unrolled to (64, 384): row = input pixel, col = c1*64 + output pixel
    w1m = jnp.einsum('tio,ct->ico', s1, w1.reshape(OUT_CHANNELS, K1),
                     precision=hi).reshape(NPIX, A1W)
    b1m = jnp.repeat(b1, NPIX).reshape(1, A1W)

    # grouped conv2 unrolled to (384, 1536):
    #   row = c1*64 + input pixel, col = u*384 + c2*16 + (ph*4 + pw)
    m2 = jnp.einsum('cja,cjt->cat', e, w2.reshape(C2, CG, K1), precision=hi)
    w2m = jnp.einsum('cat,tiup->aiucp', m2, s2, precision=hi).reshape(A1W, A2W)
    b2m = jnp.tile(jnp.repeat(b2, NPOOL), POOL_SIZE * POOL_SIZE).reshape(1, A2W)

    # fc, zero-padded from 10 to 128 output lanes
    wfcm = jnp.zeros((FEAT, NC_PAD), jnp.float32).at[:, :NUM_CLASSES].set(wfc.T)
    bfcm = jnp.zeros((1, NC_PAD), jnp.float32).at[0, :NUM_CLASSES].set(bfc)
    return w1m, b1m, w2m, b2m, wfcm, bfcm


def cnn_forward(x, params, *, batch_tile=256):
    """x: (B, 1, 8, 8) float32 NCHW (PyTorch convention). Returns (B, 10)."""
    B = x.shape[0]
    w1m, b1m, w2m, b2m, wfcm, bfcm = _prep_weights(params)

    bt = _round_up(min(batch_tile, B), 8)          # batch tile (sublane-aligned)
    bp = _round_up(B, bt)                          # padded batch
    x_flat = x.reshape(B, NPIX)
    if bp != B:
        x_flat = jnp.pad(x_flat, ((0, bp - B), (0, 0)))

    out = pl.pallas_call(
        _fused_cnn_kernel,
        out_shape=jax.ShapeDtypeStruct((bp, NC_PAD), jnp.float32),
        grid_spec=pltpu.PrefetchScalarGridSpec(
            num_scalar_prefetch=0,
            grid=(bp // bt,),
            in_specs=[
                pl.BlockSpec((bt, NPIX), lambda i: (i, 0)),     # batch tile of images
                pl.BlockSpec((NPIX, A1W), lambda i: (0, 0)),    # conv1 matrix (resident)
                pl.BlockSpec((1, A1W), lambda i: (0, 0)),
                pl.BlockSpec((A1W, A2W), lambda i: (0, 0)),     # conv2 matrix (resident)
                pl.BlockSpec((1, A2W), lambda i: (0, 0)),
                pl.BlockSpec((FEAT, NC_PAD), lambda i: (0, 0)),  # fc weight (padded)
                pl.BlockSpec((1, NC_PAD), lambda i: (0, 0)),
            ],
            out_specs=pl.BlockSpec((bt, NC_PAD), lambda i: (i, 0)),
            scratch_shapes=[
                pltpu.VMEM((bt, A1W), jnp.float32),   # conv1 activations (VMEM only)
                pltpu.VMEM((bt, A2W), jnp.float32),   # conv2 activations (pre-pool)
            ],
        ),
        compiler_params=pltpu.CompilerParams(
            dimension_semantics=("parallel",),        # shard batch across TCs on v7x
        ),
    )(x_flat, w1m, b1m, w2m, b2m, wfcm, bfcm)
    return out[:B, :NUM_CLASSES]


# ---------------------------------------------------------------------------
# Pure-JAX reference of the PyTorch forward (for verification)
# ---------------------------------------------------------------------------
def reference_forward(x, params):
    w1, b1, w2, b2, wfc, bfc = params
    dn = ('NCHW', 'OIHW', 'NCHW')
    hi = jax.lax.Precision.HIGHEST
    y = lax.conv_general_dilated(x, w1, (1, 1), 'SAME', dimension_numbers=dn,
                                 precision=hi)
    y = jnp.maximum(y + b1[None, :, None, None], 0.0)
    y = lax.conv_general_dilated(y, w2, (1, 1), 'SAME', dimension_numbers=dn,
                                 feature_group_count=3, precision=hi)
    y = jnp.maximum(y + b2[None, :, None, None], 0.0)
    y = lax.reduce_window(y, -jnp.inf, lax.max,
                          (1, 1, POOL_SIZE, POOL_SIZE),
                          (1, 1, POOL_SIZE, POOL_SIZE), 'VALID')
    y = y.reshape(x.shape[0], -1)
    return jnp.dot(y, wfc.T, precision=hi) + bfc


# ---------------------------------------------------------------------------
if __name__ == "__main__":
    key = jax.random.PRNGKey(0)
    ks = jax.random.split(key, 7)
    B = 200   # not a multiple of the batch tile -> exercises padding + a 2-step grid

    # deterministic synthetic parameters (PyTorch-convention shapes)
    w1 = jax.random.normal(ks[0], (OUT_CHANNELS, 1, KERNEL_SIZE, KERNEL_SIZE), jnp.float32) * 0.3
    b1 = jax.random.normal(ks[1], (OUT_CHANNELS,), jnp.float32) * 0.1
    w2 = jax.random.normal(ks[2], (C2, CG, KERNEL_SIZE, KERNEL_SIZE), jnp.float32) * 0.2
    b2 = jax.random.normal(ks[3], (C2,), jnp.float32) * 0.1
    wfc = jax.random.normal(ks[4], (NUM_CLASSES, FEAT), jnp.float32) * 0.1
    bfc = jax.random.normal(ks[5], (NUM_CLASSES,), jnp.float32) * 0.1
    params = (w1, b1, w2, b2, wfc, bfc)

    # sklearn-digits style input (pixel values 0..16), normalized like the lesson script
    x = jax.random.uniform(ks[6], (B, 1, IMG, IMG), jnp.float32, minval=0.0, maxval=16.0)
    x = x / 16.0

    fwd = jax.jit(functools.partial(cnn_forward, batch_tile=128))
    out = jax.block_until_ready(fwd(x, params))
    ref = jax.block_until_ready(reference_forward(x, params))
    np.testing.assert_allclose(np.asarray(out), np.asarray(ref), rtol=2e-3, atol=2e-3)
    print("KERNEL_OK")
</pallas_src>

<mosaic_0001>
module attributes {stable_mosaic.version = 11 : i64} {
  func.func @_fused_cnn_kernel(%arg0: i32, %arg1: memref<128x64xf32, #tpu.memory_space<vmem>>, %arg2: memref<64x384xf32, #tpu.memory_space<vmem>>, %arg3: memref<1x384xf32, #tpu.memory_space<vmem>>, %arg4: memref<384x1536xf32, #tpu.memory_space<vmem>>, %arg5: memref<1x1536xf32, #tpu.memory_space<vmem>>, %arg6: memref<384x128xf32, #tpu.memory_space<vmem>>, %arg7: memref<1x128xf32, #tpu.memory_space<vmem>>, %arg8: memref<128x128xf32, #tpu.memory_space<vmem>>, %arg9: memref<128x384xf32, #tpu.memory_space<vmem>>, %arg10: memref<128x1536xf32, #tpu.memory_space<vmem>>) attributes {dimension_semantics = [#tpu.dimension_semantics<parallel>], iteration_bounds = array<i64: 2>, scalar_prefetch = 0 : i64, scratch_operands = 2 : i64, tpu.core_type = #tpu.core_type<tc>, window_params = [{transform_indices = @transform_0, window_bounds = array<i64: 128, 64>}, {pipeline_mode = #tpu.pipeline_mode<synchronous>, transform_indices = @transform_1, window_bounds = array<i64: 64, 384>}, {pipeline_mode = #tpu.pipeline_mode<synchronous>, transform_indices = @transform_2, window_bounds = array<i64: 1, 384>}, {pipeline_mode = #tpu.pipeline_mode<synchronous>, transform_indices = @transform_3, window_bounds = array<i64: 384, 1536>}, {pipeline_mode = #tpu.pipeline_mode<synchronous>, transform_indices = @transform_4, window_bounds = array<i64: 1, 1536>}, {pipeline_mode = #tpu.pipeline_mode<synchronous>, transform_indices = @transform_5, window_bounds = array<i64: 384, 128>}, {pipeline_mode = #tpu.pipeline_mode<synchronous>, transform_indices = @transform_6, window_bounds = array<i64: 1, 128>}, {transform_indices = @transform_7, window_bounds = array<i64: 128, 128>}]} {
    %c0 = arith.constant 0 : index
    %c0_0 = arith.constant 0 : index
    %0 = vector.load %arg1[%c0, %c0_0] : memref<128x64xf32, #tpu.memory_space<vmem>>, vector<128x64xf32>
    %c0_1 = arith.constant 0 : index
    %c0_2 = arith.constant 0 : index
    %1 = vector.load %arg2[%c0_1, %c0_2] : memref<64x384xf32, #tpu.memory_space<vmem>>, vector<64x384xf32>
    %cst = arith.constant dense<0.000000e+00> : vector<128x384xf32>
    %2 = tpu.matmul %0, %1, %cst {dimension_numbers = #tpu.dot_dimension_numbers<[1], [0], [0], [1], [0, 0, 1, 1], [], []>} : vector<128x64xf32>, vector<64x384xf32>, vector<128x384xf32> -> vector<128x384xf32>
    %c0_3 = arith.constant 0 : index
    %c0_4 = arith.constant 0 : index
    %3 = vector.load %arg3[%c0_3, %c0_4] : memref<1x384xf32, #tpu.memory_space<vmem>>, vector<1x384xf32>
    %4 = vector.broadcast %3 : vector<1x384xf32> to vector<128x384xf32>
    %5 = arith.addf %2, %4 : vector<128x384xf32>
    %cst_5 = arith.constant 0.000000e+00 : f32
    %6 = vector.broadcast %cst_5 : f32 to vector<128x384xf32>
    %7 = arith.maximumf %5, %6 : vector<128x384xf32>
    %c0_6 = arith.constant 0 : index
    %c0_7 = arith.constant 0 : index
    %8 = vector.load %arg9[%c0_6, %c0_7] : memref<128x384xf32, #tpu.memory_space<vmem>>, vector<128x384xf32>
    tpu.vector_store %arg9[%c0_6, %c0_7], %7 {strides = array<i32>} : memref<128x384xf32, #tpu.memory_space<vmem>>, vector<128x384xf32>,
    %c0_8 = arith.constant 0 : index
    %c0_9 = arith.constant 0 : index
    %9 = vector.load %arg9[%c0_8, %c0_9] : memref<128x384xf32, #tpu.memory_space<vmem>>, vector<128x384xf32>
    %c0_10 = arith.constant 0 : index
    %c0_11 = arith.constant 0 : index
    %10 = vector.load %arg4[%c0_10, %c0_11] : memref<384x1536xf32, #tpu.memory_space<vmem>>, vector<384x1536xf32>
    %cst_12 = arith.constant dense<0.000000e+00> : vector<128x1536xf32>
    %11 = tpu.matmul %9, %10, %cst_12 {dimension_numbers = #tpu.dot_dimension_numbers<[1], [0], [0], [1], [0, 0, 1, 1], [], []>} : vector<128x384xf32>, vector<384x1536xf32>, vector<128x1536xf32> -> vector<128x1536xf32>
    %c0_13 = arith.constant 0 : index
    %c0_14 = arith.constant 0 : index
    %12 = vector.load %arg5[%c0_13, %c0_14] : memref<1x1536xf32, #tpu.memory_space<vmem>>, vector<1x1536xf32>
    %13 = vector.broadcast %12 : vector<1x1536xf32> to vector<128x1536xf32>
    %14 = arith.addf %11, %13 : vector<128x1536xf32>
    %cst_15 = arith.constant 0.000000e+00 : f32
    %15 = vector.broadcast %cst_15 : f32 to vector<128x1536xf32>
    %16 = arith.maximumf %14, %15 : vector<128x1536xf32>
    %c0_16 = arith.constant 0 : index
    %c0_17 = arith.constant 0 : index
    %17 = vector.load %arg10[%c0_16, %c0_17] : memref<128x1536xf32, #tpu.memory_space<vmem>>, vector<128x1536xf32>
    tpu.vector_store %arg10[%c0_16, %c0_17], %16 {strides = array<i32>} : memref<128x1536xf32, #tpu.memory_space<vmem>>, vector<128x1536xf32>,
    %c0_18 = arith.constant 0 : index
    %c0_19 = arith.constant 0 : index
    %18 = vector.load %arg10[%c0_18, %c0_19] : memref<128x1536xf32, #tpu.memory_space<vmem>>, vector<128x384xf32>
    %c0_20 = arith.constant 0 : index
    %c384 = arith.constant 384 : index
    %19 = vector.load %arg10[%c0_20, %c384] : memref<128x1536xf32, #tpu.memory_space<vmem>>, vector<128x384xf32>
    %20 = arith.maximumf %18, %19 : vector<128x384xf32>
    %c0_21 = arith.constant 0 : index
    %c768 = arith.constant 768 : index
    %21 = vector.load %arg10[%c0_21, %c768] : memref<128x1536xf32, #tpu.memory_space<vmem>>, vector<128x384xf32>
    %c0_22 = arith.constant 0 : index
    %c1152 = arith.constant 1152 : index
    %22 = vector.load %arg10[%c0_22, %c1152] : memref<128x1536xf32, #tpu.memory_space<vmem>>, vector<128x384xf32>
    %23 = arith.maximumf %21, %22 : vector<128x384xf32>
    %24 = arith.maximumf %20, %23 : vector<128x384xf32>
    %c0_23 = arith.constant 0 : index
    %c0_24 = arith.constant 0 : index
    %25 = vector.load %arg6[%c0_23, %c0_24] : memref<384x128xf32, #tpu.memory_space<vmem>>, vector<384x128xf32>
    %cst_25 = arith.constant dense<0.000000e+00> : vector<128x128xf32>
    %26 = tpu.matmul %24, %25, %cst_25 {dimension_numbers = #tpu.dot_dimension_numbers<[1], [0], [0], [1], [0, 0, 1, 1], [], []>} : vector<128x384xf32>, vector<384x128xf32>, vector<128x128xf32> -> vector<128x128xf32>
    %c0_26 = arith.constant 0 : index
    %c0_27 = arith.constant 0 : index
    %27 = vector.load %arg7[%c0_26, %c0_27] : memref<1x128xf32, #tpu.memory_space<vmem>>, vector<1x128xf32>
    %28 = vector.broadcast %27 : vector<1x128xf32> to vector<128x128xf32>
    %29 = arith.addf %26, %28 : vector<128x128xf32>
    %c0_28 = arith.constant 0 : index
    %c0_29 = arith.constant 0 : index
    %30 = vector.load %arg8[%c0_28, %c0_29] : memref<128x128xf32, #tpu.memory_space<vmem>>, vector<128x128xf32>
    tpu.vector_store %arg8[%c0_28, %c0_29], %29 {strides = array<i32>} : memref<128x128xf32, #tpu.memory_space<vmem>>, vector<128x128xf32>,
    return
  }
  func.func @transform_0(%arg0: i32) -> (i32, i32) {
    %c0_i32 = arith.constant 0 : i32
    %c0_i32_0 = arith.constant 0 : i32
    return %arg0, %c0_i32 : i32, i32
  }
  func.func @transform_1(%arg0: i32) -> (i32, i32) {
    %c0_i32 = arith.constant 0 : i32
    %c0_i32_0 = arith.constant 0 : i32
    %c0_i32_1 = arith.constant 0 : i32
    return %c0_i32, %c0_i32_0 : i32, i32
  }
  func.func @transform_2(%arg0: i32) -> (i32, i32) {
    %c0_i32 = arith.constant 0 : i32
    %c0_i32_0 = arith.constant 0 : i32
    %c0_i32_1 = arith.constant 0 : i32
    return %c0_i32, %c0_i32_0 : i32, i32
  }
  func.func @transform_3(%arg0: i32) -> (i32, i32) {
    %c0_i32 = arith.constant 0 : i32
    %c0_i32_0 = arith.constant 0 : i32
    %c0_i32_1 = arith.constant 0 : i32
    return %c0_i32, %c0_i32_0 : i32, i32
  }
  func.func @transform_4(%arg0: i32) -> (i32, i32) {
    %c0_i32 = arith.constant 0 : i32
    %c0_i32_0 = arith.constant 0 : i32
    %c0_i32_1 = arith.constant 0 : i32
    return %c0_i32, %c0_i32_0 : i32, i32
  }
  func.func @transform_5(%arg0: i32) -> (i32, i32) {
    %c0_i32 = arith.constant 0 : i32
    %c0_i32_0 = arith.constant 0 : i32
    %c0_i32_1 = arith.constant 0 : i32
    return %c0_i32, %c0_i32_0 : i32, i32
  }
  func.func @transform_6(%arg0: i32) -> (i32, i32) {
    %c0_i32 = arith.constant 0 : i32
    %c0_i32_0 = arith.constant 0 : i32
    %c0_i32_1 = arith.constant 0 : i32
    return %c0_i32, %c0_i32_0 : i32, i32
  }
  func.func @transform_7(%arg0: i32) -> (i32, i32) {
    %c0_i32 = arith.constant 0 : i32
    %c0_i32_0 = arith.constant 0 : i32
    return %arg0, %c0_i32 : i32, i32
  }
}

</mosaic_0001>

<bundles_post_ra>
// kernel: tile.5
= control target key start
LH: loop header
LB: loop body
LE: loop exit
PB: predicated region body
PF: predicated region fallthrough
CT: control target
= control target key end

     0   :  { %s67_s8 = smov 112   ;;  %s68_s11 = smov 80   ;;  %vm3_vm0 = vcmask 130048   ;;  %vm9_vm1 = vcmask 1048448   ;;  %vm15_vm2 = vcmask 917248   ;;  %vm21_vm3 = vcmask 786048   ;;  %s111_s0 = inlined_call_operand.vmem [shape: f32[24,16], index: 0, kind: input, shape index: {}]   ;;  %s112_s1 = inlined_call_operand.vmem [shape: f32[384], index: 1, kind: output, shape index: {}]  }
   0x1   :  { %v53_v0 = vld [vmem:[%s111_s0 + $0x7] ss:$8 sm:$0x7]   ;;  %v55_v1 = vld [vmem:[%s111_s0 + $0x5] ss:$8 sm:$0x7]  }
   0x2   :  { %7 = vrot.lane.b32.xlu0 %v53_v0, %s67_s8  ;;  %19 = vrot.lane.b32.xlu1 %v55_v1, %s68_s11  ;;  %v54_v2 = vld [vmem:[%s111_s0 + $0x6] ss:$8 sm:$0x7]   ;;  %v56_v3 = vld [vmem:[%s111_s0 + $0x4] ss:$8 sm:$0x7]  }
   0x3   :  { %s69_s16 = smov 96   ;;  %v2_v4 = vld [vmem:[%s111_s0] ss:$8 sm:$0x7]   ;;  %s70_s19 = smov 64   ;;  %vm27_vm4 = vcmask 654848  }
   0x4   :  { %v57_v5 = vld [vmem:[%s111_s0 + $0x3] ss:$8 sm:$0x7]   ;;  %4 = vst.msk [vmem:[#allocation0] sm:$0x7] %vm3_vm0, %v2_v4   ;;  %s71_s24 = smov 48  }
   0x5   :  { %v58_v6 = vld [vmem:[%s111_s0 + $0x2] ss:$8 sm:$0x7]   ;;  %s72_s25 = smov 32   ;;  %vm33_vm5 = vcmask 523648   ;;  %vm39_vm6 = vcmask 392448  }
   0x6   :  { %13 = vrot.lane.b32.xlu0 %v54_v2, %s69_s16  ;;  %25 = vrot.lane.b32.xlu1 %v56_v3, %s70_s19  ;;  %v59_v7 = vld [vmem:[%s111_s0 + $0x1] ss:$8 sm:$0x7]   ;;  %s73_s0 = smov 16   ;;  %vm45_vm7 = vcmask 261248  }
   0xa   :  { %31 = vrot.lane.b32.xlu0 %v57_v5, %s71_s24  ;;  %37 = vrot.lane.b32.xlu1 %v58_v6, %s72_s25 }
   0xe   :  { %43 = vrot.lane.b32.xlu0 %v59_v7, %s73_s0 }
  0x74   :  { %v8_v8 = vpop.permute.xlu0 %7   ;;  %v20_v9 = vpop.permute.xlu1 %19  }
  0x75   :  { %10 = vst.msk [vmem:[#allocation0] sm:$0x7] %vm9_vm1, %v8_v8  }
  0x78   :  { %v14_v10 = vpop.permute.xlu0 %13   ;;  %v26_v11 = vpop.permute.xlu1 %25  }
  0x79   :  { %16 = vst.msk [vmem:[#allocation0] sm:$0x7] %vm15_vm2, %v14_v10  }
  0x7a   :  { %22 = vst.msk [vmem:[#allocation0] sm:$0x7] %vm21_vm3, %v20_v9  }
  0x7b   :  { %28 = vst.msk [vmem:[#allocation0] sm:$0x7] %vm27_vm4, %v26_v11  }
  0x7c   :  { %v32_v12 = vpop.permute.xlu0 %31   ;;  %v38_v13 = vpop.permute.xlu1 %37  }
  0x7d   :  { %34 = vst.msk [vmem:[#allocation0] sm:$0x7] %vm33_vm5, %v32_v12  }
  0x7e   :  { %40 = vst.msk [vmem:[#allocation0] sm:$0x7] %vm39_vm6, %v38_v13  }
  0x80   :  { %v44_v14 = vpop.permute.xlu0 %43  }
  0x81   :  { %46 = vst.msk [vmem:[#allocation0] sm:$0x7] %vm45_vm7, %v44_v14  }
  0x88   :  { %v50_v15 = vld [vmem:[#allocation0] sm:$0xf] }
  0x89   :  { %52 = vst [vmem:[%s112_s1] sm:$0xf] %v50_v15 }

// kernel: cnn_forward.1
= control target key start
LH: loop header
LB: loop body
LE: loop exit
PB: predicated region body
PF: predicated region fallthrough
CT: control target
= control target key end

     0   :  { %s5938_s24 = smov 0   ;;  %s9364_s0 = inlined_call_operand.vmem [shape: f32[256,64], index: 0, kind: input, shape index: {}]   ;;  %s9365_s1 = inlined_call_operand.vmem [shape: f32[64,384], index: 1, kind: input, shape index: {}]   ;;  %s9366_s2 = inlined_call_operand.vmem [shape: f32[1,384], index: 2, kind: input, shape index: {}]   ;;  %s9367_s3 = inlined_call_operand.vmem [shape: f32[384,1536], index: 3, kind: input, shape index: {}]   ;;  %s9368_s4 = inlined_call_operand.vmem [shape: f32[1,1536], index: 4, kind: input, shape index: {}]   ;;  %s9369_s5 = inlined_call_operand.vmem [shape: f32[384,128], index: 5, kind: input, shape index: {}]   ;;  %s9370_s6 = inlined_call_operand.vmem [shape: f32[1,128], index: 6, kind: input, shape index: {}]   ;;  %s9371_s7 = inlined_call_operand.vmem [shape: f32[256,128], index: 7, kind: output, shape index: {}]  }
   0x1 LB: > { %s4547_s25 = sadd.s32 4294967295, %s5895_s24   ;;  %p4551_p0 = scmp.ge.s32.totalorder %s5895_s24, 1  ;;  %s5895_s24 = sphi %s5938_s24, %s17_s24  }
   0x2   : > { %p238_p1 = scmp.lt.s32.totalorder %s5895_s24, 3 }
   0x4   : > { %p239_p2 = pnand %p4551_p0, %p238_p1 }
   0x6   : > { %242 = sbr.rel (%p239_p2) target bundleno = 1076 (0x434), region = 48 }
   0xd   : > { %v299_v0 = vld [vmem:[%s9365_s1 + $0x8] sm:$0xff]  ;;  %v302_v1 = vld [vmem:[%s9365_s1 + $0x20] sm:$0xff]  ;;  %s4552_s9 = sshll.u32 %s4547_s25, 4  ;;  %v301_v4 = vld [vmem:[%s9365_s1 + $0x18] sm:$0xff]  ;;  %v9380_v7 = vmov 0.0   ;;  %vm339_vm0 = vcmask 523264  }
   0xe   : > { %v298_v2 = vld [vmem:[%s9365_s1] sm:$0xff]  ;;  %v4823_v3 = vpack.c.bf16 %v302_v1, %v299_v0  ;;  %v305_v5 = vld [vmem:[%s9365_s1 + $0x38] sm:$0xff]  ;;  %v308_v6 = vld [vmem:[%s9365_s1 + $0x50] sm:$0xff]  ;;  %452 = vmatprep.mubr.f32.mxu0 %v9380_v7  ;;  %p271_p3 = scmp.lt.s32.totalorder %s4552_s9, 31 }
   0xf   : > { %v4825_v8 = vpack.c.bf16 %v301_v4, %v298_v2  ;;  %v4827_v9 = vpack.c.bf16 %v308_v6, %v305_v5  ;;  %v304_v10 = vld [vmem:[%s9365_s1 + $0x30] sm:$0xff]  ;;  %v307_v11 = vld [vmem:[%s9365_s1 + $0x48] sm:$0xff]  ;;  %v314_v13 = vld [vmem:[%s9365_s1 + $0x80] sm:$0xff] }
  0x10   : > { %v311_v12 = vld [vmem:[%s9365_s1 + $0x68] sm:$0xff]  ;;  %4824 = vmatprep.subr.bf16.mxu0 %v4823_v3  ;;  %s9517_s9 = smov (!%p271_p3, %s4552_s9), 31  ;;  %v4829_v14 = vpack.c.bf16 %v307_v11, %v304_v10  ;;  %v310_v15 = vld [vmem:[%s9365_s1 + $0x60] sm:$0xff]  ;;  %v313_v16 = vld [vmem:[%s9365_s1 + $0x78] sm:$0xff] }
  0x11   : > { %4826 = vmatpush1.bf16.msra.mxu0 %v4825_v8  ;;  %v4831_v17 = vpack.c.bf16 %v314_v13, %v311_v12  ;;  %v317_v18 = vld [vmem:[%s9365_s1 + $0x98] sm:$0xff]  ;;  %s4553_s8 = sshll.u32 %s9517_s9, 3  ;;  %v300_v19 = vld [vmem:[%s9365_s1 + $0x10] sm:$0xff]  ;;  %v303_v20 = vld [vmem:[%s9365_s1 + $0x28] sm:$0xff]  ;;  %v4833_v26 = vpack.c.bf16 %v313_v16, %v310_v15 }
  0x12   : > { %4828 = vmatprep.subr.bf16.mxu0 %v4827_v9  ;;  %v320_v21 = vld [vmem:[%s9365_s1 + $0xb0] sm:$0xff]  ;;  %s6003_s18 = scalar_lea.vmem %s9364_s0, %s4553_s8  ;;  %v4839_v22 = vpack.c.bf16 %v303_v20, %v300_v19  ;;  %v306_v23 = vld [vmem:[%s9365_s1 + $0x40] sm:$0xff]  ;;  %v309_v24 = vld [vmem:[%s9365_s1 + $0x58] sm:$0xff]  ;;  %s9328_s23 = scalar_lea.vmem %s9371_s7, %s4553_s8 }
  0x13   : > { %v4843_v25 = vpack.c.bf16 %v309_v24, %v306_v23  ;;  %v4835_v27 = vpack.c.bf16 %v320_v21, %v317_v18  ;;  %v316_v28 = vld [vmem:[%s9365_s1 + $0x90] sm:$0xff]  ;;  %v319_v29 = vld [vmem:[%s9365_s1 + $0xa8] sm:$0xff]  ;;  %v282_v30 = vld [vmem:[%s6003_s18] sm:$0xff] }
  0x14   : > { %4840 = vmatprep.subr.bf16.mxu1 %v4839_v22  ;;  %v312_v31 = vld [vmem:[%s9365_s1 + $0x70] sm:$0xff]  ;;  %4743 = vmatprep.mubr.msk.f32.mxu1 %vm339_vm0, %v282_v30  ;;  %v4837_v32 = vpack.c.bf16 %v319_v29, %v316_v28  ;;  %v315_v33 = vld [vmem:[%s9365_s1 + $0x88] sm:$0xff]  ;;  %v318_v34 = vld [vmem:[%s9365_s1 + $0xa0] sm:$0xff] }
  0x15   : > { %4830 = vmatpush1.bf16.msra.mxu0 %v4829_v14  ;;  %4842 = vmatpush3.bf16.msra.mxu1 %v4839_v22  ;;  %v4847_v35 = vpack.c.bf16 %v315_v33, %v312_v31  ;;  %v321_v36 = vld [vmem:[%s9365_s1 + $0xb8] sm:$0xff]  ;;  %v839_v37 = vld [vmem:[%s9367_s3 + $0x8] sm:$0xff]  ;;  %v838_v41 = vld [vmem:[%s9367_s3] sm:$0xff] }
  0x16   : > { %4832 = vmatprep.subr.bf16.mxu0 %v4831_v17  ;;  %4844 = vmatprep.subr.bf16.mxu1 %v4843_v25  ;;  %v851_v38 = vld [vmem:[%s9367_s3 + $0x68] sm:$0xff]  ;;  %v4851_v39 = vpack.c.bf16 %v321_v36, %v318_v34  ;;  %v841_v42 = vld [vmem:[%s9367_s3 + $0x18] sm:$0xff]  ;;  %v850_v44 = vld [vmem:[%s9367_s3 + $0x60] sm:$0xff] }
  0x17   : > { %v4855_v40 = vpack.c.bf16 %v851_v38, %v839_v37  ;;  %v853_v43 = vld [vmem:[%s9367_s3 + $0x78] sm:$0xff]  ;;  %v4857_v45 = vpack.c.bf16 %v850_v44, %v838_v41  ;;  %v863_v46 = vld [vmem:[%s9367_s3 + $0xc8] sm:$0xff]  ;;  %v840_v50 = vld [vmem:[%s9367_s3 + $0x10] sm:$0xff] }
  0x18   : > { %v875_v47 = vld [vmem:[%s9367_s3 + $0x128] sm:$0xff]  ;;  %v4951_v49 = vpack.c.bf16 %v853_v43, %v841_v42  ;;  %v852_v51 = vld [vmem:[%s9367_s3 + $0x70] sm:$0xff]  ;;  %v865_v52 = vld [vmem:[%s9367_s3 + $0xd8] sm:$0xff] }
  0x19   : > { %4834 = vmatpush1.bf16.msra.mxu0 %v4833_v26  ;;  %4846 = vmatpush3.bf16.msra.mxu1 %v4843_v25  ;;  %v4859_v48 = vpack.c.bf16 %v875_v47, %v863_v46  ;;  %v877_v53 = vld [vmem:[%s9367_s3 + $0x138] sm:$0xff]  ;;  %v862_v54 = vld [vmem:[%s9367_s3 + $0xc0] sm:$0xff]  ;;  %v283_v56 = vld [vmem:[%s6003_s18 + $0x8] sm:$0xff]  ;;  %v4953_v59 = vpack.c.bf16 %v852_v51, %v840_v50 }
  0x1a   : > { %4836 = vmatprep.subr.bf16.mxu0 %v4835_v27  ;;  %4848 = vmatprep.subr.bf16.mxu1 %v4847_v35  ;;  %v874_v55 = vld [vmem:[%s9367_s3 + $0x120] sm:$0xff]  ;;  %v887_v57 = vld [vmem:[%s9367_s3 + $0x188] sm:$0xff]  ;;  %v4955_v60 = vpack.c.bf16 %v877_v53, %v865_v52  ;;  %v864_v62 = vld [vmem:[%s9367_s3 + $0xd0] sm:$0xff] }
  0x1b   : > { %v899_v58 = vld [vmem:[%s9367_s3 + $0x1e8] sm:$0xff]  ;;  %v4861_v61 = vpack.c.bf16 %v874_v55, %v862_v54  ;;  %v876_v63 = vld [vmem:[%s9367_s3 + $0x130] sm:$0xff]  ;;  %v889_v0 = vld [vmem:[%s9367_s3 + $0x198] sm:$0xff] }
  0x1c   : > { %v4863_v1 = vpack.c.bf16 %v899_v58, %v887_v57  ;;  %v901_v2 = vld [vmem:[%s9367_s3 + $0x1f8] sm:$0xff]  ;;  %v886_v3 = vld [vmem:[%s9367_s3 + $0x180] sm:$0xff]  ;;  %v284_v5 = vld [vmem:[%s6003_s18 + $0x10] sm:$0xff]  ;;  %v4957_v10 = vpack.c.bf16 %v876_v63, %v864_v62 }
  0x1d   : > { %4838 = vmatpush1.bf16.msra.mxu0 %v4837_v32  ;;  %4850 = vmatpush3.bf16.msra.mxu1 %v4847_v35  ;;  %v898_v4 = vld [vmem:[%s9367_s3 + $0x1e0] sm:$0xff]  ;;  %v911_v6 = vld [vmem:[%s9367_s3 + $0x248] sm:$0xff]  ;;  %v285_v9 = vld [vmem:[%s6003_s18 + $0x18] sm:$0xff]  ;;  %v4959_v11 = vpack.c.bf16 %v901_v2, %v889_v0 }
  0x1e   : > { %4856 = vmatprep.subr.bf16.mxu0 %v4855_v40  ;;  %4852 = vmatprep.subr.bf16.mxu1 %v4851_v39  ;;  %v923_v8 = vld [vmem:[%s9367_s3 + $0x2a8] sm:$0xff]  ;;  %v4865_v12 = vpack.c.bf16 %v898_v4, %v886_v3  ;;  %v888_v13 = vld [vmem:[%s9367_s3 + $0x190] sm:$0xff]  ;;  %v913_v15 = vld [vmem:[%s9367_s3 + $0x258] sm:$0xff] }
  0x1f   : > { %v900_v14 = vld [vmem:[%s9367_s3 + $0x1f0] sm:$0xff]  ;;  %v4867_v16 = vpack.c.bf16 %v923_v8, %v911_v6  ;;  %v925_v17 = vld [vmem:[%s9367_s3 + $0x2b8] sm:$0xff]  ;;  %v910_v18 = vld [vmem:[%s9367_s3 + $0x240] sm:$0xff] }
  0x20   : > { %4556 = vmatmul.mubr.msk.f32.vlgmr.msra.gmra.mrb[0].mxu0 %vm339_vm0, %v282_v30  ;;  %v922_v19 = vld [vmem:[%s9367_s3 + $0x2a0] sm:$0xff]  ;;  %v935_v21 = vld [vmem:[%s9367_s3 + $0x308] sm:$0xff]  ;;  %v4961_v24 = vpack.c.bf16 %v900_v14, %v888_v13  ;;  %v4963_v25 = vpack.c.bf16 %v925_v17, %v913_v15  ;;  %v912_v27 = vld [vmem:[%s9367_s3 + $0x250] sm:$0xff] }
  0x21   : > { %458 = vmatprep.mubr.f32.mxu0 %v9380_v7  ;;  %4858 = vmatpush1.bf16.msra.mxu0 %v4857_v45  ;;  %v286_v20 = vld [vmem:[%s6003_s18 + $0x20] sm:$0xff]  ;;  %v947_v22 = vld [vmem:[%s9367_s3 + $0x368] sm:$0xff]  ;;  %v4869_v26 = vpack.c.bf16 %v922_v19, %v910_v18  ;;  %v924_v28 = vld [vmem:[%s9367_s3 + $0x2b0] sm:$0xff] }
  0x22   : > { %4854 = vmatpush3.bf16.msra.mxu1 %v4851_v39  ;;  %4860 = vmatprep.subr.bf16.mxu0 %v4859_v48  ;;  %v287_v23 = vld [vmem:[%s6003_s18 + $0x28] sm:$0xff]  ;;  %v937_v29 = vld [vmem:[%s9367_s3 + $0x318] sm:$0xff]  ;;  %v4871_v30 = vpack.c.bf16 %v947_v22, %v935_v21  ;;  %v934_v32 = vld [vmem:[%s9367_s3 + $0x300] sm:$0xff]  ;;  %v4965_v38 = vpack.c.bf16 %v924_v28, %v912_v27 }
  0x23   : > { %4952 = vmatprep.subr.bf16.mxu1 %v4951_v49  ;;  %v949_v31 = vld [vmem:[%s9367_s3 + $0x378] sm:$0xff]  ;;  %v946_v33 = vld [vmem:[%s9367_s3 + $0x360] sm:$0xff]  ;;  %v288_v34 = vld [vmem:[%s6003_s18 + $0x30] sm:$0xff] }
  0x24   : > { %4557 = vmatmul.mubr.msk.f32.gmra.mrb[2].mxu0 %vm339_vm0, %v283_v56  ;;  %v959_v35 = vld [vmem:[%s9367_s3 + $0x3c8] sm:$0xff]  ;;  %v6171_v37 = vld [vmem:[%s6003_s18 + $0x38] sm:$0xff]  ;;  %v4967_v39 = vpack.c.bf16 %v949_v31, %v937_v29  ;;  %v4873_v40 = vpack.c.bf16 %v946_v33, %v934_v32  ;;  %v936_v41 = vld [vmem:[%s9367_s3 + $0x310] sm:$0xff] }
  0x25   : > { %464 = vmatprep.mubr.f32.mxu0 %v9380_v7  ;;  %4744 = vmatmul.mubr.msk.f32.vlgmr.msra.gmra.mrb[0].mxu1 %vm339_vm0, %v283_v56  ;;  %v971_v36 = vld [vmem:[%s9367_s3 + $0x428] sm:$0xff]  ;;  %v948_v42 = vld [vmem:[%s9367_s3 + $0x370] sm:$0xff]  ;;  %v961_v43 = vld [vmem:[%s9367_s3 + $0x3d8] sm:$0xff] }
  0x26   : > { %4746 = vmatprep.mubr.msk.f32.mxu1 %vm339_vm0, %v284_v5  ;;  %4954 = vmatpush1.bf16.msra.mxu1 %v4953_v59  ;;  %v4875_v44 = vpack.c.bf16 %v971_v36, %v959_v35  ;;  %v973_v45 = vld [vmem:[%s9367_s3 + $0x438] sm:$0xff]  ;;  %v958_v46 = vld [vmem:[%s9367_s3 + $0x3c0] sm:$0xff]  ;;  %v983_v49 = vld [vmem:[%s9367_s3 + $0x488] sm:$0xff]  ;;  %v4969_v52 = vpack.c.bf16 %v948_v42, %v936_v41 }
  0x27   : > { %4956 = vmatprep.subr.bf16.mxu1 %v4955_v60  ;;  %4862 = vmatpush1.bf16.msra.mxu0 %v4861_v61  ;;  %v970_v47 = vld [vmem:[%s9367_s3 + $0x420] sm:$0xff]  ;;  %v995_v50 = vld [vmem:[%s9367_s3 + $0x4e8] sm:$0xff]  ;;  %v4971_v53 = vpack.c.bf16 %v973_v45, %v961_v43  ;;  %v960_v55 = vld [vmem:[%s9367_s3 + $0x3d0] sm:$0xff] }
  0x28   : > { %4558 = vmatmul.mubr.msk.f32.gmra.mrb[4].mxu0 %vm339_vm0, %v284_v5  ;;  %4864 = vmatprep.subr.bf16.mxu0 %v4863_v1  ;;  %v6195_v48 = vld [vmem:[%s6003_s18 + $0x40] sm:$0xff]  ;;  %v6206_v51 = vld [vmem:[%s6003_s18 + $0x48] sm:$0xff]  ;;  %v4877_v54 = vpack.c.bf16 %v970_v47, %v958_v46  ;;  %v972_v56 = vld [vmem:[%s9367_s3 + $0x430] sm:$0xff]  ;;  %v4879_v58 = vpack.c.bf16 %v995_v50, %v983_v49 }
  0x29   : > { %470 = vmatprep.mubr.f32.mxu0 %v9380_v7  ;;  %4747 = vmatmul.mubr.msk.f32.gmra.mrb[2].mxu1 %vm339_vm0, %v285_v9  ;;  %v985_v57 = vld [vmem:[%s9367_s3 + $0x498] sm:$0xff]  ;;  %v982_v60 = vld [vmem:[%s9367_s3 + $0x480] sm:$0xff]  ;;  %v6231_v62 = vld [vmem:[%s6003_s18 + $0x50] sm:$0xff]  ;;  %v4973_v2 = vpack.c.bf16 %v972_v56, %v960_v55 }
  0x2a   : > { %4749 = vmatprep.mubr.msk.f32.mxu1 %vm339_vm0, %v286_v20  ;;  %4958 = vmatpush1.bf16.msra.mxu1 %v4957_v10  ;;  %v997_v59 = vld [vmem:[%s9367_s3 + $0x4f8] sm:$0xff]  ;;  %v994_v61 = vld [vmem:[%s9367_s3 + $0x4e0] sm:$0xff]  ;;  %v1007_v63 = vld [vmem:[%s9367_s3 + $0x548] sm:$0xff] }
  0x2b   : > { %4960 = vmatprep.subr.bf16.mxu1 %v4959_v11  ;;  %4866 = vmatpush1.bf16.msra.mxu0 %v4865_v12  ;;  %v1019_v0 = vld [vmem:[%s9367_s3 + $0x5a8] sm:$0xff]  ;;  %v6242_v1 = vld [vmem:[%s6003_s18 + $0x58] sm:$0xff]  ;;  %v4975_v3 = vpack.c.bf16 %v997_v59, %v985_v57  ;;  %v4881_v4 = vpack.c.bf16 %v994_v61, %v982_v60  ;;  %v984_v5 = vld [vmem:[%s9367_s3 + $0x490] sm:$0xff] }
  0x2c   : > { %4559 = vmatmul.mubr.msk.f32.gmra.mrb[6].mxu0 %vm339_vm0, %v285_v9  ;;  %4868 = vmatprep.subr.bf16.mxu0 %v4867_v16  ;;  %v996_v6 = vld [vmem:[%s9367_s3 + $0x4f0] sm:$0xff]  ;;  %v1009_v8 = vld [vmem:[%s9367_s3 + $0x558] sm:$0xff]  ;;  %v4883_v9 = vpack.c.bf16 %v1019_v0, %v1007_v63  ;;  %v1006_v11 = vld [vmem:[%s9367_s3 + $0x540] sm:$0xff] }
  0x2d   : > { %476 = vmatprep.mubr.f32.mxu0 %v9380_v7  ;;  %4750 = vmatmul.mubr.msk.f32.gmra.mrb[4].mxu1 %vm339_vm0, %v287_v23  ;;  %v1021_v10 = vld [vmem:[%s9367_s3 + $0x5b8] sm:$0xff]  ;;  %v1018_v12 = vld [vmem:[%s9367_s3 + $0x5a0] sm:$0xff]  ;;  %v1031_v14 = vld [vmem:[%s9367_s3 + $0x608] sm:$0xff]  ;;  %v4977_v17 = vpack.c.bf16 %v996_v6, %v984_v5 }
  0x2e   : > { %4752 = vmatprep.mubr.msk.f32.mxu1 %vm339_vm0, %v288_v34  ;;  %4962 = vmatpush1.bf16.msra.mxu1 %v4961_v24  ;;  %v6267_v13 = vld [vmem:[%s6003_s18 + $0x60] sm:$0xff]  ;;  %v1043_v15 = vld [vmem:[%s9367_s3 + $0x668] sm:$0xff]  ;;  %v4979_v18 = vpack.c.bf16 %v1021_v10, %v1009_v8  ;;  %v4885_v19 = vpack.c.bf16 %v1018_v12, %v1006_v11  ;;  %v1020_v21 = vld [vmem:[%s9367_s3 + $0x5b0] sm:$0xff] }
  0x2f   : > { %4964 = vmatprep.subr.bf16.mxu1 %v4963_v25  ;;  %4870 = vmatpush1.bf16.msra.mxu0 %v4869_v26  ;;  %v6278_v16 = vld [vmem:[%s6003_s18 + $0x68] sm:$0xff]  ;;  %v1033_v22 = vld [vmem:[%s9367_s3 + $0x618] sm:$0xff]  ;;  %v1030_v25 = vld [vmem:[%s9367_s3 + $0x600] sm:$0xff] }
  0x30   : > { %4560 = vmatmul.mubr.msk.f32.gmra.mrb[8].mxu0 %vm339_vm0, %v286_v20  ;;  %4872 = vmatprep.subr.bf16.mxu0 %v4871_v30  ;;  %v1008_v20 = vld [vmem:[%s9367_s3 + $0x550] sm:$0xff]  ;;  %v1045_v24 = vld [vmem:[%s9367_s3 + $0x678] sm:$0xff]  ;;  %v1042_v26 = vld [vmem:[%s9367_s3 + $0x660] sm:$0xff] }
  0x31   : > { %482 = vmatprep.mubr.f32.mxu0 %v9380_v7  ;;  %4753 = vmatmul.mubr.msk.f32.gmra.mrb[6].mxu1 %vm339_vm0, %v6171_v37  ;;  %v6304_v27 = vld [vmem:[%s6003_s18 + $0x70] sm:$0xff]  ;;  %v1055_v28 = vld [vmem:[%s9367_s3 + $0x6c8] sm:$0xff]  ;;  %v6315_v30 = vld [vmem:[%s6003_s18 + $0x78] sm:$0xff]  ;;  %v4981_v31 = vpack.c.bf16 %v1020_v21, %v1008_v20  ;;  %v4983_v32 = vpack.c.bf16 %v1045_v24, %v1033_v22  ;;  %v4889_v33 = vpack.c.bf16 %v1042_v26, %v1030_v25 }
  0x32   : > { %4755 = vmatprep.mubr.msk.f32.mxu1 %vm339_vm0, %v6195_v48  ;;  %4966 = vmatpush1.bf16.msra.mxu1 %v4965_v38  ;;  %v1067_v29 = vld [vmem:[%s9367_s3 + $0x728] sm:$0xff]  ;;  %v1044_v35 = vld [vmem:[%s9367_s3 + $0x670] sm:$0xff]  ;;  %v1057_v36 = vld [vmem:[%s9367_s3 + $0x6d8] sm:$0xff] }
  0x33   : > { %4968 = vmatprep.subr.bf16.mxu1 %v4967_v39  ;;  %4874 = vmatpush1.bf16.msra.mxu0 %v4873_v40  ;;  %v1069_v38 = vld [vmem:[%s9367_s3 + $0x738] sm:$0xff]  ;;  %v1054_v39 = vld [vmem:[%s9367_s3 + $0x6c0] sm:$0xff]  ;;  %v1079_v41 = vld [vmem:[%s9367_s3 + $0x788] sm:$0xff] }
  0x34   : > { %4561 = vmatmul.mubr.msk.f32.gmra.mrb[10].mxu0 %vm339_vm0, %v287_v23  ;;  %4876 = vmatprep.subr.bf16.mxu0 %v4875_v44  ;;  %v4887_v23 = vpack.c.bf16 %v1043_v15, %v1031_v14  ;;  %v1066_v40 = vld [vmem:[%s9367_s3 + $0x720] sm:$0xff]  ;;  %v1091_v42 = vld [vmem:[%s9367_s3 + $0x7e8] sm:$0xff]  ;;  %v4987_v44 = vpack.c.bf16 %v1069_v38, %v1057_v36  ;;  %v1056_v46 = vld [vmem:[%s9367_s3 + $0x6d0] sm:$0xff] }
  0x35   : > { %488 = vmatprep.mubr.f32.mxu0 %v9380_v7  ;;  %4756 = vmatmul.mubr.msk.f32.gmra.mrb[8].mxu1 %vm339_vm0, %v6206_v51  ;;  %v4893_v45 = vpack.c.bf16 %v1066_v40, %v1054_v39  ;;  %v1068_v47 = vld [vmem:[%s9367_s3 + $0x730] sm:$0xff]  ;;  %v4895_v49 = vpack.c.bf16 %v1091_v42, %v1079_v41  ;;  %v1093_v50 = vld [vmem:[%s9367_s3 + $0x7f8] sm:$0xff]  ;;  %v1102_v0 = vld [vmem:[%s9367_s3 + $0x840] sm:$0xff] }
  0x36   : > { %4758 = vmatprep.mubr.msk.f32.mxu1 %vm339_vm0, %v6231_v62  ;;  %4970 = vmatpush1.bf16.msra.mxu1 %v4969_v52  ;;  %v1078_v52 = vld [vmem:[%s9367_s3 + $0x780] sm:$0xff]  ;;  %v4989_v55 = vpack.c.bf16 %v1068_v47, %v1056_v46  ;;  %v1092_v59 = vld [vmem:[%s9367_s3 + $0x7f0] sm:$0xff]  ;;  %v1105_v60 = vld [vmem:[%s9367_s3 + $0x858] sm:$0xff] }
  0x37   : > { %4972 = vmatprep.subr.bf16.mxu1 %v4971_v53  ;;  %4878 = vmatpush1.bf16.msra.mxu0 %v4877_v54  ;;  %v1090_v53 = vld [vmem:[%s9367_s3 + $0x7e0] sm:$0xff]  ;;  %v1115_v54 = vld [vmem:[%s9367_s3 + $0x8a8] sm:$0xff]  ;;  %v1117_v63 = vld [vmem:[%s9367_s3 + $0x8b8] sm:$0xff] }
  0x38   : > { %4562 = vmatmul.mubr.msk.f32.gmra.mrb[12].mxu0 %vm339_vm0, %v288_v34  ;;  %4880 = vmatprep.subr.bf16.mxu0 %v4879_v58  ;;  %v1032_v34 = vld [vmem:[%s9367_s3 + $0x610] sm:$0xff]  ;;  %v4897_v57 = vpack.c.bf16 %v1090_v53, %v1078_v52  ;;  %v4995_v5 = vpack.c.bf16 %v1117_v63, %v1105_v60  ;;  %v1129_v10 = vld [vmem:[%s9367_s3 + $0x918] sm:$0xff]  ;;  %v1126_v14 = vld [vmem:[%s9367_s3 + $0x900] sm:$0xff]  ;;  %v324_v63 = vlaneseq }
  0x39   : > { %494 = vmatprep.mubr.f32.mxu0 %v9380_v7  ;;  %4759 = vmatmul.mubr.msk.f32.gmra.mrb[10].mxu1 %vm339_vm0, %v6242_v1  ;;  %v4985_v43 = vpack.c.bf16 %v1044_v35, %v1032_v34  ;;  %v1080_v58 = vld [vmem:[%s9367_s3 + $0x790] sm:$0xff]  ;;  %v1141_v12 = vld [vmem:[%s9367_s3 + $0x978] sm:$0xff]  ;;  %v1138_v15 = vld [vmem:[%s9367_s3 + $0x960] sm:$0xff] }
  0x3a   : > { %4761 = vmatprep.mubr.msk.f32.mxu1 %vm339_vm0, %v6267_v13  ;;  %4974 = vmatpush1.bf16.msra.mxu1 %v4973_v2  ;;  %v1114_v2 = vld [vmem:[%s9367_s3 + $0x8a0] sm:$0xff]  ;;  %v1104_v8 = vld [vmem:[%s9367_s3 + $0x850] sm:$0xff]  ;;  %v4905_v20 = vpack.c.bf16 %v1138_v15, %v1126_v14  ;;  %v1165_v25 = vld [vmem:[%s9367_s3 + $0xa38] sm:$0xff] }
  0x3b   : > { %4976 = vmatprep.subr.bf16.mxu1 %v4975_v3  ;;  %4882 = vmatpush1.bf16.msra.mxu0 %v4881_v4  ;;  %v1139_v3 = vld [vmem:[%s9367_s3 + $0x968] sm:$0xff]  ;;  %v4993_v4 = vpack.c.bf16 %v1092_v59, %v1080_v58  ;;  %v4901_v6 = vpack.c.bf16 %v1114_v2, %v1102_v0  ;;  %v1128_v21 = vld [vmem:[%s9367_s3 + $0x910] sm:$0xff]  ;;  %v1150_v26 = vld [vmem:[%s9367_s3 + $0x9c0] sm:$0xff]  ;;  %v6524_v0 = vshrl.u32 %v324_v63, 7 }
  0x3c   : > { %4563 = vmatmul.mubr.msk.f32.gmra.mrb[14].mxu0 %vm339_vm0, %v6171_v37  ;;  %4884 = vmatprep.subr.bf16.mxu0 %v4883_v9  ;;  %v4891_v37 = vpack.c.bf16 %v1067_v29, %v1055_v28  ;;  %v1116_v9 = vld [vmem:[%s9367_s3 + $0x8b0] sm:$0xff]  ;;  %v1162_v28 = vld [vmem:[%s9367_s3 + $0xa20] sm:$0xff]  ;;  %v1187_v29 = vld [vmem:[%s9367_s3 + $0xae8] sm:$0xff] }
  0x3d   : > { %500 = vmatprep.mubr.f32.mxu0 %v9380_v7  ;;  %4762 = vmatmul.mubr.msk.f32.gmra.mrb[12].mxu1 %vm339_vm0, %v6278_v16  ;;  %v1140_v22 = vld [vmem:[%s9367_s3 + $0x970] sm:$0xff]  ;;  %v1177_v36 = vld [vmem:[%s9367_s3 + $0xa98] sm:$0xff]  ;;  %v1174_v39 = vld [vmem:[%s9367_s3 + $0xa80] sm:$0xff]  ;;  %9394 = vst [vmem:[#allocation4_spill] sm:$0xff] %v6524_v0  ;;  %v6527_v2 = vsub.s32 0, %v6524_v0 }
  0x3e   : > { %4764 = vmatprep.mubr.msk.f32.mxu1 %vm339_vm0, %v6304_v27  ;;  %4978 = vmatpush1.bf16.msra.mxu1 %v4977_v17  ;;  %v1163_v17 = vld [vmem:[%s9367_s3 + $0xa28] sm:$0xff]  ;;  %v1152_v34 = vld [vmem:[%s9367_s3 + $0x9d0] sm:$0xff]  ;;  %v1189_v38 = vld [vmem:[%s9367_s3 + $0xaf8] sm:$0xff] }
  0x3f   : > { %4980 = vmatprep.subr.bf16.mxu1 %v4979_v18  ;;  %4886 = vmatpush1.bf16.msra.mxu0 %v4885_v19  ;;  %v4997_v18 = vpack.c.bf16 %v1116_v9, %v1104_v8  ;;  %v4999_v19 = vpack.c.bf16 %v1141_v12, %v1129_v10  ;;  %v1164_v35 = vld [vmem:[%s9367_s3 + $0xa30] sm:$0xff]  ;;  %v1186_v40 = vld [vmem:[%s9367_s3 + $0xae0] sm:$0xff]  ;;  %v1199_v46 = vld [vmem:[%s9367_s3 + $0xb48] sm:$0xff]  ;;  %9395 = vst [vmem:[#allocation5_spill] sm:$0xff] %v6527_v2 }
  0x40   : > { %4564 = vmatmul.mubr.msk.f32.gmra.mrb[16].mxu0 %vm339_vm0, %v6195_v48  ;;  %4888 = vmatprep.subr.bf16.mxu0 %v4887_v23  ;;  %v1081_v48 = vld [vmem:[%s9367_s3 + $0x798] sm:$0xff]  ;;  %v5005_v41 = vpack.c.bf16 %v1164_v35, %v1152_v34  ;;  %v4913_v42 = vpack.c.bf16 %v1186_v40, %v1174_v39  ;;  %v1211_v47 = vld [vmem:[%s9367_s3 + $0xba8] sm:$0xff]  ;;  %v1222_v8 = vld [vmem:[%s9367_s3 + $0xc00] sm:$0xff] }
  0x41   : > { %506 = vmatprep.mubr.f32.mxu0 %v9380_v7  ;;  %4765 = vmatmul.mubr.msk.f32.gmra.mrb[14].mxu1 %vm339_vm0, %v6315_v30  ;;  %v4991_v56 = vpack.c.bf16 %v1093_v50, %v1081_v48  ;;  %v1153_v23 = vld [vmem:[%s9367_s3 + $0x9d8] sm:$0xff]  ;;  %v4915_v48 = vpack.c.bf16 %v1211_v47, %v1199_v46  ;;  %v1210_v50 = vld [vmem:[%s9367_s3 + $0xba0] sm:$0xff]  ;;  %v1224_v12 = vld [vmem:[%s9367_s3 + $0xc10] sm:$0xff] }
  0x42   : > { %4982 = vmatpush1.bf16.msra.mxu1 %v4981_v31  ;;  %v5001_v31 = vpack.c.bf16 %v1140_v22, %v1128_v21  ;;  %v1225_v58 = vld [vmem:[%s9367_s3 + $0xc18] sm:$0xff]  ;;  %v1234_v9 = vld [vmem:[%s9367_s3 + $0xc60] sm:$0xff]  ;;  %v1236_v14 = vld [vmem:[%s9367_s3 + $0xc70] sm:$0xff] }
  0x43   : > { %4984 = vmatprep.subr.bf16.mxu1 %v4983_v32  ;;  %4890 = vmatpush1.bf16.msra.mxu0 %v4889_v33  ;;  %v5003_v32 = vpack.c.bf16 %v1165_v25, %v1153_v23  ;;  %v4909_v33 = vpack.c.bf16 %v1162_v28, %v1150_v26  ;;  %v1237_v60 = vld [vmem:[%s9367_s3 + $0xc78] sm:$0xff]  ;;  %v1247_v15 = vld [vmem:[%s9367_s3 + $0xcc8] sm:$0xff]  ;;  %v4921_v22 = vpack.c.bf16 %v1234_v9, %v1222_v8  ;;  %v1258_v25 = vld [vmem:[%s9367_s3 + $0xd20] sm:$0xff] }
  0x44   : > { %4565 = vmatmul.mubr.msk.f32.gmra.mrb[18].mxu0 %vm339_vm0, %v6206_v51  ;;  %4892 = vmatprep.subr.bf16.mxu0 %v4891_v37  ;;  %v1103_v51 = vld [vmem:[%s9367_s3 + $0x848] sm:$0xff]  ;;  %v5017_v23 = vpack.c.bf16 %v1236_v14, %v1224_v12  ;;  %v1285_v39 = vld [vmem:[%s9367_s3 + $0xdf8] sm:$0xff]  ;;  %v1294_v63 = vld [vmem:[%s9367_s3 + $0xe40] sm:$0xff] }
  0x45   : > { %512 = vmatprep.mubr.f32.mxu0 %v9380_v7  ;;  %v4899_v61 = vpack.c.bf16 %v1115_v54, %v1103_v51  ;;  %v1200_v51 = vld [vmem:[%s9367_s3 + $0xb50] sm:$0xff]  ;;  %v1271_v34 = vld [vmem:[%s9367_s3 + $0xd88] sm:$0xff] }
  0x46   : > { %4986 = vmatpush1.bf16.msra.mxu1 %v4985_v43  ;;  %v1176_v43 = vld [vmem:[%s9367_s3 + $0xa90] sm:$0xff] }
  0x47   : > { %4988 = vmatprep.subr.bf16.mxu1 %v4987_v44  ;;  %4894 = vmatpush1.bf16.msra.mxu0 %v4893_v45  ;;  %v1188_v44 = vld [vmem:[%s9367_s3 + $0xaf0] sm:$0xff] }
  0x48   : > { %4566 = vmatmul.mubr.msk.f32.gmra.mrb[20].mxu0 %vm339_vm0, %v6231_v62  ;;  %4896 = vmatprep.subr.bf16.mxu0 %v4895_v49  ;;  %v1127_v62 = vld [vmem:[%s9367_s3 + $0x908] sm:$0xff]  ;;  %v5009_v45 = vpack.c.bf16 %v1188_v44, %v1176_v43  ;;  %v1213_v49 = vld [vmem:[%s9367_s3 + $0xbb8] sm:$0xff]  ;;  %v1212_v54 = vld [vmem:[%s9367_s3 + $0xbb0] sm:$0xff] }
  0x49   : > { %518 = vmatprep.mubr.f32.mxu0 %v9380_v7  ;;  %v4903_v11 = vpack.c.bf16 %v1139_v3, %v1127_v62  ;;  %v6532_v62 = vld [vmem:[%s9366_s2] sm:$0x7]  ;;  %v6535_v3 = vsub.s32 1, %v6524_v0  ;;  %v1296_v14 = vld [vmem:[%s9367_s3 + $0xe50] sm:$0xff] }
  0x4a   : > { %4990 = vmatpush1.bf16.msra.mxu1 %v4989_v55  ;;  %v5013_v55 = vpack.c.bf16 %v1212_v54, %v1200_v51  ;;  %v1270_v44 = vld [vmem:[%s9367_s3 + $0xd80] sm:$0xff]  ;;  %v1307_v54 = vld [vmem:[%s9367_s3 + $0xea8] sm:$0xff] }
  0x4b   : > { %4992 = vmatprep.subr.bf16.mxu1 %v4991_v56  ;;  %4898 = vmatpush1.bf16.msra.mxu0 %v4897_v57  ;;  %v1223_v56 = vld [vmem:[%s9367_s3 + $0xc08] sm:$0xff]  ;;  %9396 = vst [vmem:[#allocation6_spill] sm:$0xff] %v6535_v3 }
  0x4c   : > { %4567 = vmatmul.mubr.msk.f32.gmra.mrb[22].mxu0 %vm339_vm0, %v6242_v1  ;;  %4900 = vmatprep.subr.bf16.mxu0 %v4899_v61  ;;  %v1151_v1 = vld [vmem:[%s9367_s3 + $0x9c8] sm:$0xff]  ;;  %v5015_v61 = vpack.c.bf16 %v1237_v60, %v1225_v58 }
  0x4d   : > { %524 = vmatprep.mubr.f32.mxu0 %v9380_v7  ;;  %v4907_v24 = vpack.c.bf16 %v1163_v17, %v1151_v1  ;;  %v1235_v57 = vld [vmem:[%s9367_s3 + $0xc68] sm:$0xff] }
  0x4e   : > { %4994 = vmatpush1.bf16.msra.mxu1 %v4993_v4  ;;  %v4919_v59 = vpack.c.bf16 %v1235_v57, %v1223_v56  ;;  %v6539_v4 = vrot.slane %v6532_v62, %v6527_v2  ;;  %v1259_v17 = vld [vmem:[%s9367_s3 + $0xd28] sm:$0xff]  ;;  %v1309_v56 = vld [vmem:[%s9367_s3 + $0xeb8] sm:$0xff]  ;;  %v878_v2 = vld [vmem:[%s9367_s3 + $0x140] sm:$0xff] }
  0x4f   : > { %4996 = vmatprep.subr.bf16.mxu1 %v4995_v5  ;;  %4902 = vmatpush1.bf16.msra.mxu0 %v4901_v6  ;;  %v6543_v5 = vrot.slane %v6532_v62, %v6535_v3 }
  0x50   : > { %4568 = vmatmul.mubr.msk.f32.gmra.mrb[24].mxu0 %vm339_vm0, %v6267_v13  ;;  %4904 = vmatprep.subr.bf16.mxu0 %v4903_v11  ;;  %v1175_v13 = vld [vmem:[%s9367_s3 + $0xa88] sm:$0xff] }
  0x51   : > { %530 = vmatprep.mubr.f32.mxu0 %v9380_v7  ;;  %v4911_v37 = vpack.c.bf16 %v1187_v29, %v1175_v13  ;;  %v4923_v29 = vpack.c.bf16 %v1259_v17, %v1247_v15  ;;  %v1308_v15 = vld [vmem:[%s9367_s3 + $0xeb0] sm:$0xff] }
  0x52   : > { %4998 = vmatpush1.bf16.msra.mxu1 %v4997_v18  ;;  %v1249_v18 = vld [vmem:[%s9367_s3 + $0xcd8] sm:$0xff] }
  0x53   : > { %5000 = vmatprep.subr.bf16.mxu1 %v4999_v19  ;;  %4906 = vmatpush1.bf16.msra.mxu0 %v4905_v20  ;;  %v1261_v19 = vld [vmem:[%s9367_s3 + $0xd38] sm:$0xff] }
  0x54   : > { %4569 = vmatmul.mubr.msk.f32.gmra.mrb[26].mxu0 %vm339_vm0, %v6278_v16  ;;  %4908 = vmatprep.subr.bf16.mxu0 %v4907_v24  ;;  %v5007_v16 = vpack.c.bf16 %v1189_v38, %v1177_v36  ;;  %v1246_v24 = vld [vmem:[%s9367_s3 + $0xcc0] sm:$0xff]  ;;  %v1273_v38 = vld [vmem:[%s9367_s3 + $0xd98] sm:$0xff] }
  0x55   : > { %536 = vmatprep.mubr.f32.mxu0 %v9380_v7 }
  0x56   : > { %5002 = vmatpush1.bf16.msra.mxu1 %v5001_v31  ;;  %v5019_v31 = vpack.c.bf16 %v1261_v19, %v1249_v18  ;;  %v1331_v19 = vld [vmem:[%s9367_s3 + $0xf68] sm:$0xff] }
  0x57   : > { %5004 = vmatprep.subr.bf16.mxu1 %v5003_v32  ;;  %4910 = vmatpush1.bf16.msra.mxu0 %v4909_v33  ;;  %v1248_v32 = vld [vmem:[%s9367_s3 + $0xcd0] sm:$0xff] }
  0x58   : > { %4570 = vmatmul.mubr.msk.f32.gmra.mrb[28].mxu0 %vm339_vm0, %v6304_v27  ;;  %4912 = vmatprep.subr.bf16.mxu0 %v4911_v37  ;;  %v1201_v27 = vld [vmem:[%s9367_s3 + $0xb58] sm:$0xff]  ;;  %v1260_v33 = vld [vmem:[%s9367_s3 + $0xd30] sm:$0xff]  ;;  %v1283_v37 = vld [vmem:[%s9367_s3 + $0xde8] sm:$0xff] }
  0x59   : > { %542 = vmatprep.mubr.f32.mxu0 %v9380_v7  ;;  %v5011_v52 = vpack.c.bf16 %v1213_v49, %v1201_v27  ;;  %v5021_v43 = vpack.c.bf16 %v1260_v33, %v1248_v32  ;;  %v5023_v49 = vpack.c.bf16 %v1285_v39, %v1273_v38  ;;  %v1320_v38 = vld [vmem:[%s9367_s3 + $0xf10] sm:$0xff] }
  0x5a   : > { %5006 = vmatpush1.bf16.msra.mxu1 %v5005_v41  ;;  %v1332_v39 = vld [vmem:[%s9367_s3 + $0xf70] sm:$0xff] }
  0x5b   : > { %5008 = vmatprep.subr.bf16.mxu1 %v5007_v16  ;;  %4914 = vmatpush1.bf16.msra.mxu0 %v4913_v42  ;;  %v4925_v42 = vpack.c.bf16 %v1258_v25, %v1246_v24 }
  0x5c   : > { %4571 = vmatmul.mubr.msk.f32.gmra.mrb[30].mxu0 %vm339_vm0, %v6315_v30  ;;  %v1198_v30 = vld [vmem:[%s9367_s3 + $0xb40] sm:$0xff]  ;;  %4916 = vmatprep.subr.bf16.mxu0 %v4915_v48  ;;  %v4927_v48 = vpack.c.bf16 %v1283_v37, %v1271_v34 }
  0x5d   : > { %v4917_v53 = vpack.c.bf16 %v1210_v50, %v1198_v30  ;;  %v1272_v30 = vld [vmem:[%s9367_s3 + $0xd90] sm:$0xff] }
  0x5e   : > { %5010 = vmatpush1.bf16.msra.mxu1 %v5009_v45  ;;  %v1282_v45 = vld [vmem:[%s9367_s3 + $0xde0] sm:$0xff]  ;;  %v1284_v50 = vld [vmem:[%s9367_s3 + $0xdf0] sm:$0xff] }
  0x5f   : > { %5012 = vmatprep.subr.bf16.mxu1 %v5011_v52  ;;  %4918 = vmatpush1.bf16.msra.mxu0 %v4917_v53  ;;  %v1295_v52 = vld [vmem:[%s9367_s3 + $0xe48] sm:$0xff]  ;;  %v4929_v60 = vpack.c.bf16 %v1282_v45, %v1270_v44  ;;  %v1345_v45 = vld [vmem:[%s9367_s3 + $0xfd8] sm:$0xff] }
  0x60   : > { %4920 = vmatprep.subr.bf16.mxu0 %v4919_v59  ;;  %v1355_v44 = vld [vmem:[%s9367_s3 + $0x1028] sm:$0xff] }
  0x62   : > { %5014 = vmatpush1.bf16.msra.mxu1 %v5013_v55  ;;  %v1297_v55 = vld [vmem:[%s9367_s3 + $0xe58] sm:$0xff] }
  0x63   : > { %5016 = vmatprep.subr.bf16.mxu1 %v5015_v61  ;;  %v5025_v61 = vpack.c.bf16 %v1284_v50, %v1272_v30  ;;  %v5027_v12 = vpack.c.bf16 %v1309_v56, %v1297_v55  ;;  %v5033_v50 = vpack.c.bf16 %v1332_v39, %v1320_v38 }
  0xf3   : > { %v454_v6 = vpop.f32.mrb[0].mxu0 }
  0xf4   : > { %v455_v10 = vadd.f32 %v454_v6, %v6539_v4  ;;  %v456_v11 = vpop.f32.mrb[1].mxu0  ;;  %v1306_v6 = vld [vmem:[%s9367_s3 + $0xea0] sm:$0xff] }
  0xf5   : > { %v457_v1 = vadd.f32 %v456_v11, %v6543_v5  ;;  %v4931_v11 = vpack.c.bf16 %v1307_v54, %v1295_v52  ;;  %v1342_v52 = vld [vmem:[%s9367_s3 + $0xfc0] sm:$0xff] }
  0xf6   : > { %v6579_v26 = vmax.f32 %v455_v10, 0.0 }
  0xf7   : > { %v6571_v20 = vmax.f32 %v457_v1, 0.0  ;;  %v460_v21 = vpop.f32.mrb[2].mxu0  ;;  %v1319_v1 = vld [vmem:[%s9367_s3 + $0xf08] sm:$0xff] }
  0xf8   : > { %v461_v28 = vadd.f32 %v460_v21, %v6539_v4  ;;  %v462_v13 = vpop.f32.mrb[3].mxu0  ;;  %v6591_v35 = vpop.f32.mrb[0].mxu1  ;;  %v1321_v21 = vld [vmem:[%s9367_s3 + $0xf18] sm:$0xff] }
  0xf9   : > { %v463_v36 = vadd.f32 %v462_v13, %v6543_v5  ;;  %1542 = vmatprep.mubr.f32.mxu0 %v6571_v20  ;;  %1864 = vmatprep.mubr.f32.mxu1 %v6571_v20  ;;  %v6605_v40 = vpop.f32.mrb[1].mxu1  ;;  %v5029_v13 = vpack.c.bf16 %v1308_v15, %v1296_v14  ;;  %v1381_v14 = vld [vmem:[%s9367_s3 + $0x10f8] sm:$0xff] }
  0xfa   : > { %1543 = vmatmul.mubr.f32.vlgmr.msra.gmra.mrb[32].mxu0 %v6579_v26  ;;  %1865 = vmatmul.mubr.f32.vlgmr.msra.gmra.mrb[16].mxu1 %v6579_v26  ;;  %v6617_v46 = vmax.f32 %v461_v28, 0.0  ;;  %v4933_v28 = vpack.c.bf16 %v1306_v6, %v1294_v63  ;;  %v1356_v63 = vld [vmem:[%s9367_s3 + $0x1030] sm:$0xff]  ;;  %v1367_v6 = vld [vmem:[%s9367_s3 + $0x1088] sm:$0xff] }
  0xfb   : > { %v6609_v41 = vmax.f32 %v463_v36, 0.0  ;;  %4922 = vmatpush1.bf16.msra.mxu0 %v4921_v22  ;;  %5018 = vmatpush1.bf16.msra.mxu1 %v5017_v23  ;;  %v466_v16 = vpop.f32.mrb[4].mxu0  ;;  %v1333_v22 = vld [vmem:[%s9367_s3 + $0xf78] sm:$0xff]  ;;  %v4935_v36 = vpack.c.bf16 %v1331_v19, %v1319_v1 }
  0xfc   : > { %v467_v47 = vadd.f32 %v466_v16, %v6539_v4  ;;  %v468_v27 = vpop.f32.mrb[5].mxu0  ;;  %4924 = vmatprep.subr.bf16.mxu0 %v4923_v29  ;;  %5020 = vmatprep.subr.bf16.mxu1 %v5019_v31  ;;  %v6629_v53 = vpop.f32.mrb[2].mxu1  ;;  %v1318_v29 = vld [vmem:[%s9367_s3 + $0xf00] sm:$0xff]  ;;  %v5031_v37 = vpack.c.bf16 %v1333_v22, %v1321_v21  ;;  %v1343_v16 = vld [vmem:[%s9367_s3 + $0xfc8] sm:$0xff] }
  0xfd   : > { %v469_v51 = vadd.f32 %v468_v27, %v6543_v5  ;;  %1548 = vmatprep.mubr.f32.mxu0 %v6609_v41  ;;  %1870 = vmatprep.mubr.f32.mxu1 %v6609_v41  ;;  %v6643_v57 = vpop.f32.mrb[3].mxu1  ;;  %v1330_v31 = vld [vmem:[%s9367_s3 + $0xf60] sm:$0xff] }
  0xfe   : > { %1549 = vmatmul.mubr.f32.gmra.mrb[34].mxu0 %v6617_v46  ;;  %1871 = vmatmul.mubr.f32.gmra.mrb[18].mxu1 %v6617_v46  ;;  %v6655_v8 = vmax.f32 %v467_v47, 0.0  ;;  %v1357_v47 = vld [vmem:[%s9367_s3 + $0x1038] sm:$0xff]  ;;  %v4937_v30 = vpack.c.bf16 %v1330_v31, %v1318_v29  ;;  %v1366_v22 = vld [vmem:[%s9367_s3 + $0x1080] sm:$0xff] }
  0xff   : > { %v6647_v58 = vmax.f32 %v469_v51, 0.0  ;;  %v472_v59 = vpop.f32.mrb[6].mxu0  ;;  %4926 = vmatpush1.bf16.msra.mxu0 %v4925_v42  ;;  %5022 = vmatpush1.bf16.msra.mxu1 %v5021_v43  ;;  %v1354_v51 = vld [vmem:[%s9367_s3 + $0x1020] sm:$0xff] }
 0x100   : > { %v473_v9 = vadd.f32 %v472_v59, %v6539_v4  ;;  %v474_v10 = vpop.f32.mrb[7].mxu0  ;;  %4928 = vmatprep.subr.bf16.mxu0 %v4927_v48  ;;  %5024 = vmatprep.subr.bf16.mxu1 %v5023_v49  ;;  %v6667_v17 = vpop.f32.mrb[4].mxu1  ;;  %v4939_v59 = vpack.c.bf16 %v1355_v44, %v1343_v16  ;;  %v4941_v19 = vpack.c.bf16 %v1354_v51, %v1342_v52  ;;  %v1403_v16 = vld [vmem:[%s9367_s3 + $0x11a8] sm:$0xff]  ;;  %v1405_v44 = vld [vmem:[%s9367_s3 + $0x11b8] sm:$0xff]  ;;  %v1390_v52 = vld [vmem:[%s9367_s3 + $0x1140] sm:$0xff] }
 0x101   : > { %9397 = vst [vmem:[#allocation7_spill] sm:$0xff] %v6647_v58  ;;  %v475_v18 = vadd.f32 %v474_v10, %v6543_v5  ;;  %1554 = vmatprep.mubr.f32.mxu0 %v6647_v58  ;;  %1876 = vmatprep.mubr.f32.mxu1 %v6647_v58  ;;  %v6681_v23 = vpop.f32.mrb[5].mxu1  ;;  %v1402_v51 = vld [vmem:[%s9367_s3 + $0x11a0] sm:$0xff] }
 0x102   : > { %1555 = vmatmul.mubr.f32.gmra.mrb[36].mxu0 %v6655_v8  ;;  %1877 = vmatmul.mubr.f32.gmra.mrb[20].mxu1 %v6655_v8  ;;  %v6693_v32 = vmax.f32 %v473_v9, 0.0 }
 0x103   : > { %v6685_v24 = vmax.f32 %v475_v18, 0.0  ;;  %v478_v25 = vpop.f32.mrb[8].mxu0  ;;  %4930 = vmatpush1.bf16.msra.mxu0 %v4929_v60  ;;  %5026 = vmatpush1.bf16.msra.mxu1 %v5025_v61  ;;  %v5035_v60 = vpack.c.bf16 %v1357_v47, %v1345_v45  ;;  %v1344_v61 = vld [vmem:[%s9367_s3 + $0xfd0] sm:$0xff] }
 0x104   : > { %v479_v33 = vadd.f32 %v478_v25, %v6539_v4  ;;  %v480_v34 = vpop.f32.mrb[9].mxu0  ;;  %4932 = vmatprep.subr.bf16.mxu0 %v4931_v11  ;;  %5028 = vmatprep.subr.bf16.mxu1 %v5027_v12  ;;  %v6705_v42 = vpop.f32.mrb[6].mxu1  ;;  %v1379_v11 = vld [vmem:[%s9367_s3 + $0x10e8] sm:$0xff]  ;;  %v1369_v12 = vld [vmem:[%s9367_s3 + $0x1098] sm:$0xff]  ;;  %v5037_v21 = vpack.c.bf16 %v1356_v63, %v1344_v61  ;;  %v1378_v25 = vld [vmem:[%s9367_s3 + $0x10e0] sm:$0xff] }
 0x105   : > { %v481_v43 = vadd.f32 %v480_v34, %v6543_v5  ;;  %1560 = vmatprep.mubr.f32.mxu0 %v6685_v24  ;;  %1882 = vmatprep.mubr.f32.mxu1 %v6685_v24  ;;  %v6719_v27 = vpop.f32.mrb[7].mxu1  ;;  %v4943_v31 = vpack.c.bf16 %v1379_v11, %v1367_v6  ;;  %v1368_v34 = vld [vmem:[%s9367_s3 + $0x1090] sm:$0xff] }
 0x106   : > { %1561 = vmatmul.mubr.f32.gmra.mrb[38].mxu0 %v6693_v32  ;;  %1883 = vmatmul.mubr.f32.gmra.mrb[22].mxu1 %v6693_v32  ;;  %v6731_v54 = vmax.f32 %v479_v33, 0.0  ;;  %v5039_v33 = vpack.c.bf16 %v1381_v14, %v1369_v12  ;;  %v1392_v63 = vld [vmem:[%s9367_s3 + $0x1150] sm:$0xff]  ;;  %v855_v14 = vld [vmem:[%s9367_s3 + $0x88] sm:$0xff] }
 0x107   : > { %v6723_v48 = vmax.f32 %v481_v43, 0.0  ;;  %v484_v49 = vpop.f32.mrb[10].mxu0  ;;  %4934 = vmatpush1.bf16.msra.mxu0 %v4933_v28  ;;  %5030 = vmatpush1.bf16.msra.mxu1 %v5029_v13  ;;  %v1393_v43 = vld [vmem:[%s9367_s3 + $0x1158] sm:$0xff]  ;;  %v1404_v6 = vld [vmem:[%s9367_s3 + $0x11b0] sm:$0xff] }
 0x108   : > { %v485_v55 = vadd.f32 %v484_v49, %v6539_v4  ;;  %v486_v56 = vpop.f32.mrb[11].mxu0  ;;  %4936 = vmatprep.subr.bf16.mxu0 %v4935_v36  ;;  %5032 = vmatprep.subr.bf16.mxu1 %v5031_v37  ;;  %v6743_v9 = vpop.f32.mrb[8].mxu1  ;;  %v1380_v36 = vld [vmem:[%s9367_s3 + $0x10f0] sm:$0xff]  ;;  %v1391_v37 = vld [vmem:[%s9367_s3 + $0x1148] sm:$0xff]  ;;  %v5043_v61 = vpack.c.bf16 %v1405_v44, %v1393_v43 }
 0x109   : > { %v487_v10 = vadd.f32 %v486_v56, %v6543_v5  ;;  %1566 = vmatprep.mubr.f32.mxu0 %v6723_v48  ;;  %1888 = vmatprep.mubr.f32.mxu1 %v6723_v48  ;;  %v6757_v15 = vpop.f32.mrb[9].mxu1 }
 0x10a   : > { %1567 = vmatmul.mubr.f32.gmra.mrb[40].mxu0 %v6731_v54  ;;  %1889 = vmatmul.mubr.f32.gmra.mrb[24].mxu1 %v6731_v54  ;;  %v6769_v28 = vmax.f32 %v485_v55, 0.0 }
 0x10b   : > { %v6761_v1 = vmax.f32 %v487_v10, 0.0  ;;  %v490_v18 = vpop.f32.mrb[12].mxu0  ;;  %4938 = vmatpush1.bf16.msra.mxu0 %v4937_v30  ;;  %5034 = vmatpush1.bf16.msra.mxu1 %v5033_v50  ;;  %v4945_v30 = vpack.c.bf16 %v1378_v25, %v1366_v22  ;;  %v5041_v50 = vpack.c.bf16 %v1380_v36, %v1368_v34  ;;  %v843_v10 = vld [vmem:[%s9367_s3 + $0x28] sm:$0xff] }
 0x10c   : > { %v491_v13 = vadd.f32 %v490_v18, %v6539_v4  ;;  %v492_v29 = vpop.f32.mrb[13].mxu0  ;;  %4940 = vmatprep.subr.bf16.mxu0 %v4939_v59  ;;  %5036 = vmatprep.subr.bf16.mxu1 %v5035_v60  ;;  %v6781_v38 = vpop.f32.mrb[10].mxu1  ;;  %v4947_v60 = vpack.c.bf16 %v1403_v16, %v1391_v37  ;;  %v845_v18 = vld [vmem:[%s9367_s3 + $0x38] sm:$0xff]  ;;  %v5047_v36 = vpack.c.bf16 %v855_v14, %v843_v10 }
 0x10d   : > { %v493_v39 = vadd.f32 %v492_v29, %v6543_v5  ;;  %1572 = vmatprep.mubr.f32.mxu0 %v6761_v1  ;;  %1894 = vmatprep.mubr.f32.mxu1 %v6761_v1  ;;  %v6795_v45 = vpop.f32.mrb[11].mxu1  ;;  %v5045_v29 = vpack.c.bf16 %v1404_v6, %v1392_v63 }
 0x10e   : > { %1573 = vmatmul.mubr.f32.gmra.mrb[42].mxu0 %v6769_v28  ;;  %1895 = vmatmul.mubr.f32.gmra.mrb[26].mxu1 %v6769_v28  ;;  %v6807_v55 = vmax.f32 %v491_v13, 0.0  ;;  %v4949_v13 = vpack.c.bf16 %v1402_v51, %v1390_v52 }
 0x10f   : > { %v6799_v47 = vmax.f32 %v493_v39, 0.0  ;;  %v496_v49 = vpop.f32.mrb[14].mxu0  ;;  %4942 = vmatpush1.bf16.msra.mxu0 %v4941_v19  ;;  %5038 = vmatpush1.bf16.msra.mxu1 %v5037_v21  ;;  %v857_v19 = vld [vmem:[%s9367_s3 + $0x98] sm:$0xff] }
 0x110   : > { %v497_v56 = vadd.f32 %v496_v49, %v6539_v4  ;;  %v498_v59 = vpop.f32.mrb[15].mxu0  ;;  %4944 = vmatprep.subr.bf16.mxu0 %v4943_v31  ;;  %5040 = vmatprep.subr.bf16.mxu1 %v5039_v33  ;;  %v6819_v11 = vpop.f32.mrb[12].mxu1  ;;  %v5143_v37 = vpack.c.bf16 %v857_v19, %v845_v18 }
 0x111   : > { %v499_v12 = vadd.f32 %v498_v59, %v6543_v5  ;;  %1578 = vmatprep.mubr.f32.mxu0 %v6799_v47  ;;  %1900 = vmatprep.mubr.f32.mxu1 %v6799_v47  ;;  %v6833_v21 = vpop.f32.mrb[13].mxu1 }
 0x112   : > { %1579 = vmatmul.mubr.f32.gmra.mrb[44].mxu0 %v6807_v55  ;;  %1901 = vmatmul.mubr.f32.gmra.mrb[28].mxu1 %v6807_v55  ;;  %v6839_v31 = vmax.f32 %v497_v56, 0.0 }
 0x113   : > { %v6837_v22 = vmax.f32 %v499_v12, 0.0  ;;  %v502_v25 = vpop.f32.mrb[16].mxu0  ;;  %4946 = vmatpush1.bf16.msra.mxu0 %v4945_v30  ;;  %5042 = vmatpush1.bf16.msra.mxu1 %v5041_v50 }
 0x114   : > { %v503_v33 = vadd.f32 %v502_v25, %v6539_v4  ;;  %v504_v34 = vpop.f32.mrb[17].mxu0  ;;  %4948 = vmatprep.subr.bf16.mxu0 %v4947_v60  ;;  %5044 = vmatprep.subr.bf16.mxu1 %v5043_v61  ;;  %v6842_v39 = vpop.f32.mrb[14].mxu1 }
 0x115   : > { %v505_v16 = vadd.f32 %v504_v34, %v6543_v5  ;;  %1584 = vmatprep.mubr.f32.mxu0 %v6837_v22  ;;  %1906 = vmatprep.mubr.f32.mxu1 %v6837_v22  ;;  %v6847_v43 = vpop.f32.mrb[15].mxu1 }
 0x116   : > { %1585 = vmatmul.mubr.f32.gmra.mrb[46].mxu0 %v6839_v31  ;;  %1907 = vmatmul.mubr.f32.gmra.mrb[30].mxu1 %v6839_v31  ;;  %v6853_v30 = vmax.f32 %v503_v33, 0.0 }
 0x117   : > { %v6851_v44 = vmax.f32 %v505_v16, 0.0  ;;  %v508_v49 = vpop.f32.mrb[18].mxu0  ;;  %4950 = vmatpush1.bf16.msra.mxu0 %v4949_v13  ;;  %5046 = vmatpush1.bf16.msra.mxu1 %v5045_v29 }
 0x118   : > { %v509_v50 = vadd.f32 %v508_v49, %v6539_v4  ;;  %v510_v52 = vpop.f32.mrb[19].mxu0  ;;  %5048 = vmatprep.subr.bf16.mxu0 %v5047_v36  ;;  %5144 = vmatprep.subr.bf16.mxu1 %v5143_v37 }
 0x119   : > { %v511_v51 = vadd.f32 %v510_v52, %v6543_v5  ;;  %1590 = vmatprep.mubr.f32.mxu0 %v6851_v44  ;;  %1912 = vmatprep.mubr.f32.mxu1 %v6851_v44 }
 0x11a   : > { %1591 = vmatmul.mubr.f32.gmra.mrb[48].mxu0 %v6853_v30  ;;  %1913 = vmatmul.mubr.f32.gmra.mrb[32].mxu1 %v6853_v30  ;;  %v6863_v60 = vmax.f32 %v509_v50, 0.0 }
 0x11b   : > { %v6861_v56 = vmax.f32 %v511_v51, 0.0  ;;  %v514_v59 = vpop.f32.mrb[20].mxu0 }
 0x11c   : > { %v515_v61 = vadd.f32 %v514_v59, %v6539_v4  ;;  %v516_v63 = vpop.f32.mrb[21].mxu0 }
 0x11d   : > { %v517_v6 = vadd.f32 %v516_v63, %v6543_v5  ;;  %1596 = vmatprep.mubr.f32.mxu0 %v6861_v56  ;;  %1918 = vmatprep.mubr.f32.mxu1 %v6861_v56 }
 0x11e   : > { %1597 = vmatmul.mubr.f32.gmra.mrb[50].mxu0 %v6863_v60  ;;  %1919 = vmatmul.mubr.f32.gmra.mrb[34].mxu1 %v6863_v60  ;;  %v6873_v14 = vmax.f32 %v515_v61, 0.0  ;;  %v6902_v61 = vsub.s32 2, %v6524_v0  ;;  %v868_v0 = vld [vmem:[%s9367_s3 + $0xf0] sm:$0xff] }
 0x11f   : > { %v6871_v10 = vmax.f32 %v517_v6, 0.0  ;;  %v520_v12 = vpop.f32.mrb[22].mxu0 }
 0x120   : > { %v521_v18 = vadd.f32 %v520_v12, %v6539_v4  ;;  %v522_v19 = vpop.f32.mrb[23].mxu0  ;;  %9398 = vst [vmem:[#allocation8_spill] sm:$0xff] %v6902_v61 }
 0x121   : > { %v523_v25 = vadd.f32 %v522_v19, %v6543_v5  ;;  %1602 = vmatprep.mubr.f32.mxu0 %v6871_v10  ;;  %1924 = vmatprep.mubr.f32.mxu1 %v6871_v10 }
 0x122   : > { %1603 = vmatmul.mubr.f32.gmra.mrb[52].mxu0 %v6873_v14  ;;  %1925 = vmatmul.mubr.f32.gmra.mrb[36].mxu1 %v6873_v14  ;;  %v6883_v33 = vmax.f32 %v521_v18, 0.0 }
 0x123   : > { %v6881_v13 = vmax.f32 %v523_v25, 0.0  ;;  %v526_v29 = vpop.f32.mrb[24].mxu0 }
 0x124   : > { %v527_v34 = vadd.f32 %v526_v29, %v6539_v4  ;;  %v528_v36 = vpop.f32.mrb[25].mxu0  ;;  %v6916_v29 = vrot.slane %v6532_v62, %v6902_v61  ;;  %v866_v61 = vld [vmem:[%s9367_s3 + $0xe0] sm:$0xff] }
 0x125   : > { %v529_v37 = vadd.f32 %v528_v36, %v6543_v5  ;;  %1608 = vmatprep.mubr.f32.mxu0 %v6881_v13  ;;  %1930 = vmatprep.mubr.f32.mxu1 %v6881_v13 }
 0x126   : > { %1609 = vmatmul.mubr.f32.gmra.mrb[54].mxu0 %v6883_v33  ;;  %1931 = vmatmul.mubr.f32.gmra.mrb[38].mxu1 %v6883_v33  ;;  %v6893_v50 = vmax.f32 %v527_v34, 0.0  ;;  %v616_v62 = vadd.f32 %v6605_v40, %v6916_v29  ;;  %v856_v40 = vld [vmem:[%s9367_s3 + $0x90] sm:$0xff]  ;;  %v621_v3 = vadd.f32 %v6591_v35, %v6916_v29  ;;  %v626_v35 = vadd.f32 %v6643_v57, %v6916_v29  ;;  %v890_v57 = vld [vmem:[%s9367_s3 + $0x1a0] sm:$0xff] }
 0x127   : > { %v6891_v16 = vmax.f32 %v529_v37, 0.0  ;;  %v532_v49 = vpop.f32.mrb[26].mxu0 }
 0x128   : > { %v533_v52 = vadd.f32 %v532_v49, %v6539_v4  ;;  %v534_v51 = vpop.f32.mrb[27].mxu0 }
 0x129   : > { %v535_v59 = vadd.f32 %v534_v51, %v6543_v5  ;;  %1614 = vmatprep.mubr.f32.mxu0 %v6891_v16  ;;  %1936 = vmatprep.mubr.f32.mxu1 %v6891_v16 }
 0x12a   : > { %1615 = vmatmul.mubr.f32.gmra.mrb[56].mxu0 %v6893_v50  ;;  %1937 = vmatmul.mubr.f32.gmra.mrb[40].mxu1 %v6893_v50  ;;  %v6906_v12 = vmax.f32 %v533_v52, 0.0 }
 0x12b   : > { %v6904_v63 = vmax.f32 %v535_v59, 0.0  ;;  %v538_v6 = vpop.f32.mrb[28].mxu0 }
 0x12c   : > { %v539_v18 = vadd.f32 %v538_v6, %v6539_v4  ;;  %v540_v19 = vpop.f32.mrb[29].mxu0 }
 0x12d   : > { %v541_v25 = vadd.f32 %v540_v19, %v6543_v5  ;;  %1620 = vmatprep.mubr.f32.mxu0 %v6904_v63  ;;  %1942 = vmatprep.mubr.f32.mxu1 %v6904_v63  ;;  %v867_v19 = vld [vmem:[%s9367_s3 + $0xe8] sm:$0xff] }
 0x12e   : > { %1621 = vmatmul.mubr.f32.gmra.mrb[58].mxu0 %v6906_v12  ;;  %1943 = vmatmul.mubr.f32.gmra.mrb[42].mxu1 %v6906_v12  ;;  %v6920_v37 = vmax.f32 %v539_v18, 0.0  ;;  %v844_v18 = vld [vmem:[%s9367_s3 + $0x30] sm:$0xff] }
 0x12f   : > { %v6918_v34 = vmax.f32 %v541_v25, 0.0  ;;  %v544_v36 = vpop.f32.mrb[30].mxu0  ;;  %v6951_v25 = vmax.f32 %v616_v62, 0.0  ;;  %v5145_v62 = vpack.c.bf16 %v856_v40, %v844_v18  ;;  %v891_v40 = vld [vmem:[%s9367_s3 + $0x1a8] sm:$0xff] }
 0x130   : > { %v545_v49 = vadd.f32 %v544_v36, %v6539_v4  ;;  %v546_v52 = vpop.f32.mrb[31].mxu0  ;;  %v842_v4 = vld [vmem:[%s9367_s3 + $0x20] sm:$0xff]  ;;  %v879_v36 = vld [vmem:[%s9367_s3 + $0x148] sm:$0xff] }
 0x131   : > { %v547_v51 = vadd.f32 %v546_v52, %v6543_v5  ;;  %1626 = vmatprep.mubr.f32.mxu0 %v6918_v34  ;;  %1948 = vmatprep.mubr.f32.mxu1 %v6918_v34  ;;  %v854_v5 = vld [vmem:[%s9367_s3 + $0x80] sm:$0xff]  ;;  %9401 = vst [vmem:[#allocation11_spill] sm:$0xff] %v6951_v25  ;;  %v881_v52 = vld [vmem:[%s9367_s3 + $0x158] sm:$0xff] }
 0x132   : > { %1627 = vmatmul.mubr.f32.gmra.mrb[60].mxu0 %v6920_v37  ;;  %1949 = vmatmul.mubr.f32.gmra.mrb[44].mxu1 %v6920_v37  ;;  %v6935_v6 = vmax.f32 %v545_v49, 0.0  ;;  %v869_v49 = vld [vmem:[%s9367_s3 + $0xf8] sm:$0xff] }
 0x133   : > { %v6930_v59 = vmax.f32 %v547_v51, 0.0  ;;  %v5049_v51 = vpack.c.bf16 %v854_v5, %v842_v4  ;;  %v880_v4 = vld [vmem:[%s9367_s3 + $0x150] sm:$0xff]  ;;  %v5051_v5 = vpack.c.bf16 %v879_v36, %v867_v19  ;;  %v5147_v18 = vpack.c.bf16 %v881_v52, %v869_v49  ;;  %v893_v19 = vld [vmem:[%s9367_s3 + $0x1b8] sm:$0xff] }
 0x134   : > { %9400 = vst [vmem:[#allocation10_spill] sm:$0xff] %v6935_v6  ;;  %v905_v36 = vld [vmem:[%s9367_s3 + $0x218] sm:$0xff]  ;;  %v5053_v49 = vpack.c.bf16 %v878_v2, %v866_v61  ;;  %v5149_v52 = vpack.c.bf16 %v880_v4, %v868_v0  ;;  %v904_v0 = vld [vmem:[%s9367_s3 + $0x210] sm:$0xff]  ;;  %v915_v61 = vld [vmem:[%s9367_s3 + $0x268] sm:$0xff] }
 0x135   : > { %9399 = vst [vmem:[#allocation9_spill] sm:$0xff] %v6930_v59  ;;  %1632 = vmatprep.mubr.f32.mxu0 %v6930_v59  ;;  %1954 = vmatprep.mubr.f32.mxu1 %v6930_v59  ;;  %v902_v59 = vld [vmem:[%s9367_s3 + $0x200] sm:$0xff]  ;;  %v927_v4 = vld [vmem:[%s9367_s3 + $0x2c8] sm:$0xff] }
 0x136   : > { %1633 = vmatmul.mubr.f32.gmra.mrb[62].mxu0 %v6935_v6  ;;  %1955 = vmatmul.mubr.f32.gmra.mrb[46].mxu1 %v6935_v6  ;;  %v9402_v6 = vmov 0.0  }
 0x137   : > { %1703 = vmatprep.mubr.f32.mxu0 %v9380_v7  ;;  %2025 = vmatprep.mubr.f32.mxu1 %v9380_v7  ;;  %v903_v7 = vld [vmem:[%s9367_s3 + $0x208] sm:$0xff] }
 0x138   : > { %v5055_v2 = vpack.c.bf16 %v903_v7, %v891_v40  ;;  %v929_v7 = vld [vmem:[%s9367_s3 + $0x2d8] sm:$0xff] }
 0x13a   : > { %1704 = vmatmul.mubr.f32.vlgmr.msra.gmra.mrb[32].mxu0 %v6951_v25  ;;  %2026 = vmatmul.mubr.f32.vlgmr.msra.gmra.mrb[16].mxu1 %v6951_v25  ;;  %v6999_v25 = vmax.f32 %v621_v3, 0.0  ;;  %v5151_v3 = vpack.c.bf16 %v905_v36, %v893_v19  ;;  %v631_v19 = vadd.f32 %v6629_v53, %v6916_v29  ;;  %v926_v36 = vld [vmem:[%s9367_s3 + $0x2c0] sm:$0xff] }
 0x13b   : > { %5050 = vmatpush1.bf16.msra.mxu0 %v5049_v51  ;;  %5146 = vmatpush1.bf16.msra.mxu1 %v5145_v62  ;;  %v892_v51 = vld [vmem:[%s9367_s3 + $0x1b0] sm:$0xff]  ;;  %v7015_v62 = vmax.f32 %v626_v35, 0.0  ;;  %v914_v35 = vld [vmem:[%s9367_s3 + $0x260] sm:$0xff] }
 0x13c   : > { %1709 = vmatprep.mubr.f32.mxu0 %v9402_v6  ;;  %2031 = vmatprep.mubr.f32.mxu1 %v9402_v6  ;;  %v5153_v40 = vpack.c.bf16 %v904_v0, %v892_v51  ;;  %v636_v51 = vadd.f32 %v6681_v23, %v6916_v29  ;;  %v951_v0 = vld [vmem:[%s9367_s3 + $0x388] sm:$0xff]  ;;  %v938_v23 = vld [vmem:[%s9367_s3 + $0x320] sm:$0xff] }
 0x13d   : > { %5052 = vmatprep.subr.bf16.mxu0 %v5051_v5  ;;  %5148 = vmatprep.subr.bf16.mxu1 %v5147_v18  ;;  %v917_v5 = vld [vmem:[%s9367_s3 + $0x278] sm:$0xff]  ;;  %v5057_v18 = vpack.c.bf16 %v902_v59, %v890_v57  ;;  %v916_v59 = vld [vmem:[%s9367_s3 + $0x270] sm:$0xff]  ;;  %v939_v57 = vld [vmem:[%s9367_s3 + $0x328] sm:$0xff] }
 0x13e   : > { %1710 = vmatmul.mubr.f32.gmra.mrb[34].mxu0 %v6999_v25  ;;  %2032 = vmatmul.mubr.f32.gmra.mrb[18].mxu1 %v6999_v25  ;;  %v5155_v53 = vpack.c.bf16 %v929_v7, %v917_v5  ;;  %v7063_v5 = vmax.f32 %v631_v19, 0.0  ;;  %v950_v7 = vld [vmem:[%s9367_s3 + $0x380] sm:$0xff] }
 0x13f   : > { %5054 = vmatpush1.bf16.msra.mxu0 %v5053_v49  ;;  %5150 = vmatpush1.bf16.msra.mxu1 %v5149_v52  ;;  %v928_v49 = vld [vmem:[%s9367_s3 + $0x2d0] sm:$0xff]  ;;  %v5059_v52 = vpack.c.bf16 %v927_v4, %v915_v61  ;;  %v5061_v61 = vpack.c.bf16 %v926_v36, %v914_v35  ;;  %v5063_v35 = vpack.c.bf16 %v951_v0, %v939_v57  ;;  %v963_v36 = vld [vmem:[%s9367_s3 + $0x3e8] sm:$0xff]  ;;  %v962_v0 = vld [vmem:[%s9367_s3 + $0x3e0] sm:$0xff] }
 0x140   : > { %1715 = vmatprep.mubr.f32.mxu0 %v9402_v6  ;;  %2037 = vmatprep.mubr.f32.mxu1 %v9402_v6  ;;  %v5157_v4 = vpack.c.bf16 %v928_v49, %v916_v59  ;;  %v7079_v59 = vmax.f32 %v636_v51, 0.0  ;;  %v975_v49 = vld [vmem:[%s9367_s3 + $0x448] sm:$0xff]  ;;  %v5065_v57 = vpack.c.bf16 %v950_v7, %v938_v23 }
 0x141   : > { %5056 = vmatprep.subr.bf16.mxu0 %v5055_v2  ;;  %5152 = vmatprep.subr.bf16.mxu1 %v5151_v3  ;;  %v941_v2 = vld [vmem:[%s9367_s3 + $0x338] sm:$0xff]  ;;  %v5067_v23 = vpack.c.bf16 %v975_v49, %v963_v36  ;;  %v987_v7 = vld [vmem:[%s9367_s3 + $0x4a8] sm:$0xff] }
 0x142   : > { %1716 = vmatmul.mubr.f32.gmra.mrb[36].mxu0 %v7015_v62  ;;  %2038 = vmatmul.mubr.f32.gmra.mrb[20].mxu1 %v7015_v62  ;;  %v953_v3 = vld [vmem:[%s9367_s3 + $0x398] sm:$0xff] }
 0x143   : > { %5058 = vmatpush1.bf16.msra.mxu0 %v5057_v18  ;;  %5154 = vmatpush1.bf16.msra.mxu1 %v5153_v40  ;;  %v940_v18 = vld [vmem:[%s9367_s3 + $0x330] sm:$0xff]  ;;  %v5159_v19 = vpack.c.bf16 %v953_v3, %v941_v2  ;;  %v641_v2 = vadd.f32 %v6667_v17, %v6916_v29  ;;  %v974_v3 = vld [vmem:[%s9367_s3 + $0x440] sm:$0xff] }
 0x144   : > { %1721 = vmatprep.mubr.f32.mxu0 %v9402_v6  ;;  %2043 = vmatprep.mubr.f32.mxu1 %v9402_v6  ;;  %v952_v40 = vld [vmem:[%s9367_s3 + $0x390] sm:$0xff]  ;;  %v5069_v36 = vpack.c.bf16 %v974_v3, %v962_v0  ;;  %v1011_v3 = vld [vmem:[%s9367_s3 + $0x568] sm:$0xff] }
 0x145   : > { %5060 = vmatprep.subr.bf16.mxu0 %v5059_v52  ;;  %5156 = vmatprep.subr.bf16.mxu1 %v5155_v53  ;;  %v965_v52 = vld [vmem:[%s9367_s3 + $0x3f8] sm:$0xff]  ;;  %v5161_v51 = vpack.c.bf16 %v952_v40, %v940_v18  ;;  %v646_v18 = vadd.f32 %v6719_v27, %v6916_v29  ;;  %v999_v40 = vld [vmem:[%s9367_s3 + $0x508] sm:$0xff]  ;;  %v986_v27 = vld [vmem:[%s9367_s3 + $0x4a0] sm:$0xff] }
 0x146   : > { %1722 = vmatmul.mubr.f32.gmra.mrb[38].mxu0 %v7063_v5  ;;  %2044 = vmatmul.mubr.f32.gmra.mrb[22].mxu1 %v7063_v5  ;;  %v977_v53 = vld [vmem:[%s9367_s3 + $0x458] sm:$0xff]  ;;  %v5071_v0 = vpack.c.bf16 %v999_v40, %v987_v7  ;;  %v1010_v40 = vld [vmem:[%s9367_s3 + $0x560] sm:$0xff] }
 0x147   : > { %5062 = vmatpush1.bf16.msra.mxu0 %v5061_v61  ;;  %5158 = vmatpush1.bf16.msra.mxu1 %v5157_v4  ;;  %v964_v61 = vld [vmem:[%s9367_s3 + $0x3f0] sm:$0xff]  ;;  %v5163_v17 = vpack.c.bf16 %v977_v53, %v965_v52  ;;  %v7127_v52 = vmax.f32 %v641_v2, 0.0  ;;  %v998_v53 = vld [vmem:[%s9367_s3 + $0x500] sm:$0xff] }
 0x148   : > { %1727 = vmatprep.mubr.f32.mxu0 %v9402_v6  ;;  %2049 = vmatprep.mubr.f32.mxu1 %v9402_v6  ;;  %v976_v4 = vld [vmem:[%s9367_s3 + $0x450] sm:$0xff]  ;;  %v5073_v7 = vpack.c.bf16 %v998_v53, %v986_v27  ;;  %v1035_v53 = vld [vmem:[%s9367_s3 + $0x628] sm:$0xff] }
 0x149   : > { %5064 = vmatprep.subr.bf16.mxu0 %v5063_v35  ;;  %5160 = vmatprep.subr.bf16.mxu1 %v5159_v19  ;;  %v989_v35 = vld [vmem:[%s9367_s3 + $0x4b8] sm:$0xff]  ;;  %v5165_v49 = vpack.c.bf16 %v976_v4, %v964_v61  ;;  %v7143_v61 = vmax.f32 %v646_v18, 0.0  ;;  %v1023_v4 = vld [vmem:[%s9367_s3 + $0x5c8] sm:$0xff] }
 0x14a   : > { %1728 = vmatmul.mubr.f32.gmra.mrb[40].mxu0 %v7079_v59  ;;  %2050 = vmatmul.mubr.f32.gmra.mrb[24].mxu1 %v7079_v59  ;;  %v1001_v19 = vld [vmem:[%s9367_s3 + $0x518] sm:$0xff]  ;;  %v5075_v27 = vpack.c.bf16 %v1023_v4, %v1011_v3 }
 0x14b   : > { %5066 = vmatpush1.bf16.msra.mxu0 %v5065_v57  ;;  %5162 = vmatpush1.bf16.msra.mxu1 %v5161_v51  ;;  %v988_v57 = vld [vmem:[%s9367_s3 + $0x4b0] sm:$0xff]  ;;  %v5167_v2 = vpack.c.bf16 %v1001_v19, %v989_v35  ;;  %v651_v35 = vadd.f32 %v6705_v42, %v6916_v29  ;;  %v1022_v19 = vld [vmem:[%s9367_s3 + $0x5c0] sm:$0xff] }
 0x14c   : > { %1733 = vmatprep.mubr.f32.mxu0 %v9402_v6  ;;  %2055 = vmatprep.mubr.f32.mxu1 %v9402_v6  ;;  %v1000_v51 = vld [vmem:[%s9367_s3 + $0x510] sm:$0xff]  ;;  %v5077_v3 = vpack.c.bf16 %v1022_v19, %v1010_v40  ;;  %v1059_v19 = vld [vmem:[%s9367_s3 + $0x6e8] sm:$0xff] }
 0x14d   : > { %5068 = vmatprep.subr.bf16.mxu0 %v5067_v23  ;;  %5164 = vmatprep.subr.bf16.mxu1 %v5163_v17  ;;  %v1013_v23 = vld [vmem:[%s9367_s3 + $0x578] sm:$0xff]  ;;  %v5169_v18 = vpack.c.bf16 %v1000_v51, %v988_v57  ;;  %v656_v57 = vadd.f32 %v6757_v15, %v6916_v29  ;;  %v1047_v51 = vld [vmem:[%s9367_s3 + $0x688] sm:$0xff]  ;;  %v1034_v15 = vld [vmem:[%s9367_s3 + $0x620] sm:$0xff] }
 0x14e   : > { %1734 = vmatmul.mubr.f32.gmra.mrb[42].mxu0 %v7127_v52  ;;  %2056 = vmatmul.mubr.f32.gmra.mrb[26].mxu1 %v7127_v52  ;;  %v1025_v17 = vld [vmem:[%s9367_s3 + $0x5d8] sm:$0xff]  ;;  %v5079_v40 = vpack.c.bf16 %v1047_v51, %v1035_v53  ;;  %v1058_v51 = vld [vmem:[%s9367_s3 + $0x6e0] sm:$0xff] }
 0x14f   : > { %5070 = vmatpush1.bf16.msra.mxu0 %v5069_v36  ;;  %5166 = vmatpush1.bf16.msra.mxu1 %v5165_v49  ;;  %v1012_v36 = vld [vmem:[%s9367_s3 + $0x570] sm:$0xff]  ;;  %v5171_v42 = vpack.c.bf16 %v1025_v17, %v1013_v23  ;;  %v7191_v23 = vmax.f32 %v651_v35, 0.0  ;;  %v1046_v17 = vld [vmem:[%s9367_s3 + $0x680] sm:$0xff] }
 0x150   : > { %1739 = vmatprep.mubr.f32.mxu0 %v9402_v6  ;;  %2061 = vmatprep.mubr.f32.mxu1 %v9402_v6  ;;  %v1024_v49 = vld [vmem:[%s9367_s3 + $0x5d0] sm:$0xff]  ;;  %v5081_v53 = vpack.c.bf16 %v1046_v17, %v1034_v15  ;;  %v1083_v17 = vld [vmem:[%s9367_s3 + $0x7a8] sm:$0xff] }
 0x151   : > { %5072 = vmatprep.subr.bf16.mxu0 %v5071_v0  ;;  %5168 = vmatprep.subr.bf16.mxu1 %v5167_v2  ;;  %v1037_v0 = vld [vmem:[%s9367_s3 + $0x638] sm:$0xff]  ;;  %v5173_v4 = vpack.c.bf16 %v1024_v49, %v1012_v36  ;;  %v7207_v36 = vmax.f32 %v656_v57, 0.0  ;;  %v1071_v49 = vld [vmem:[%s9367_s3 + $0x748] sm:$0xff] }
 0x152   : > { %1740 = vmatmul.mubr.f32.gmra.mrb[44].mxu0 %v7143_v61  ;;  %2062 = vmatmul.mubr.f32.gmra.mrb[28].mxu1 %v7143_v61  ;;  %v1049_v2 = vld [vmem:[%s9367_s3 + $0x698] sm:$0xff]  ;;  %v5083_v15 = vpack.c.bf16 %v1071_v49, %v1059_v19 }
 0x153   : > { %5074 = vmatpush1.bf16.msra.mxu0 %v5073_v7  ;;  %5170 = vmatpush1.bf16.msra.mxu1 %v5169_v18  ;;  %v1036_v7 = vld [vmem:[%s9367_s3 + $0x630] sm:$0xff]  ;;  %v5175_v35 = vpack.c.bf16 %v1049_v2, %v1037_v0  ;;  %v661_v0 = vadd.f32 %v6743_v9, %v6916_v29  ;;  %v1070_v2 = vld [vmem:[%s9367_s3 + $0x740] sm:$0xff] }
 0x154   : > { %1745 = vmatprep.mubr.f32.mxu0 %v9402_v6  ;;  %2067 = vmatprep.mubr.f32.mxu1 %v9402_v6  ;;  %v1048_v18 = vld [vmem:[%s9367_s3 + $0x690] sm:$0xff]  ;;  %v5085_v19 = vpack.c.bf16 %v1070_v2, %v1058_v51  ;;  %v1107_v2 = vld [vmem:[%s9367_s3 + $0x868] sm:$0xff] }
 0x155   : > { %5076 = vmatprep.subr.bf16.mxu0 %v5075_v27  ;;  %5172 = vmatprep.subr.bf16.mxu1 %v5171_v42  ;;  %v1061_v27 = vld [vmem:[%s9367_s3 + $0x6f8] sm:$0xff]  ;;  %v5177_v57 = vpack.c.bf16 %v1048_v18, %v1036_v7  ;;  %v666_v7 = vadd.f32 %v6795_v45, %v6916_v29  ;;  %v1095_v18 = vld [vmem:[%s9367_s3 + $0x808] sm:$0xff]  ;;  %v1082_v45 = vld [vmem:[%s9367_s3 + $0x7a0] sm:$0xff] }
 0x156   : > { %1746 = vmatmul.mubr.f32.gmra.mrb[46].mxu0 %v7191_v23  ;;  %2068 = vmatmul.mubr.f32.gmra.mrb[30].mxu1 %v7191_v23  ;;  %v1073_v42 = vld [vmem:[%s9367_s3 + $0x758] sm:$0xff]  ;;  %v5087_v51 = vpack.c.bf16 %v1095_v18, %v1083_v17  ;;  %v1106_v18 = vld [vmem:[%s9367_s3 + $0x860] sm:$0xff] }
 0x157   : > { %5078 = vmatpush1.bf16.msra.mxu0 %v5077_v3  ;;  %5174 = vmatpush1.bf16.msra.mxu1 %v5173_v4  ;;  %v1060_v3 = vld [vmem:[%s9367_s3 + $0x6f0] sm:$0xff]  ;;  %v5179_v9 = vpack.c.bf16 %v1073_v42, %v1061_v27  ;;  %v7255_v27 = vmax.f32 %v661_v0, 0.0  ;;  %v1094_v42 = vld [vmem:[%s9367_s3 + $0x800] sm:$0xff] }
 0x158   : > { %1751 = vmatprep.mubr.f32.mxu0 %v9402_v6  ;;  %2073 = vmatprep.mubr.f32.mxu1 %v9402_v6  ;;  %v1072_v4 = vld [vmem:[%s9367_s3 + $0x750] sm:$0xff]  ;;  %v5089_v17 = vpack.c.bf16 %v1094_v42, %v1082_v45  ;;  %v1131_v42 = vld [vmem:[%s9367_s3 + $0x928] sm:$0xff] }
 0x159   : > { %5080 = vmatprep.subr.bf16.mxu0 %v5079_v40  ;;  %5176 = vmatprep.subr.bf16.mxu1 %v5175_v35  ;;  %v1085_v40 = vld [vmem:[%s9367_s3 + $0x7b8] sm:$0xff]  ;;  %v5181_v49 = vpack.c.bf16 %v1072_v4, %v1060_v3  ;;  %v7271_v3 = vmax.f32 %v666_v7, 0.0  ;;  %v1119_v4 = vld [vmem:[%s9367_s3 + $0x8c8] sm:$0xff] }
 0x15a   : > { %1752 = vmatmul.mubr.f32.gmra.mrb[48].mxu0 %v7207_v36  ;;  %2074 = vmatmul.mubr.f32.gmra.mrb[32].mxu1 %v7207_v36  ;;  %v1097_v35 = vld [vmem:[%s9367_s3 + $0x818] sm:$0xff]  ;;  %v5091_v45 = vpack.c.bf16 %v1119_v4, %v1107_v2 }
 0x15b   : > { %5082 = vmatpush1.bf16.msra.mxu0 %v5081_v53  ;;  %5178 = vmatpush1.bf16.msra.mxu1 %v5177_v57  ;;  %v1084_v53 = vld [vmem:[%s9367_s3 + $0x7b0] sm:$0xff]  ;;  %v5183_v0 = vpack.c.bf16 %v1097_v35, %v1085_v40  ;;  %v671_v40 = vadd.f32 %v6781_v38, %v6916_v29  ;;  %v1118_v35 = vld [vmem:[%s9367_s3 + $0x8c0] sm:$0xff] }
 0x15c   : > { %1757 = vmatprep.mubr.f32.mxu0 %v9402_v6  ;;  %2079 = vmatprep.mubr.f32.mxu1 %v9402_v6  ;;  %v1096_v57 = vld [vmem:[%s9367_s3 + $0x810] sm:$0xff]  ;;  %v5093_v2 = vpack.c.bf16 %v1118_v35, %v1106_v18  ;;  %v1155_v35 = vld [vmem:[%s9367_s3 + $0x9e8] sm:$0xff] }
 0x15d   : > { %5084 = vmatprep.subr.bf16.mxu0 %v5083_v15  ;;  %5180 = vmatprep.subr.bf16.mxu1 %v5179_v9  ;;  %v1109_v15 = vld [vmem:[%s9367_s3 + $0x878] sm:$0xff]  ;;  %v5185_v7 = vpack.c.bf16 %v1096_v57, %v1084_v53  ;;  %v676_v53 = vadd.f32 %v6833_v21, %v6916_v29  ;;  %v1143_v57 = vld [vmem:[%s9367_s3 + $0x988] sm:$0xff]  ;;  %v1130_v21 = vld [vmem:[%s9367_s3 + $0x920] sm:$0xff] }
 0x15e   : > { %1758 = vmatmul.mubr.f32.gmra.mrb[50].mxu0 %v7255_v27  ;;  %2080 = vmatmul.mubr.f32.gmra.mrb[34].mxu1 %v7255_v27  ;;  %v1121_v9 = vld [vmem:[%s9367_s3 + $0x8d8] sm:$0xff]  ;;  %v5095_v18 = vpack.c.bf16 %v1143_v57, %v1131_v42  ;;  %v1154_v57 = vld [vmem:[%s9367_s3 + $0x9e0] sm:$0xff] }
 0x15f   : > { %5086 = vmatpush1.bf16.msra.mxu0 %v5085_v19  ;;  %5182 = vmatpush1.bf16.msra.mxu1 %v5181_v49  ;;  %v1108_v19 = vld [vmem:[%s9367_s3 + $0x870] sm:$0xff]  ;;  %v5187_v38 = vpack.c.bf16 %v1121_v9, %v1109_v15  ;;  %v7319_v15 = vmax.f32 %v671_v40, 0.0  ;;  %v1142_v9 = vld [vmem:[%s9367_s3 + $0x980] sm:$0xff] }
 0x160   : > { %1763 = vmatprep.mubr.f32.mxu0 %v9402_v6  ;;  %2085 = vmatprep.mubr.f32.mxu1 %v9402_v6  ;;  %v1120_v49 = vld [vmem:[%s9367_s3 + $0x8d0] sm:$0xff]  ;;  %v5097_v42 = vpack.c.bf16 %v1142_v9, %v1130_v21  ;;  %v1179_v9 = vld [vmem:[%s9367_s3 + $0xaa8] sm:$0xff] }
 0x161   : > { %5088 = vmatprep.subr.bf16.mxu0 %v5087_v51  ;;  %5184 = vmatprep.subr.bf16.mxu1 %v5183_v0  ;;  %v1133_v51 = vld [vmem:[%s9367_s3 + $0x938] sm:$0xff]  ;;  %v5189_v4 = vpack.c.bf16 %v1120_v49, %v1108_v19  ;;  %v7335_v19 = vmax.f32 %v676_v53, 0.0  ;;  %v1167_v49 = vld [vmem:[%s9367_s3 + $0xa48] sm:$0xff] }
 0x162   : > { %1764 = vmatmul.mubr.f32.gmra.mrb[52].mxu0 %v7271_v3  ;;  %2086 = vmatmul.mubr.f32.gmra.mrb[36].mxu1 %v7271_v3  ;;  %v1145_v0 = vld [vmem:[%s9367_s3 + $0x998] sm:$0xff]  ;;  %v5099_v21 = vpack.c.bf16 %v1167_v49, %v1155_v35 }
 0x163   : > { %5090 = vmatpush1.bf16.msra.mxu0 %v5089_v17  ;;  %5186 = vmatpush1.bf16.msra.mxu1 %v5185_v7  ;;  %v1132_v17 = vld [vmem:[%s9367_s3 + $0x930] sm:$0xff]  ;;  %v5191_v40 = vpack.c.bf16 %v1145_v0, %v1133_v51  ;;  %v681_v51 = vadd.f32 %v6819_v11, %v6916_v29  ;;  %v1166_v0 = vld [vmem:[%s9367_s3 + $0xa40] sm:$0xff] }
 0x164   : > { %1769 = vmatprep.mubr.f32.mxu0 %v9402_v6  ;;  %2091 = vmatprep.mubr.f32.mxu1 %v9402_v6  ;;  %v1144_v7 = vld [vmem:[%s9367_s3 + $0x990] sm:$0xff]  ;;  %v5101_v35 = vpack.c.bf16 %v1166_v0, %v1154_v57  ;;  %v1203_v0 = vld [vmem:[%s9367_s3 + $0xb68] sm:$0xff] }
 0x165   : > { %5092 = vmatprep.subr.bf16.mxu0 %v5091_v45  ;;  %5188 = vmatprep.subr.bf16.mxu1 %v5187_v38  ;;  %v1157_v45 = vld [vmem:[%s9367_s3 + $0x9f8] sm:$0xff]  ;;  %v5193_v53 = vpack.c.bf16 %v1144_v7, %v1132_v17  ;;  %v686_v17 = vadd.f32 %v6847_v43, %v6916_v29  ;;  %v1191_v7 = vld [vmem:[%s9367_s3 + $0xb08] sm:$0xff]  ;;  %v1178_v43 = vld [vmem:[%s9367_s3 + $0xaa0] sm:$0xff] }
 0x166   : > { %1770 = vmatmul.mubr.f32.gmra.mrb[54].mxu0 %v7319_v15  ;;  %2092 = vmatmul.mubr.f32.gmra.mrb[38].mxu1 %v7319_v15  ;;  %v1169_v38 = vld [vmem:[%s9367_s3 + $0xa58] sm:$0xff]  ;;  %v5103_v57 = vpack.c.bf16 %v1191_v7, %v1179_v9  ;;  %v1202_v7 = vld [vmem:[%s9367_s3 + $0xb60] sm:$0xff] }
 0x167   : > { %5094 = vmatpush1.bf16.msra.mxu0 %v5093_v2  ;;  %5190 = vmatpush1.bf16.msra.mxu1 %v5189_v4  ;;  %v1156_v2 = vld [vmem:[%s9367_s3 + $0x9f0] sm:$0xff]  ;;  %v5195_v11 = vpack.c.bf16 %v1169_v38, %v1157_v45  ;;  %v7383_v45 = vmax.f32 %v681_v51, 0.0  ;;  %v1190_v38 = vld [vmem:[%s9367_s3 + $0xb00] sm:$0xff] }
 0x168   : > { %1775 = vmatprep.mubr.f32.mxu0 %v9402_v6  ;;  %2097 = vmatprep.mubr.f32.mxu1 %v9402_v6  ;;  %v1168_v4 = vld [vmem:[%s9367_s3 + $0xa50] sm:$0xff]  ;;  %v5105_v9 = vpack.c.bf16 %v1190_v38, %v1178_v43  ;;  %v1239_v38 = vld [vmem:[%s9367_s3 + $0xc88] sm:$0xff] }
 0x169   : > { %5096 = vmatprep.subr.bf16.mxu0 %v5095_v18  ;;  %5192 = vmatprep.subr.bf16.mxu1 %v5191_v40  ;;  %v1181_v18 = vld [vmem:[%s9367_s3 + $0xab8] sm:$0xff]  ;;  %v5197_v49 = vpack.c.bf16 %v1168_v4, %v1156_v2  ;;  %v7399_v2 = vmax.f32 %v686_v17, 0.0  ;;  %v1215_v4 = vld [vmem:[%s9367_s3 + $0xbc8] sm:$0xff] }
 0x16a   : > { %1776 = vmatmul.mubr.f32.gmra.mrb[56].mxu0 %v7335_v19  ;;  %2098 = vmatmul.mubr.f32.gmra.mrb[40].mxu1 %v7335_v19  ;;  %v1193_v40 = vld [vmem:[%s9367_s3 + $0xb18] sm:$0xff]  ;;  %v5107_v43 = vpack.c.bf16 %v1215_v4, %v1203_v0  ;;  %v1226_v0 = vld [vmem:[%s9367_s3 + $0xc20] sm:$0xff] }
 0x16b   : > { %5098 = vmatpush1.bf16.msra.mxu0 %v5097_v42  ;;  %5194 = vmatpush1.bf16.msra.mxu1 %v5193_v53  ;;  %v1180_v42 = vld [vmem:[%s9367_s3 + $0xab0] sm:$0xff]  ;;  %v5199_v51 = vpack.c.bf16 %v1193_v40, %v1181_v18  ;;  %v691_v18 = vadd.f32 %v6842_v39, %v6916_v29  ;;  %v1214_v40 = vld [vmem:[%s9367_s3 + $0xbc0] sm:$0xff]  ;;  %v1227_v29 = vld [vmem:[%s9367_s3 + $0xc28] sm:$0xff] }
 0x16c   : > { %1781 = vmatprep.mubr.f32.mxu0 %v9402_v6  ;;  %2103 = vmatprep.mubr.f32.mxu1 %v9402_v6  ;;  %v1192_v53 = vld [vmem:[%s9367_s3 + $0xb10] sm:$0xff] }
 0x16d   : > { %5100 = vmatprep.subr.bf16.mxu0 %v5099_v21  ;;  %5196 = vmatprep.subr.bf16.mxu1 %v5195_v11  ;;  %v1205_v21 = vld [vmem:[%s9367_s3 + $0xb78] sm:$0xff]  ;;  %v5201_v17 = vpack.c.bf16 %v1192_v53, %v1180_v42  ;;  %v7445_v4 = vmax.f32 %v691_v18, 0.0  ;;  %v1251_v18 = vld [vmem:[%s9367_s3 + $0xce8] sm:$0xff] }
 0x16e   : > { %1782 = vmatmul.mubr.f32.gmra.mrb[58].mxu0 %v7383_v45  ;;  %2104 = vmatmul.mubr.f32.gmra.mrb[42].mxu1 %v7383_v45  ;;  %v1217_v11 = vld [vmem:[%s9367_s3 + $0xbd8] sm:$0xff] }
 0x16f   : > { %5102 = vmatpush1.bf16.msra.mxu0 %v5101_v35  ;;  %5198 = vmatpush1.bf16.msra.mxu1 %v5197_v49  ;;  %v1204_v35 = vld [vmem:[%s9367_s3 + $0xb70] sm:$0xff]  ;;  %v5203_v39 = vpack.c.bf16 %v1217_v11, %v1205_v21  ;;  %v1229_v42 = vld [vmem:[%s9367_s3 + $0xc38] sm:$0xff]  ;;  %9403 = vst [vmem:[#allocation12_spill] sm:$0xff] %v7445_v4  ;;  %v1238_v21 = vld [vmem:[%s9367_s3 + $0xc80] sm:$0xff] }
 0x170   : > { %1787 = vmatprep.mubr.f32.mxu0 %v9402_v6  ;;  %2109 = vmatprep.mubr.f32.mxu1 %v9402_v6  ;;  %v1216_v49 = vld [vmem:[%s9367_s3 + $0xbd0] sm:$0xff]  ;;  %v1241_v53 = vld [vmem:[%s9367_s3 + $0xc98] sm:$0xff] }
 0x171   : > { %5104 = vmatprep.subr.bf16.mxu0 %v5103_v57  ;;  %5200 = vmatprep.subr.bf16.mxu1 %v5199_v51  ;;  %v5109_v57 = vpack.c.bf16 %v1214_v40, %v1202_v7  ;;  %v5205_v51 = vpack.c.bf16 %v1216_v49, %v1204_v35  ;;  %v1228_v11 = vld [vmem:[%s9367_s3 + $0xc30] sm:$0xff]  ;;  %v5207_v7 = vpack.c.bf16 %v1241_v53, %v1229_v42  ;;  %v1263_v40 = vld [vmem:[%s9367_s3 + $0xd48] sm:$0xff]  ;;  %v1253_v35 = vld [vmem:[%s9367_s3 + $0xcf8] sm:$0xff] }
 0x172   : > { %1788 = vmatmul.mubr.f32.gmra.mrb[60].mxu0 %v7399_v2  ;;  %2110 = vmatmul.mubr.f32.gmra.mrb[44].mxu1 %v7399_v2  ;;  %v1265_v49 = vld [vmem:[%s9367_s3 + $0xd58] sm:$0xff]  ;;  %v5115_v42 = vpack.c.bf16 %v1263_v40, %v1251_v18  ;;  %v1274_v18 = vld [vmem:[%s9367_s3 + $0xda0] sm:$0xff] }
 0x173   : > { %5106 = vmatpush1.bf16.msra.mxu0 %v5105_v9  ;;  %5202 = vmatpush1.bf16.msra.mxu1 %v5201_v17  ;;  %v1240_v9 = vld [vmem:[%s9367_s3 + $0xc90] sm:$0xff]  ;;  %v5111_v17 = vpack.c.bf16 %v1239_v38, %v1227_v29  ;;  %v1250_v29 = vld [vmem:[%s9367_s3 + $0xce0] sm:$0xff]  ;;  %v5211_v53 = vpack.c.bf16 %v1265_v49, %v1253_v35 }
 0x174   : > { %1793 = vmatprep.mubr.f32.mxu0 %v9402_v6  ;;  %2115 = vmatprep.mubr.f32.mxu1 %v9402_v6  ;;  %v1262_v38 = vld [vmem:[%s9367_s3 + $0xd40] sm:$0xff] }
 0x175   : > { %5108 = vmatprep.subr.bf16.mxu0 %v5107_v43  ;;  %5204 = vmatprep.subr.bf16.mxu1 %v5203_v39  ;;  %v5113_v43 = vpack.c.bf16 %v1238_v21, %v1226_v0  ;;  %v5209_v39 = vpack.c.bf16 %v1240_v9, %v1228_v11  ;;  %v1275_v0 = vld [vmem:[%s9367_s3 + $0xda8] sm:$0xff]  ;;  %v1277_v11 = vld [vmem:[%s9367_s3 + $0xdb8] sm:$0xff]  ;;  %v1286_v40 = vld [vmem:[%s9367_s3 + $0xe00] sm:$0xff] }
 0x176   : > { %1794 = vmatmul.mubr.f32.gmra.mrb[62].mxu0 %v7445_v4  ;;  %2116 = vmatmul.mubr.f32.gmra.mrb[46].mxu1 %v7445_v4  ;;  %v1287_v21 = vld [vmem:[%s9367_s3 + $0xe08] sm:$0xff]  ;;  %v1289_v9 = vld [vmem:[%s9367_s3 + $0xe18] sm:$0xff] }
 0x177   : > { %5110 = vmatpush1.bf16.msra.mxu0 %v5109_v57  ;;  %5206 = vmatpush1.bf16.msra.mxu1 %v5205_v51  ;;  %v1252_v57 = vld [vmem:[%s9367_s3 + $0xcf0] sm:$0xff]  ;;  %v5119_v35 = vpack.c.bf16 %v1287_v21, %v1275_v0  ;;  %v5215_v49 = vpack.c.bf16 %v1289_v9, %v1277_v11  ;;  %v1298_v0 = vld [vmem:[%s9367_s3 + $0xe60] sm:$0xff] }
 0x178   : > { %2186 = vmatprep.mubr.f32.mxu0 %v6571_v20  ;;  %2508 = vmatprep.mubr.f32.mxu1 %v6571_v20  ;;  %v1264_v51 = vld [vmem:[%s9367_s3 + $0xd50] sm:$0xff]  ;;  %v1310_v21 = vld [vmem:[%s9367_s3 + $0xec0] sm:$0xff] }
 0x179   : > { %5112 = vmatprep.subr.bf16.mxu0 %v5111_v17  ;;  %5208 = vmatprep.subr.bf16.mxu1 %v5207_v7  ;;  %v5117_v17 = vpack.c.bf16 %v1262_v38, %v1250_v29  ;;  %v5213_v7 = vpack.c.bf16 %v1264_v51, %v1252_v57  ;;  %v1299_v29 = vld [vmem:[%s9367_s3 + $0xe68] sm:$0xff]  ;;  %v5121_v57 = vpack.c.bf16 %v1286_v40, %v1274_v18  ;;  %v1325_v40 = vld [vmem:[%s9367_s3 + $0xf38] sm:$0xff] }
 0x17a   : > { %2187 = vmatmul.mubr.f32.vlgmr.msra.gmra.mrb[64].mxu0 %v6579_v26  ;;  %2509 = vmatmul.mubr.f32.vlgmr.msra.gmra.mrb[48].mxu1 %v6579_v26  ;;  %v1311_v38 = vld [vmem:[%s9367_s3 + $0xec8] sm:$0xff] }
 0x17b   : > { %5114 = vmatpush1.bf16.msra.mxu0 %v5113_v43  ;;  %5210 = vmatpush1.bf16.msra.mxu1 %v5209_v39  ;;  %v1276_v43 = vld [vmem:[%s9367_s3 + $0xdb0] sm:$0xff]  ;;  %v5123_v11 = vpack.c.bf16 %v1311_v38, %v1299_v29  ;;  %v1335_v18 = vld [vmem:[%s9367_s3 + $0xf88] sm:$0xff]  ;;  %v1334_v29 = vld [vmem:[%s9367_s3 + $0xf80] sm:$0xff] }
 0x17c   : > { %2192 = vmatprep.mubr.f32.mxu0 %v6609_v41  ;;  %2514 = vmatprep.mubr.f32.mxu1 %v6609_v41  ;;  %v1288_v39 = vld [vmem:[%s9367_s3 + $0xe10] sm:$0xff] }
 0x17d   : > { %5116 = vmatprep.subr.bf16.mxu0 %v5115_v42  ;;  %5212 = vmatprep.subr.bf16.mxu1 %v5211_v53  ;;  %v1301_v42 = vld [vmem:[%s9367_s3 + $0xe78] sm:$0xff]  ;;  %v5217_v51 = vpack.c.bf16 %v1288_v39, %v1276_v43  ;;  %v1322_v39 = vld [vmem:[%s9367_s3 + $0xf20] sm:$0xff] }
 0x17e   : > { %2193 = vmatmul.mubr.f32.gmra.mrb[66].mxu0 %v6617_v46  ;;  %2515 = vmatmul.mubr.f32.gmra.mrb[50].mxu1 %v6617_v46  ;;  %v1313_v53 = vld [vmem:[%s9367_s3 + $0xed8] sm:$0xff] }
 0x17f   : > { %2198 = vmatprep.mubr.f32.mxu0 %v6647_v58  ;;  %2520 = vmatprep.mubr.f32.mxu1 %v6647_v58  ;;  %v5219_v9 = vpack.c.bf16 %v1313_v53, %v1301_v42  ;;  %v1300_v58 = vld [vmem:[%s9367_s3 + $0xe70] sm:$0xff] }
 0x180   : > { %5118 = vmatpush1.bf16.msra.mxu0 %v5117_v17  ;;  %5214 = vmatpush1.bf16.msra.mxu1 %v5213_v7  ;;  %v1312_v17 = vld [vmem:[%s9367_s3 + $0xed0] sm:$0xff]  ;;  %v1323_v7 = vld [vmem:[%s9367_s3 + $0xf28] sm:$0xff] }
 0x181   : > { %5120 = vmatprep.subr.bf16.mxu0 %v5119_v35  ;;  %5216 = vmatprep.subr.bf16.mxu1 %v5215_v49  ;;  %v1337_v35 = vld [vmem:[%s9367_s3 + $0xf98] sm:$0xff]  ;;  %v5125_v49 = vpack.c.bf16 %v1310_v21, %v1298_v0  ;;  %v5221_v43 = vpack.c.bf16 %v1312_v17, %v1300_v58  ;;  %v5127_v38 = vpack.c.bf16 %v1335_v18, %v1323_v7  ;;  %v1324_v53 = vld [vmem:[%s9367_s3 + $0xf30] sm:$0xff]  ;;  %v1346_v17 = vld [vmem:[%s9367_s3 + $0xfe0] sm:$0xff] }
 0x182   : > { %2199 = vmatmul.mubr.f32.gmra.mrb[68].mxu0 %v6655_v8  ;;  %2521 = vmatmul.mubr.f32.gmra.mrb[52].mxu1 %v6655_v8  ;;  %v5223_v42 = vpack.c.bf16 %v1337_v35, %v1325_v40  ;;  %v1336_v58 = vld [vmem:[%s9367_s3 + $0xf90] sm:$0xff]  ;;  %v1349_v0 = vld [vmem:[%s9367_s3 + $0xff8] sm:$0xff]  ;;  %v1358_v7 = vld [vmem:[%s9367_s3 + $0x1040] sm:$0xff] }
 0x183   : > { %2204 = vmatprep.mubr.f32.mxu0 %v6685_v24  ;;  %2526 = vmatprep.mubr.f32.mxu1 %v6685_v24  ;;  %v1361_v21 = vld [vmem:[%s9367_s3 + $0x1058] sm:$0xff]  ;;  %v1348_v35 = vld [vmem:[%s9367_s3 + $0xff0] sm:$0xff] }
 0x184   : > { %5122 = vmatpush1.bf16.msra.mxu0 %v5121_v57  ;;  %5218 = vmatpush1.bf16.msra.mxu1 %v5217_v51  ;;  %v1347_v57 = vld [vmem:[%s9367_s3 + $0xfe8] sm:$0xff]  ;;  %v5227_v40 = vpack.c.bf16 %v1361_v21, %v1349_v0  ;;  %v1372_v21 = vld [vmem:[%s9367_s3 + $0x10b0] sm:$0xff] }
 0x185   : > { %5124 = vmatprep.subr.bf16.mxu0 %v5123_v11  ;;  %5220 = vmatprep.subr.bf16.mxu1 %v5219_v9  ;;  %v1359_v51 = vld [vmem:[%s9367_s3 + $0x1048] sm:$0xff]  ;;  %v5129_v11 = vpack.c.bf16 %v1334_v29, %v1322_v39  ;;  %v5225_v9 = vpack.c.bf16 %v1336_v58, %v1324_v53  ;;  %v1373_v29 = vld [vmem:[%s9367_s3 + $0x10b8] sm:$0xff]  ;;  %v1370_v58 = vld [vmem:[%s9367_s3 + $0x10a0] sm:$0xff] }
 0x186   : > { %2205 = vmatmul.mubr.f32.gmra.mrb[70].mxu0 %v6693_v32  ;;  %2527 = vmatmul.mubr.f32.gmra.mrb[54].mxu1 %v6693_v32  ;;  %v5131_v18 = vpack.c.bf16 %v1359_v51, %v1347_v57  ;;  %v1383_v39 = vld [vmem:[%s9367_s3 + $0x1108] sm:$0xff]  ;;  %v1382_v57 = vld [vmem:[%s9367_s3 + $0x1100] sm:$0xff] }
 0x187   : > { %2210 = vmatprep.mubr.f32.mxu0 %v6723_v48  ;;  %2532 = vmatprep.mubr.f32.mxu1 %v6723_v48 }
 0x188   : > { %5126 = vmatpush1.bf16.msra.mxu0 %v5125_v49  ;;  %5222 = vmatpush1.bf16.msra.mxu1 %v5221_v43  ;;  %v1360_v49 = vld [vmem:[%s9367_s3 + $0x1050] sm:$0xff]  ;;  %v1371_v43 = vld [vmem:[%s9367_s3 + $0x10a8] sm:$0xff] }
 0x189   : > { %5128 = vmatprep.subr.bf16.mxu0 %v5127_v38  ;;  %5224 = vmatprep.subr.bf16.mxu1 %v5223_v42  ;;  %v1385_v38 = vld [vmem:[%s9367_s3 + $0x1118] sm:$0xff]  ;;  %v5133_v42 = vpack.c.bf16 %v1358_v7, %v1346_v17  ;;  %v5229_v53 = vpack.c.bf16 %v1360_v49, %v1348_v35  ;;  %v5135_v51 = vpack.c.bf16 %v1383_v39, %v1371_v43  ;;  %v1407_v17 = vld [vmem:[%s9367_s3 + $0x11c8] sm:$0xff]  ;;  %v1394_v49 = vld [vmem:[%s9367_s3 + $0x1160] sm:$0xff] }
 0x18a   : > { %2211 = vmatmul.mubr.f32.gmra.mrb[72].mxu0 %v6731_v54  ;;  %2533 = vmatmul.mubr.f32.gmra.mrb[56].mxu1 %v6731_v54  ;;  %v5231_v0 = vpack.c.bf16 %v1385_v38, %v1373_v29  ;;  %v1397_v7 = vld [vmem:[%s9367_s3 + $0x1178] sm:$0xff]  ;;  %v1406_v43 = vld [vmem:[%s9367_s3 + $0x11c0] sm:$0xff]  ;;  %v1396_v38 = vld [vmem:[%s9367_s3 + $0x1170] sm:$0xff] }
 0x18b   : > { %2216 = vmatprep.mubr.f32.mxu0 %v6761_v1  ;;  %2538 = vmatprep.mubr.f32.mxu1 %v6761_v1 }
 0x18c   : > { %5130 = vmatpush1.bf16.msra.mxu0 %v5129_v11  ;;  %5226 = vmatpush1.bf16.msra.mxu1 %v5225_v9  ;;  %v1384_v11 = vld [vmem:[%s9367_s3 + $0x1110] sm:$0xff]  ;;  %v1395_v9 = vld [vmem:[%s9367_s3 + $0x1168] sm:$0xff] }
 0x18d   : > { %5132 = vmatprep.subr.bf16.mxu0 %v5131_v18  ;;  %5228 = vmatprep.subr.bf16.mxu1 %v5227_v40  ;;  %v1409_v18 = vld [vmem:[%s9367_s3 + $0x11d8] sm:$0xff]  ;;  %v5137_v40 = vpack.c.bf16 %v1382_v57, %v1370_v58  ;;  %v5233_v35 = vpack.c.bf16 %v1384_v11, %v1372_v21  ;;  %v5139_v39 = vpack.c.bf16 %v1407_v17, %v1395_v9  ;;  %v859_v58 = vld [vmem:[%s9367_s3 + $0xa8] sm:$0xff] }
 0x18e   : > { %2217 = vmatmul.mubr.f32.gmra.mrb[74].mxu0 %v6769_v28  ;;  %2539 = vmatmul.mubr.f32.gmra.mrb[58].mxu1 %v6769_v28  ;;  %v5235_v29 = vpack.c.bf16 %v1409_v18, %v1397_v7  ;;  %v849_v57 = vld [vmem:[%s9367_s3 + $0x58] sm:$0xff]  ;;  %v9404_v17 = vld [vmem:[#allocation9_spill] sm:$0xff]  ;;  %v846_v7 = vld [vmem:[%s9367_s3 + $0x40] sm:$0xff] }
 0x18f   : > { %2222 = vmatprep.mubr.f32.mxu0 %v6799_v47  ;;  %2544 = vmatprep.mubr.f32.mxu1 %v6799_v47  ;;  %v858_v18 = vld [vmem:[%s9367_s3 + $0xa0] sm:$0xff] }
 0x190   : > { %5134 = vmatpush1.bf16.msra.mxu0 %v5133_v42  ;;  %5230 = vmatpush1.bf16.msra.mxu1 %v5229_v53  ;;  %v1408_v42 = vld [vmem:[%s9367_s3 + $0x11d0] sm:$0xff]  ;;  %v847_v53 = vld [vmem:[%s9367_s3 + $0x48] sm:$0xff] }
 0x191   : > { %5136 = vmatprep.subr.bf16.mxu0 %v5135_v51  ;;  %5232 = vmatprep.subr.bf16.mxu1 %v5231_v0  ;;  %v861_v51 = vld [vmem:[%s9367_s3 + $0xb8] sm:$0xff]  ;;  %v5141_v0 = vpack.c.bf16 %v1406_v43, %v1394_v49  ;;  %v5237_v21 = vpack.c.bf16 %v1408_v42, %v1396_v38  ;;  %v5239_v11 = vpack.c.bf16 %v859_v58, %v847_v53  ;;  %v871_v49 = vld [vmem:[%s9367_s3 + $0x108] sm:$0xff]  ;;  %v9405_v43 = vld [vmem:[#allocation10_spill] sm:$0xff] }
 0x192   : > { %2223 = vmatmul.mubr.f32.gmra.mrb[76].mxu0 %v6807_v55  ;;  %2545 = vmatmul.mubr.f32.gmra.mrb[60].mxu1 %v6807_v55  ;;  %v5335_v9 = vpack.c.bf16 %v861_v51, %v849_v57  ;;  %v885_v38 = vld [vmem:[%s9367_s3 + $0x178] sm:$0xff]  ;;  %v5241_v42 = vpack.c.bf16 %v858_v18, %v846_v7  ;;  %v870_v58 = vld [vmem:[%s9367_s3 + $0x100] sm:$0xff]  ;;  %v872_v51 = vld [vmem:[%s9367_s3 + $0x110] sm:$0xff] }
 0x193   : > { %2228 = vmatprep.mubr.f32.mxu0 %v6837_v22  ;;  %2550 = vmatprep.mubr.f32.mxu1 %v6837_v22  ;;  %v882_v57 = vld [vmem:[%s9367_s3 + $0x160] sm:$0xff]  ;;  %v9406_v7 = vld [vmem:[#allocation11_spill] sm:$0xff]  ;;  %v907_v18 = vld [vmem:[%s9367_s3 + $0x228] sm:$0xff] }
 0x194   : > { %5138 = vmatpush1.bf16.msra.mxu0 %v5137_v40  ;;  %5234 = vmatpush1.bf16.msra.mxu1 %v5233_v35  ;;  %v848_v40 = vld [vmem:[%s9367_s3 + $0x50] sm:$0xff] }
 0x195   : > { %5140 = vmatprep.subr.bf16.mxu0 %v5139_v39  ;;  %5236 = vmatprep.subr.bf16.mxu1 %v5235_v29  ;;  %v860_v35 = vld [vmem:[%s9367_s3 + $0xb0] sm:$0xff]  ;;  %v883_v39 = vld [vmem:[%s9367_s3 + $0x168] sm:$0xff]  ;;  %v873_v29 = vld [vmem:[%s9367_s3 + $0x118] sm:$0xff] }
 0x196   : > { %2229 = vmatmul.mubr.f32.gmra.mrb[78].mxu0 %v6839_v31  ;;  %2551 = vmatmul.mubr.f32.gmra.mrb[62].mxu1 %v6839_v31  ;;  %v5337_v53 = vpack.c.bf16 %v860_v35, %v848_v40  ;;  %v897_v40 = vld [vmem:[%s9367_s3 + $0x1d8] sm:$0xff] }
 0x197   : > { %2234 = vmatprep.mubr.f32.mxu0 %v6851_v44  ;;  %2556 = vmatprep.mubr.f32.mxu1 %v6851_v44  ;;  %v909_v35 = vld [vmem:[%s9367_s3 + $0x238] sm:$0xff] }
 0x198   : > { %5142 = vmatpush1.bf16.msra.mxu0 %v5141_v0  ;;  %5238 = vmatpush1.bf16.msra.mxu1 %v5237_v21  ;;  %v884_v0 = vld [vmem:[%s9367_s3 + $0x170] sm:$0xff]  ;;  %v5243_v21 = vpack.c.bf16 %v883_v39, %v871_v49  ;;  %v5245_v49 = vpack.c.bf16 %v882_v57, %v870_v58  ;;  %v5343_v58 = vpack.c.bf16 %v909_v35, %v897_v40  ;;  %v919_v57 = vld [vmem:[%s9367_s3 + $0x288] sm:$0xff]  ;;  %v930_v40 = vld [vmem:[%s9367_s3 + $0x2e0] sm:$0xff] }
 0x199   : > { %5240 = vmatprep.subr.bf16.mxu0 %v5239_v11  ;;  %5336 = vmatprep.subr.bf16.mxu1 %v5335_v9  ;;  %v5339_v11 = vpack.c.bf16 %v885_v38, %v873_v29  ;;  %v895_v9 = vld [vmem:[%s9367_s3 + $0x1c8] sm:$0xff]  ;;  %v5341_v39 = vpack.c.bf16 %v884_v0, %v872_v51  ;;  %v894_v29 = vld [vmem:[%s9367_s3 + $0x1c0] sm:$0xff]  ;;  %v921_v0 = vld [vmem:[%s9367_s3 + $0x298] sm:$0xff] }
 0x19a   : > { %2235 = vmatmul.mubr.f32.gmra.mrb[80].mxu0 %v6853_v30  ;;  %2557 = vmatmul.mubr.f32.gmra.mrb[64].mxu1 %v6853_v30  ;;  %v906_v38 = vld [vmem:[%s9367_s3 + $0x220] sm:$0xff]  ;;  %v931_v51 = vld [vmem:[%s9367_s3 + $0x2e8] sm:$0xff]  ;;  %v920_v35 = vld [vmem:[%s9367_s3 + $0x290] sm:$0xff] }
 0x19b   : > { %2240 = vmatprep.mubr.f32.mxu0 %v6861_v56  ;;  %2562 = vmatprep.mubr.f32.mxu1 %v6861_v56 }
 0x19e   : > { %2241 = vmatmul.mubr.f32.gmra.mrb[82].mxu0 %v6863_v60  ;;  %2563 = vmatmul.mubr.f32.gmra.mrb[66].mxu1 %v6863_v60 }
 0x19f   : > { %2246 = vmatprep.mubr.f32.mxu0 %v6871_v10  ;;  %2568 = vmatprep.mubr.f32.mxu1 %v6871_v10 }
 0x1a2   : > { %2247 = vmatmul.mubr.f32.gmra.mrb[84].mxu0 %v6873_v14  ;;  %2569 = vmatmul.mubr.f32.gmra.mrb[68].mxu1 %v6873_v14 }
 0x1a3   : > { %2252 = vmatprep.mubr.f32.mxu0 %v6881_v13  ;;  %2574 = vmatprep.mubr.f32.mxu1 %v6881_v13 }
 0x1a6   : > { %2253 = vmatmul.mubr.f32.gmra.mrb[86].mxu0 %v6883_v33  ;;  %2575 = vmatmul.mubr.f32.gmra.mrb[70].mxu1 %v6883_v33 }
 0x1a7   : > { %2258 = vmatprep.mubr.f32.mxu0 %v6891_v16  ;;  %2580 = vmatprep.mubr.f32.mxu1 %v6891_v16 }
 0x1aa   : > { %2259 = vmatmul.mubr.f32.gmra.mrb[88].mxu0 %v6893_v50  ;;  %2581 = vmatmul.mubr.f32.gmra.mrb[72].mxu1 %v6893_v50 }
 0x1ab   : > { %2264 = vmatprep.mubr.f32.mxu0 %v6904_v63  ;;  %2586 = vmatprep.mubr.f32.mxu1 %v6904_v63 }
 0x1ae   : > { %2265 = vmatmul.mubr.f32.gmra.mrb[90].mxu0 %v6906_v12  ;;  %2587 = vmatmul.mubr.f32.gmra.mrb[74].mxu1 %v6906_v12 }
 0x1af   : > { %2270 = vmatprep.mubr.f32.mxu0 %v6918_v34  ;;  %2592 = vmatprep.mubr.f32.mxu1 %v6918_v34 }
 0x1b2   : > { %2271 = vmatmul.mubr.f32.gmra.mrb[92].mxu0 %v6920_v37  ;;  %2593 = vmatmul.mubr.f32.gmra.mrb[76].mxu1 %v6920_v37 }
 0x1b3   : > { %2276 = vmatprep.mubr.f32.mxu0 %v9404_v17  ;;  %2598 = vmatprep.mubr.f32.mxu1 %v9404_v17 }
 0x1b6   : > { %2277 = vmatmul.mubr.f32.gmra.mrb[94].mxu0 %v9405_v43  ;;  %2599 = vmatmul.mubr.f32.gmra.mrb[78].mxu1 %v9405_v43 }
 0x1b7   : > { %2347 = vmatprep.mubr.f32.mxu0 %v9402_v6  ;;  %2669 = vmatprep.mubr.f32.mxu1 %v9402_v6 }
 0x1ba   : > { %2348 = vmatmul.mubr.f32.vlgmr.msra.gmra.mrb[64].mxu0 %v9406_v7  ;;  %2670 = vmatmul.mubr.f32.vlgmr.msra.gmra.mrb[48].mxu1 %v9406_v7  ;;  %v896_v7 = vld [vmem:[%s9367_s3 + $0x1d0] sm:$0xff] }
 0x1bb   : > { %5242 = vmatpush1.bf16.msra.mxu0 %v5241_v42  ;;  %5338 = vmatpush1.bf16.msra.mxu1 %v5337_v53  ;;  %v908_v42 = vld [vmem:[%s9367_s3 + $0x230] sm:$0xff]  ;;  %v5247_v53 = vpack.c.bf16 %v907_v18, %v895_v9  ;;  %v918_v18 = vld [vmem:[%s9367_s3 + $0x280] sm:$0xff] }
 0x1bc   : > { %2353 = vmatprep.mubr.f32.mxu0 %v9402_v6  ;;  %2675 = vmatprep.mubr.f32.mxu1 %v9402_v6  ;;  %v5345_v9 = vpack.c.bf16 %v908_v42, %v896_v7  ;;  %v932_v7 = vld [vmem:[%s9367_s3 + $0x2f0] sm:$0xff]  ;;  %v945_v42 = vld [vmem:[%s9367_s3 + $0x358] sm:$0xff] }
 0x1bd   : > { %5244 = vmatprep.subr.bf16.mxu0 %v5243_v21  ;;  %5340 = vmatprep.subr.bf16.mxu1 %v5339_v11  ;;  %v933_v21 = vld [vmem:[%s9367_s3 + $0x2f8] sm:$0xff]  ;;  %v5249_v11 = vpack.c.bf16 %v906_v38, %v894_v29  ;;  %v943_v29 = vld [vmem:[%s9367_s3 + $0x348] sm:$0xff] }
 0x1be   : > { %2354 = vmatmul.mubr.f32.gmra.mrb[66].mxu0 %v6999_v25  ;;  %2676 = vmatmul.mubr.f32.gmra.mrb[50].mxu1 %v6999_v25  ;;  %v955_v38 = vld [vmem:[%s9367_s3 + $0x3a8] sm:$0xff] }
 0x1bf   : > { %5246 = vmatpush1.bf16.msra.mxu0 %v5245_v49  ;;  %5342 = vmatpush1.bf16.msra.mxu1 %v5341_v39  ;;  %v5251_v49 = vpack.c.bf16 %v931_v51, %v919_v57  ;;  %v5347_v39 = vpack.c.bf16 %v933_v21, %v921_v0  ;;  %v5349_v57 = vpack.c.bf16 %v932_v7, %v920_v35  ;;  %v942_v51 = vld [vmem:[%s9367_s3 + $0x340] sm:$0xff]  ;;  %v944_v21 = vld [vmem:[%s9367_s3 + $0x350] sm:$0xff]  ;;  %v979_v35 = vld [vmem:[%s9367_s3 + $0x468] sm:$0xff] }
 0x1c0   : > { %2359 = vmatprep.mubr.f32.mxu0 %v9402_v6  ;;  %2681 = vmatprep.mubr.f32.mxu1 %v9402_v6  ;;  %v954_v0 = vld [vmem:[%s9367_s3 + $0x3a0] sm:$0xff]  ;;  %v969_v7 = vld [vmem:[%s9367_s3 + $0x418] sm:$0xff] }
 0x1c1   : > { %5248 = vmatprep.subr.bf16.mxu0 %v5247_v53  ;;  %5344 = vmatprep.subr.bf16.mxu1 %v5343_v58  ;;  %v957_v53 = vld [vmem:[%s9367_s3 + $0x3b8] sm:$0xff]  ;;  %v5253_v58 = vpack.c.bf16 %v930_v40, %v918_v18  ;;  %v967_v40 = vld [vmem:[%s9367_s3 + $0x408] sm:$0xff] }
 0x1c2   : > { %2360 = vmatmul.mubr.f32.gmra.mrb[68].mxu0 %v7015_v62  ;;  %2682 = vmatmul.mubr.f32.gmra.mrb[52].mxu1 %v7015_v62  ;;  %v5351_v18 = vpack.c.bf16 %v957_v53, %v945_v42  ;;  %v978_v42 = vld [vmem:[%s9367_s3 + $0x460] sm:$0xff]  ;;  %v968_v53 = vld [vmem:[%s9367_s3 + $0x410] sm:$0xff] }
 0x1c3   : > { %5250 = vmatpush1.bf16.msra.mxu0 %v5249_v11  ;;  %5346 = vmatpush1.bf16.msra.mxu1 %v5345_v9  ;;  %v956_v11 = vld [vmem:[%s9367_s3 + $0x3b0] sm:$0xff]  ;;  %v5255_v9 = vpack.c.bf16 %v955_v38, %v943_v29  ;;  %v966_v38 = vld [vmem:[%s9367_s3 + $0x400] sm:$0xff] }
 0x1c4   : > { %2365 = vmatprep.mubr.f32.mxu0 %v9402_v6  ;;  %2687 = vmatprep.mubr.f32.mxu1 %v9402_v6  ;;  %v5353_v29 = vpack.c.bf16 %v956_v11, %v944_v21  ;;  %v1003_v21 = vld [vmem:[%s9367_s3 + $0x528] sm:$0xff]  ;;  %v993_v11 = vld [vmem:[%s9367_s3 + $0x4d8] sm:$0xff] }
 0x1c5   : > { %5252 = vmatprep.subr.bf16.mxu0 %v5251_v49  ;;  %5348 = vmatprep.subr.bf16.mxu1 %v5347_v39  ;;  %v981_v49 = vld [vmem:[%s9367_s3 + $0x478] sm:$0xff]  ;;  %v5257_v39 = vpack.c.bf16 %v954_v0, %v942_v51  ;;  %v991_v0 = vld [vmem:[%s9367_s3 + $0x4c8] sm:$0xff] }
 0x1c6   : > { %2366 = vmatmul.mubr.f32.gmra.mrb[70].mxu0 %v7063_v5  ;;  %2688 = vmatmul.mubr.f32.gmra.mrb[54].mxu1 %v7063_v5  ;;  %v5355_v51 = vpack.c.bf16 %v981_v49, %v969_v7  ;;  %v1002_v7 = vld [vmem:[%s9367_s3 + $0x520] sm:$0xff]  ;;  %v992_v49 = vld [vmem:[%s9367_s3 + $0x4d0] sm:$0xff] }
 0x1c7   : > { %5254 = vmatpush1.bf16.msra.mxu0 %v5253_v58  ;;  %5350 = vmatpush1.bf16.msra.mxu1 %v5349_v57  ;;  %v980_v58 = vld [vmem:[%s9367_s3 + $0x470] sm:$0xff]  ;;  %v5259_v57 = vpack.c.bf16 %v979_v35, %v967_v40  ;;  %v990_v35 = vld [vmem:[%s9367_s3 + $0x4c0] sm:$0xff] }
 0x1c8   : > { %2371 = vmatprep.mubr.f32.mxu0 %v9402_v6  ;;  %2693 = vmatprep.mubr.f32.mxu1 %v9402_v6  ;;  %v5357_v40 = vpack.c.bf16 %v980_v58, %v968_v53  ;;  %v1027_v53 = vld [vmem:[%s9367_s3 + $0x5e8] sm:$0xff]  ;;  %v1017_v58 = vld [vmem:[%s9367_s3 + $0x598] sm:$0xff] }
 0x1c9   : > { %5256 = vmatprep.subr.bf16.mxu0 %v5255_v9  ;;  %5352 = vmatprep.subr.bf16.mxu1 %v5351_v18  ;;  %v1005_v9 = vld [vmem:[%s9367_s3 + $0x538] sm:$0xff]  ;;  %v5261_v18 = vpack.c.bf16 %v978_v42, %v966_v38  ;;  %v1015_v42 = vld [vmem:[%s9367_s3 + $0x588] sm:$0xff] }
 0x1ca   : > { %2372 = vmatmul.mubr.f32.gmra.mrb[72].mxu0 %v7079_v59  ;;  %2694 = vmatmul.mubr.f32.gmra.mrb[56].mxu1 %v7079_v59  ;;  %v5359_v38 = vpack.c.bf16 %v1005_v9, %v993_v11  ;;  %v1026_v11 = vld [vmem:[%s9367_s3 + $0x5e0] sm:$0xff]  ;;  %v1016_v9 = vld [vmem:[%s9367_s3 + $0x590] sm:$0xff] }
 0x1cb   : > { %5258 = vmatpush1.bf16.msra.mxu0 %v5257_v39  ;;  %5354 = vmatpush1.bf16.msra.mxu1 %v5353_v29  ;;  %v1004_v39 = vld [vmem:[%s9367_s3 + $0x530] sm:$0xff]  ;;  %v5263_v29 = vpack.c.bf16 %v1003_v21, %v991_v0  ;;  %v1014_v21 = vld [vmem:[%s9367_s3 + $0x580] sm:$0xff] }
 0x1cc   : > { %2377 = vmatprep.mubr.f32.mxu0 %v9402_v6  ;;  %2699 = vmatprep.mubr.f32.mxu1 %v9402_v6  ;;  %v5361_v0 = vpack.c.bf16 %v1004_v39, %v992_v49  ;;  %v1051_v49 = vld [vmem:[%s9367_s3 + $0x6a8] sm:$0xff]  ;;  %v1041_v39 = vld [vmem:[%s9367_s3 + $0x658] sm:$0xff] }
 0x1cd   : > { %5260 = vmatprep.subr.bf16.mxu0 %v5259_v57  ;;  %5356 = vmatprep.subr.bf16.mxu1 %v5355_v51  ;;  %v1029_v57 = vld [vmem:[%s9367_s3 + $0x5f8] sm:$0xff]  ;;  %v5265_v51 = vpack.c.bf16 %v1002_v7, %v990_v35  ;;  %v1039_v7 = vld [vmem:[%s9367_s3 + $0x648] sm:$0xff] }
 0x1ce   : > { %2378 = vmatmul.mubr.f32.gmra.mrb[74].mxu0 %v7127_v52  ;;  %2700 = vmatmul.mubr.f32.gmra.mrb[58].mxu1 %v7127_v52  ;;  %v5363_v35 = vpack.c.bf16 %v1029_v57, %v1017_v58  ;;  %v1050_v58 = vld [vmem:[%s9367_s3 + $0x6a0] sm:$0xff]  ;;  %v1040_v57 = vld [vmem:[%s9367_s3 + $0x650] sm:$0xff] }
 0x1cf   : > { %5262 = vmatpush1.bf16.msra.mxu0 %v5261_v18  ;;  %5358 = vmatpush1.bf16.msra.mxu1 %v5357_v40  ;;  %v1028_v18 = vld [vmem:[%s9367_s3 + $0x5f0] sm:$0xff]  ;;  %v5267_v40 = vpack.c.bf16 %v1027_v53, %v1015_v42  ;;  %v1038_v53 = vld [vmem:[%s9367_s3 + $0x640] sm:$0xff] }
 0x1d0   : > { %2383 = vmatprep.mubr.f32.mxu0 %v9402_v6  ;;  %2705 = vmatprep.mubr.f32.mxu1 %v9402_v6  ;;  %v5365_v42 = vpack.c.bf16 %v1028_v18, %v1016_v9  ;;  %v1075_v9 = vld [vmem:[%s9367_s3 + $0x768] sm:$0xff]  ;;  %v1065_v18 = vld [vmem:[%s9367_s3 + $0x718] sm:$0xff] }
 0x1d1   : > { %5264 = vmatprep.subr.bf16.mxu0 %v5263_v29  ;;  %5360 = vmatprep.subr.bf16.mxu1 %v5359_v38  ;;  %v1053_v29 = vld [vmem:[%s9367_s3 + $0x6b8] sm:$0xff]  ;;  %v5269_v38 = vpack.c.bf16 %v1026_v11, %v1014_v21  ;;  %v1063_v11 = vld [vmem:[%s9367_s3 + $0x708] sm:$0xff] }
 0x1d2   : > { %2384 = vmatmul.mubr.f32.gmra.mrb[76].mxu0 %v7143_v61  ;;  %2706 = vmatmul.mubr.f32.gmra.mrb[60].mxu1 %v7143_v61  ;;  %v5367_v21 = vpack.c.bf16 %v1053_v29, %v1041_v39  ;;  %v1074_v39 = vld [vmem:[%s9367_s3 + $0x760] sm:$0xff]  ;;  %v1064_v29 = vld [vmem:[%s9367_s3 + $0x710] sm:$0xff] }
 0x1d3   : > { %5266 = vmatpush1.bf16.msra.mxu0 %v5265_v51  ;;  %5362 = vmatpush1.bf16.msra.mxu1 %v5361_v0  ;;  %v1052_v51 = vld [vmem:[%s9367_s3 + $0x6b0] sm:$0xff]  ;;  %v5271_v0 = vpack.c.bf16 %v1051_v49, %v1039_v7  ;;  %v1062_v49 = vld [vmem:[%s9367_s3 + $0x700] sm:$0xff] }
 0x1d4   : > { %2389 = vmatprep.mubr.f32.mxu0 %v9402_v6  ;;  %2711 = vmatprep.mubr.f32.mxu1 %v9402_v6  ;;  %v5369_v7 = vpack.c.bf16 %v1052_v51, %v1040_v57  ;;  %v1099_v57 = vld [vmem:[%s9367_s3 + $0x828] sm:$0xff]  ;;  %v1089_v51 = vld [vmem:[%s9367_s3 + $0x7d8] sm:$0xff] }
 0x1d5   : > { %5268 = vmatprep.subr.bf16.mxu0 %v5267_v40  ;;  %5364 = vmatprep.subr.bf16.mxu1 %v5363_v35  ;;  %v1077_v40 = vld [vmem:[%s9367_s3 + $0x778] sm:$0xff]  ;;  %v5273_v35 = vpack.c.bf16 %v1050_v58, %v1038_v53  ;;  %v1087_v58 = vld [vmem:[%s9367_s3 + $0x7c8] sm:$0xff] }
 0x1d6   : > { %2390 = vmatmul.mubr.f32.gmra.mrb[78].mxu0 %v7191_v23  ;;  %2712 = vmatmul.mubr.f32.gmra.mrb[62].mxu1 %v7191_v23  ;;  %v5371_v53 = vpack.c.bf16 %v1077_v40, %v1065_v18  ;;  %v1098_v18 = vld [vmem:[%s9367_s3 + $0x820] sm:$0xff]  ;;  %v1088_v40 = vld [vmem:[%s9367_s3 + $0x7d0] sm:$0xff] }
 0x1d7   : > { %5270 = vmatpush1.bf16.msra.mxu0 %v5269_v38  ;;  %5366 = vmatpush1.bf16.msra.mxu1 %v5365_v42  ;;  %v1076_v38 = vld [vmem:[%s9367_s3 + $0x770] sm:$0xff]  ;;  %v5275_v42 = vpack.c.bf16 %v1075_v9, %v1063_v11  ;;  %v1086_v9 = vld [vmem:[%s9367_s3 + $0x7c0] sm:$0xff] }
 0x1d8   : > { %2395 = vmatprep.mubr.f32.mxu0 %v9402_v6  ;;  %2717 = vmatprep.mubr.f32.mxu1 %v9402_v6  ;;  %v5373_v11 = vpack.c.bf16 %v1076_v38, %v1064_v29  ;;  %v1123_v29 = vld [vmem:[%s9367_s3 + $0x8e8] sm:$0xff]  ;;  %v1113_v38 = vld [vmem:[%s9367_s3 + $0x898] sm:$0xff] }
 0x1d9   : > { %5272 = vmatprep.subr.bf16.mxu0 %v5271_v0  ;;  %5368 = vmatprep.subr.bf16.mxu1 %v5367_v21  ;;  %v1101_v0 = vld [vmem:[%s9367_s3 + $0x838] sm:$0xff]  ;;  %v5277_v21 = vpack.c.bf16 %v1074_v39, %v1062_v49  ;;  %v1111_v39 = vld [vmem:[%s9367_s3 + $0x888] sm:$0xff] }
 0x1da   : > { %2396 = vmatmul.mubr.f32.gmra.mrb[80].mxu0 %v7207_v36  ;;  %2718 = vmatmul.mubr.f32.gmra.mrb[64].mxu1 %v7207_v36  ;;  %v5375_v49 = vpack.c.bf16 %v1101_v0, %v1089_v51  ;;  %v1122_v51 = vld [vmem:[%s9367_s3 + $0x8e0] sm:$0xff]  ;;  %v1112_v0 = vld [vmem:[%s9367_s3 + $0x890] sm:$0xff] }
 0x1db   : > { %5274 = vmatpush1.bf16.msra.mxu0 %v5273_v35  ;;  %5370 = vmatpush1.bf16.msra.mxu1 %v5369_v7  ;;  %v1100_v35 = vld [vmem:[%s9367_s3 + $0x830] sm:$0xff]  ;;  %v5279_v7 = vpack.c.bf16 %v1099_v57, %v1087_v58  ;;  %v1110_v57 = vld [vmem:[%s9367_s3 + $0x880] sm:$0xff] }
 0x1dc   : > { %2401 = vmatprep.mubr.f32.mxu0 %v9402_v6  ;;  %2723 = vmatprep.mubr.f32.mxu1 %v9402_v6  ;;  %v5377_v58 = vpack.c.bf16 %v1100_v35, %v1088_v40  ;;  %v1147_v40 = vld [vmem:[%s9367_s3 + $0x9a8] sm:$0xff]  ;;  %v1137_v35 = vld [vmem:[%s9367_s3 + $0x958] sm:$0xff] }
 0x1dd   : > { %5276 = vmatprep.subr.bf16.mxu0 %v5275_v42  ;;  %5372 = vmatprep.subr.bf16.mxu1 %v5371_v53  ;;  %v1125_v42 = vld [vmem:[%s9367_s3 + $0x8f8] sm:$0xff]  ;;  %v5281_v53 = vpack.c.bf16 %v1098_v18, %v1086_v9  ;;  %v1135_v18 = vld [vmem:[%s9367_s3 + $0x948] sm:$0xff] }
 0x1de   : > { %2402 = vmatmul.mubr.f32.gmra.mrb[82].mxu0 %v7255_v27  ;;  %2724 = vmatmul.mubr.f32.gmra.mrb[66].mxu1 %v7255_v27  ;;  %v5379_v9 = vpack.c.bf16 %v1125_v42, %v1113_v38  ;;  %v1146_v38 = vld [vmem:[%s9367_s3 + $0x9a0] sm:$0xff]  ;;  %v1136_v42 = vld [vmem:[%s9367_s3 + $0x950] sm:$0xff] }
 0x1df   : > { %5278 = vmatpush1.bf16.msra.mxu0 %v5277_v21  ;;  %5374 = vmatpush1.bf16.msra.mxu1 %v5373_v11  ;;  %v1124_v21 = vld [vmem:[%s9367_s3 + $0x8f0] sm:$0xff]  ;;  %v5283_v11 = vpack.c.bf16 %v1123_v29, %v1111_v39  ;;  %v1134_v29 = vld [vmem:[%s9367_s3 + $0x940] sm:$0xff] }
 0x1e0   : > { %2407 = vmatprep.mubr.f32.mxu0 %v9402_v6  ;;  %2729 = vmatprep.mubr.f32.mxu1 %v9402_v6  ;;  %v5381_v39 = vpack.c.bf16 %v1124_v21, %v1112_v0  ;;  %v1171_v0 = vld [vmem:[%s9367_s3 + $0xa68] sm:$0xff]  ;;  %v1161_v21 = vld [vmem:[%s9367_s3 + $0xa18] sm:$0xff] }
 0x1e1   : > { %5280 = vmatprep.subr.bf16.mxu0 %v5279_v7  ;;  %5376 = vmatprep.subr.bf16.mxu1 %v5375_v49  ;;  %v1149_v7 = vld [vmem:[%s9367_s3 + $0x9b8] sm:$0xff]  ;;  %v5285_v49 = vpack.c.bf16 %v1122_v51, %v1110_v57  ;;  %v1159_v51 = vld [vmem:[%s9367_s3 + $0xa08] sm:$0xff] }
 0x1e2   : > { %2408 = vmatmul.mubr.f32.gmra.mrb[84].mxu0 %v7271_v3  ;;  %2730 = vmatmul.mubr.f32.gmra.mrb[68].mxu1 %v7271_v3  ;;  %v5383_v57 = vpack.c.bf16 %v1149_v7, %v1137_v35  ;;  %v1170_v35 = vld [vmem:[%s9367_s3 + $0xa60] sm:$0xff]  ;;  %v1160_v7 = vld [vmem:[%s9367_s3 + $0xa10] sm:$0xff] }
 0x1e3   : > { %5282 = vmatpush1.bf16.msra.mxu0 %v5281_v53  ;;  %5378 = vmatpush1.bf16.msra.mxu1 %v5377_v58  ;;  %v1148_v53 = vld [vmem:[%s9367_s3 + $0x9b0] sm:$0xff]  ;;  %v5287_v58 = vpack.c.bf16 %v1147_v40, %v1135_v18  ;;  %v1158_v40 = vld [vmem:[%s9367_s3 + $0xa00] sm:$0xff] }
 0x1e4   : > { %2413 = vmatprep.mubr.f32.mxu0 %v9402_v6  ;;  %2735 = vmatprep.mubr.f32.mxu1 %v9402_v6  ;;  %v5385_v18 = vpack.c.bf16 %v1148_v53, %v1136_v42  ;;  %v1195_v42 = vld [vmem:[%s9367_s3 + $0xb28] sm:$0xff]  ;;  %v1185_v53 = vld [vmem:[%s9367_s3 + $0xad8] sm:$0xff] }
 0x1e5   : > { %5284 = vmatprep.subr.bf16.mxu0 %v5283_v11  ;;  %5380 = vmatprep.subr.bf16.mxu1 %v5379_v9  ;;  %v1173_v11 = vld [vmem:[%s9367_s3 + $0xa78] sm:$0xff]  ;;  %v5289_v9 = vpack.c.bf16 %v1146_v38, %v1134_v29  ;;  %v1183_v38 = vld [vmem:[%s9367_s3 + $0xac8] sm:$0xff] }
 0x1e6   : > { %2414 = vmatmul.mubr.f32.gmra.mrb[86].mxu0 %v7319_v15  ;;  %2736 = vmatmul.mubr.f32.gmra.mrb[70].mxu1 %v7319_v15  ;;  %v5387_v29 = vpack.c.bf16 %v1173_v11, %v1161_v21  ;;  %v1194_v21 = vld [vmem:[%s9367_s3 + $0xb20] sm:$0xff]  ;;  %v1184_v11 = vld [vmem:[%s9367_s3 + $0xad0] sm:$0xff] }
 0x1e7   : > { %5286 = vmatpush1.bf16.msra.mxu0 %v5285_v49  ;;  %5382 = vmatpush1.bf16.msra.mxu1 %v5381_v39  ;;  %v1172_v49 = vld [vmem:[%s9367_s3 + $0xa70] sm:$0xff]  ;;  %v5291_v39 = vpack.c.bf16 %v1171_v0, %v1159_v51  ;;  %v1182_v0 = vld [vmem:[%s9367_s3 + $0xac0] sm:$0xff] }
 0x1e8   : > { %2419 = vmatprep.mubr.f32.mxu0 %v9402_v6  ;;  %2741 = vmatprep.mubr.f32.mxu1 %v9402_v6  ;;  %v5389_v51 = vpack.c.bf16 %v1172_v49, %v1160_v7  ;;  %v1219_v7 = vld [vmem:[%s9367_s3 + $0xbe8] sm:$0xff]  ;;  %v1209_v49 = vld [vmem:[%s9367_s3 + $0xb98] sm:$0xff] }
 0x1e9   : > { %5288 = vmatprep.subr.bf16.mxu0 %v5287_v58  ;;  %5384 = vmatprep.subr.bf16.mxu1 %v5383_v57  ;;  %v1197_v58 = vld [vmem:[%s9367_s3 + $0xb38] sm:$0xff]  ;;  %v5293_v57 = vpack.c.bf16 %v1170_v35, %v1158_v40  ;;  %v1207_v35 = vld [vmem:[%s9367_s3 + $0xb88] sm:$0xff] }
 0x1ea   : > { %2420 = vmatmul.mubr.f32.gmra.mrb[88].mxu0 %v7335_v19  ;;  %2742 = vmatmul.mubr.f32.gmra.mrb[72].mxu1 %v7335_v19  ;;  %v5391_v40 = vpack.c.bf16 %v1197_v58, %v1185_v53  ;;  %v1218_v53 = vld [vmem:[%s9367_s3 + $0xbe0] sm:$0xff]  ;;  %v1208_v58 = vld [vmem:[%s9367_s3 + $0xb90] sm:$0xff] }
 0x1eb   : > { %5290 = vmatpush1.bf16.msra.mxu0 %v5289_v9  ;;  %5386 = vmatpush1.bf16.msra.mxu1 %v5385_v18  ;;  %v1196_v9 = vld [vmem:[%s9367_s3 + $0xb30] sm:$0xff]  ;;  %v5295_v18 = vpack.c.bf16 %v1195_v42, %v1183_v38  ;;  %v1206_v42 = vld [vmem:[%s9367_s3 + $0xb80] sm:$0xff] }
 0x1ec   : > { %2425 = vmatprep.mubr.f32.mxu0 %v9402_v6  ;;  %2747 = vmatprep.mubr.f32.mxu1 %v9402_v6  ;;  %v5393_v38 = vpack.c.bf16 %v1196_v9, %v1184_v11  ;;  %v1243_v11 = vld [vmem:[%s9367_s3 + $0xca8] sm:$0xff]  ;;  %v1233_v9 = vld [vmem:[%s9367_s3 + $0xc58] sm:$0xff] }
 0x1ed   : > { %5292 = vmatprep.subr.bf16.mxu0 %v5291_v39  ;;  %5388 = vmatprep.subr.bf16.mxu1 %v5387_v29  ;;  %v1221_v39 = vld [vmem:[%s9367_s3 + $0xbf8] sm:$0xff]  ;;  %v5297_v29 = vpack.c.bf16 %v1194_v21, %v1182_v0  ;;  %v1231_v21 = vld [vmem:[%s9367_s3 + $0xc48] sm:$0xff] }
 0x1ee   : > { %2426 = vmatmul.mubr.f32.gmra.mrb[90].mxu0 %v7383_v45  ;;  %2748 = vmatmul.mubr.f32.gmra.mrb[74].mxu1 %v7383_v45  ;;  %v5395_v0 = vpack.c.bf16 %v1221_v39, %v1209_v49  ;;  %v1242_v49 = vld [vmem:[%s9367_s3 + $0xca0] sm:$0xff]  ;;  %v1232_v39 = vld [vmem:[%s9367_s3 + $0xc50] sm:$0xff] }
 0x1ef   : > { %5294 = vmatpush1.bf16.msra.mxu0 %v5293_v57  ;;  %5390 = vmatpush1.bf16.msra.mxu1 %v5389_v51  ;;  %v1220_v57 = vld [vmem:[%s9367_s3 + $0xbf0] sm:$0xff]  ;;  %v5299_v51 = vpack.c.bf16 %v1219_v7, %v1207_v35  ;;  %v1230_v7 = vld [vmem:[%s9367_s3 + $0xc40] sm:$0xff] }
 0x1f0   : > { %2431 = vmatprep.mubr.f32.mxu0 %v9402_v6  ;;  %2753 = vmatprep.mubr.f32.mxu1 %v9402_v6  ;;  %v5397_v35 = vpack.c.bf16 %v1220_v57, %v1208_v58  ;;  %v1267_v58 = vld [vmem:[%s9367_s3 + $0xd68] sm:$0xff]  ;;  %v1257_v57 = vld [vmem:[%s9367_s3 + $0xd18] sm:$0xff] }
 0x1f1   : > { %5296 = vmatprep.subr.bf16.mxu0 %v5295_v18  ;;  %5392 = vmatprep.subr.bf16.mxu1 %v5391_v40  ;;  %v1245_v18 = vld [vmem:[%s9367_s3 + $0xcb8] sm:$0xff]  ;;  %v5301_v40 = vpack.c.bf16 %v1218_v53, %v1206_v42  ;;  %v1255_v53 = vld [vmem:[%s9367_s3 + $0xd08] sm:$0xff] }
 0x1f2   : > { %2432 = vmatmul.mubr.f32.gmra.mrb[92].mxu0 %v7399_v2  ;;  %2754 = vmatmul.mubr.f32.gmra.mrb[76].mxu1 %v7399_v2  ;;  %v5399_v42 = vpack.c.bf16 %v1245_v18, %v1233_v9  ;;  %v1266_v9 = vld [vmem:[%s9367_s3 + $0xd60] sm:$0xff]  ;;  %v5307_v18 = vpack.c.bf16 %v1267_v58, %v1255_v53 }
 0x1f3   : > { %5298 = vmatpush1.bf16.msra.mxu0 %v5297_v29  ;;  %5394 = vmatpush1.bf16.msra.mxu1 %v5393_v38  ;;  %v1244_v29 = vld [vmem:[%s9367_s3 + $0xcb0] sm:$0xff]  ;;  %v5303_v38 = vpack.c.bf16 %v1243_v11, %v1231_v21  ;;  %v1254_v11 = vld [vmem:[%s9367_s3 + $0xd00] sm:$0xff] }
 0x1f4   : > { %2437 = vmatprep.mubr.f32.mxu0 %v9402_v6  ;;  %2759 = vmatprep.mubr.f32.mxu1 %v9402_v6  ;;  %v5401_v21 = vpack.c.bf16 %v1244_v29, %v1232_v39  ;;  %v1293_v39 = vld [vmem:[%s9367_s3 + $0xe38] sm:$0xff]  ;;  %v5309_v29 = vpack.c.bf16 %v1266_v9, %v1254_v11 }
 0x1f5   : > { %5300 = vmatprep.subr.bf16.mxu0 %v5299_v51  ;;  %5396 = vmatprep.subr.bf16.mxu1 %v5395_v0  ;;  %v1269_v51 = vld [vmem:[%s9367_s3 + $0xd78] sm:$0xff]  ;;  %v5305_v0 = vpack.c.bf16 %v1242_v49, %v1230_v7  ;;  %v1291_v7 = vld [vmem:[%s9367_s3 + $0xe28] sm:$0xff] }
 0x1f6   : > { %2438 = vmatmul.mubr.f32.gmra.mrb[94].mxu0 %v7445_v4  ;;  %2760 = vmatmul.mubr.f32.gmra.mrb[78].mxu1 %v7445_v4  ;;  %v5403_v4 = vpack.c.bf16 %v1269_v51, %v1257_v57  ;;  %v1281_v49 = vld [vmem:[%s9367_s3 + $0xdd8] sm:$0xff]  ;;  %v1280_v57 = vld [vmem:[%s9367_s3 + $0xdd0] sm:$0xff]  ;;  %v1303_v51 = vld [vmem:[%s9367_s3 + $0xe88] sm:$0xff] }
 0x1f7   : > { %5302 = vmatpush1.bf16.msra.mxu0 %v5301_v40  ;;  %5398 = vmatpush1.bf16.msra.mxu1 %v5397_v35  ;;  %v1256_v40 = vld [vmem:[%s9367_s3 + $0xd10] sm:$0xff]  ;;  %v1279_v35 = vld [vmem:[%s9367_s3 + $0xdc8] sm:$0xff]  ;;  %v5407_v58 = vpack.c.bf16 %v1293_v39, %v1281_v49  ;;  %v9407_v11 = vld [vmem:[#allocation7_spill] sm:$0xff] }
 0x1f8   : > { %2830 = vmatprep.mubr.f32.mxu0 %v6571_v20  ;;  %3152 = vmatprep.mubr.f32.mxu1 %v6571_v20  ;;  %v1268_v20 = vld [vmem:[%s9367_s3 + $0xd70] sm:$0xff]  ;;  %v5311_v53 = vpack.c.bf16 %v1291_v7, %v1279_v35  ;;  %v1327_v39 = vld [vmem:[%s9367_s3 + $0xf48] sm:$0xff] }
 0x1f9   : > { %5304 = vmatprep.subr.bf16.mxu0 %v5303_v38  ;;  %5400 = vmatprep.subr.bf16.mxu1 %v5399_v42  ;;  %v1278_v38 = vld [vmem:[%s9367_s3 + $0xdc0] sm:$0xff]  ;;  %v1304_v7 = vld [vmem:[%s9367_s3 + $0xe90] sm:$0xff] }
 0x1fa   : > { %2831 = vmatmul.mubr.f32.vlgmr.msra.gmra.mrb[96].mxu0 %v6579_v26  ;;  %3153 = vmatmul.mubr.f32.vlgmr.msra.gmra.mrb[80].mxu1 %v6579_v26  ;;  %v5405_v26 = vpack.c.bf16 %v1268_v20, %v1256_v40  ;;  %v1290_v42 = vld [vmem:[%s9367_s3 + $0xe20] sm:$0xff]  ;;  %v1316_v49 = vld [vmem:[%s9367_s3 + $0xef0] sm:$0xff] }
 0x1fb   : > { %5306 = vmatpush1.bf16.msra.mxu0 %v5305_v0  ;;  %5402 = vmatpush1.bf16.msra.mxu1 %v5401_v21  ;;  %v1305_v0 = vld [vmem:[%s9367_s3 + $0xe98] sm:$0xff]  ;;  %v5313_v9 = vpack.c.bf16 %v1290_v42, %v1278_v38  ;;  %v1314_v40 = vld [vmem:[%s9367_s3 + $0xee0] sm:$0xff] }
 0x1fc   : > { %2836 = vmatprep.mubr.f32.mxu0 %v6609_v41  ;;  %3158 = vmatprep.mubr.f32.mxu1 %v6609_v41  ;;  %v1292_v41 = vld [vmem:[%s9367_s3 + $0xe30] sm:$0xff]  ;;  %v1317_v21 = vld [vmem:[%s9367_s3 + $0xef8] sm:$0xff] }
 0x1fd   : > { %5308 = vmatprep.subr.bf16.mxu0 %v5307_v18  ;;  %5404 = vmatprep.subr.bf16.mxu1 %v5403_v4  ;;  %v1315_v4 = vld [vmem:[%s9367_s3 + $0xee8] sm:$0xff]  ;;  %v1302_v18 = vld [vmem:[%s9367_s3 + $0xe80] sm:$0xff]  ;;  %v5411_v35 = vpack.c.bf16 %v1317_v21, %v1305_v0  ;;  %v1341_v38 = vld [vmem:[%s9367_s3 + $0xfb8] sm:$0xff] }
 0x1fe   : > { %2837 = vmatmul.mubr.f32.gmra.mrb[98].mxu0 %v6617_v46  ;;  %3159 = vmatmul.mubr.f32.gmra.mrb[82].mxu1 %v6617_v46  ;;  %v5409_v46 = vpack.c.bf16 %v1292_v41, %v1280_v57  ;;  %v5315_v20 = vpack.c.bf16 %v1315_v4, %v1303_v51  ;;  %v5317_v42 = vpack.c.bf16 %v1314_v40, %v1302_v18  ;;  %v1340_v51 = vld [vmem:[%s9367_s3 + $0xfb0] sm:$0xff]  ;;  %v1351_v4 = vld [vmem:[%s9367_s3 + $0x1008] sm:$0xff]  ;;  %v1353_v21 = vld [vmem:[%s9367_s3 + $0x1018] sm:$0xff] }
 0x1ff   : > { %2842 = vmatprep.mubr.f32.mxu0 %v9407_v11  ;;  %3164 = vmatprep.mubr.f32.mxu1 %v9407_v11  ;;  %v1363_v0 = vld [vmem:[%s9367_s3 + $0x1068] sm:$0xff]  ;;  %v1365_v11 = vld [vmem:[%s9367_s3 + $0x1078] sm:$0xff] }
 0x200   : > { %5310 = vmatpush1.bf16.msra.mxu0 %v5309_v29  ;;  %5406 = vmatpush1.bf16.msra.mxu1 %v5405_v26  ;;  %v1339_v29 = vld [vmem:[%s9367_s3 + $0xfa8] sm:$0xff]  ;;  %v1329_v26 = vld [vmem:[%s9367_s3 + $0xf58] sm:$0xff] }
 0x201   : > { %5312 = vmatprep.subr.bf16.mxu0 %v5311_v53  ;;  %5408 = vmatprep.subr.bf16.mxu1 %v5407_v58  ;;  %v1326_v53 = vld [vmem:[%s9367_s3 + $0xf40] sm:$0xff]  ;;  %v5319_v57 = vpack.c.bf16 %v1339_v29, %v1327_v39  ;;  %v5415_v41 = vpack.c.bf16 %v1341_v38, %v1329_v26  ;;  %v1364_v39 = vld [vmem:[%s9367_s3 + $0x1070] sm:$0xff]  ;;  %v1375_v29 = vld [vmem:[%s9367_s3 + $0x10c8] sm:$0xff] }
 0x202   : > { %2843 = vmatmul.mubr.f32.gmra.mrb[100].mxu0 %v6655_v8  ;;  %3165 = vmatmul.mubr.f32.gmra.mrb[84].mxu1 %v6655_v8  ;;  %v5413_v8 = vpack.c.bf16 %v1316_v49, %v1304_v7  ;;  %v1338_v58 = vld [vmem:[%s9367_s3 + $0xfa0] sm:$0xff]  ;;  %v5419_v7 = vpack.c.bf16 %v1365_v11, %v1353_v21  ;;  %v1352_v49 = vld [vmem:[%s9367_s3 + $0x1010] sm:$0xff]  ;;  %v9409_v26 = vld [vmem:[#allocation5_spill] sm:$0xff] }
 0x203   : > { %2848 = vmatprep.mubr.f32.mxu0 %v6685_v24  ;;  %3170 = vmatprep.mubr.f32.mxu1 %v6685_v24  ;;  %v1328_v24 = vld [vmem:[%s9367_s3 + $0xf50] sm:$0xff]  ;;  %v5321_v18 = vpack.c.bf16 %v1338_v58, %v1326_v53  ;;  %v1389_v53 = vld [vmem:[%s9367_s3 + $0x1138] sm:$0xff] }
 0x204   : > { %5314 = vmatpush1.bf16.msra.mxu0 %v5313_v9  ;;  %5410 = vmatpush1.bf16.msra.mxu1 %v5409_v46  ;;  %v9408_v9 = vld [vmem:[#allocation4_spill] sm:$0xff]  ;;  %v5417_v40 = vpack.c.bf16 %v1340_v51, %v1328_v24  ;;  %v1376_v21 = vld [vmem:[%s9367_s3 + $0x10d0] sm:$0xff] }
 0x205   : > { %5316 = vmatprep.subr.bf16.mxu0 %v5315_v20  ;;  %5412 = vmatprep.subr.bf16.mxu1 %v5411_v35  ;;  %v9393_v46 = vsub.s32 3, %v9408_v9  ;;  %v1350_v20 = vld [vmem:[%s9367_s3 + $0x1000] sm:$0xff]  ;;  %v1388_v11 = vld [vmem:[%s9367_s3 + $0x1130] sm:$0xff] }
 0x206   : > { %2849 = vmatmul.mubr.f32.gmra.mrb[102].mxu0 %v6693_v32  ;;  %3171 = vmatmul.mubr.f32.gmra.mrb[86].mxu1 %v6693_v32  ;;  %v8293_v32 = vld [vmem:[%s9368_s4] sm:$0xff] }
 0x207   : > { %2854 = vmatprep.mubr.f32.mxu0 %v6723_v48  ;;  %3176 = vmatprep.mubr.f32.mxu1 %v6723_v48  ;;  %v1362_v35 = vld [vmem:[%s9367_s3 + $0x1060] sm:$0xff]  ;;  %v5323_v48 = vpack.c.bf16 %v1363_v0, %v1351_v4  ;;  %v8315_v38 = vrot.slane %v8293_v32, %v9409_v26 }
 0x208   : > { %5318 = vmatpush1.bf16.msra.mxu0 %v5317_v42  ;;  %5414 = vmatpush1.bf16.msra.mxu1 %v5413_v8  ;;  %v1387_v42 = vld [vmem:[%s9367_s3 + $0x1128] sm:$0xff]  ;;  %v1377_v8 = vld [vmem:[%s9367_s3 + $0x10d8] sm:$0xff]  ;;  %v5325_v58 = vpack.c.bf16 %v1362_v35, %v1350_v20  ;;  %v1386_v24 = vld [vmem:[%s9367_s3 + $0x1120] sm:$0xff] }
 0x209   : > { %5320 = vmatprep.subr.bf16.mxu0 %v5319_v57  ;;  %5416 = vmatprep.subr.bf16.mxu1 %v5415_v41  ;;  %v5421_v57 = vpack.c.bf16 %v1364_v39, %v1352_v49  ;;  %v1374_v41 = vld [vmem:[%s9367_s3 + $0x10c0] sm:$0xff]  ;;  %v5423_v0 = vpack.c.bf16 %v1389_v53, %v1377_v8  ;;  %v1413_v49 = vld [vmem:[%s9367_s3 + $0x11f8] sm:$0xff] }
 0x20a   : > { %2855 = vmatmul.mubr.f32.gmra.mrb[104].mxu0 %v6731_v54  ;;  %3177 = vmatmul.mubr.f32.gmra.mrb[88].mxu1 %v6731_v54  ;;  %v8331_v54 = vrot.slane %v8293_v32, %v9393_v46  ;;  %v1398_v8 = vld [vmem:[%s9367_s3 + $0x1180] sm:$0xff] }
 0x20b   : > { %2860 = vmatprep.mubr.f32.mxu0 %v6761_v1  ;;  %3182 = vmatprep.mubr.f32.mxu1 %v6761_v1  ;;  %v5327_v1 = vpack.c.bf16 %v1387_v42, %v1375_v29  ;;  %v5425_v42 = vpack.c.bf16 %v1388_v11, %v1376_v21 }
 0x20c   : > { %5322 = vmatpush1.bf16.msra.mxu0 %v5321_v18  ;;  %5418 = vmatpush1.bf16.msra.mxu1 %v5417_v40  ;;  %v1399_v18 = vld [vmem:[%s9367_s3 + $0x1188] sm:$0xff] }
 0x20d   : > { %v1705_v51 = vpop.f32.mrb[32].mxu0  ;;  %v8339_v4 = vpop.f32.mrb[16].mxu1  ;;  %5324 = vmatprep.subr.bf16.mxu0 %v5323_v48  ;;  %5420 = vmatprep.subr.bf16.mxu1 %v5419_v7  ;;  %v1411_v48 = vld [vmem:[%s9367_s3 + $0x11e8] sm:$0xff]  ;;  %v1401_v7 = vld [vmem:[%s9367_s3 + $0x1198] sm:$0xff] }
 0x20e   : > { %v5495_v40 = vadd.f32 %v1705_v51, %v8315_v38  ;;  %v8351_v20 = vpop.f32.mrb[33].mxu0  ;;  %v2029_v35 = vpop.f32.mrb[17].mxu1  ;;  %2861 = vmatmul.mubr.f32.gmra.mrb[106].mxu0 %v6769_v28  ;;  %3183 = vmatmul.mubr.f32.gmra.mrb[90].mxu1 %v6769_v28  ;;  %v5329_v28 = vpack.c.bf16 %v1386_v24, %v1374_v41  ;;  %v5427_v26 = vpack.c.bf16 %v1413_v49, %v1401_v7 }
 0x20f   : > { %v5528_v39 = vadd.f32 %v2029_v35, %v8331_v54  ;;  %2866 = vmatprep.mubr.f32.mxu0 %v6799_v47  ;;  %3188 = vmatprep.mubr.f32.mxu1 %v6799_v47  ;;  %v5331_v35 = vpack.c.bf16 %v1411_v48, %v1399_v18  ;;  %v1410_v47 = vld [vmem:[%s9367_s3 + $0x11e0] sm:$0xff] }
 0x210   : > { %v3410_v29 = vmax.f32 %v5495_v40, 0.0  ;;  %5326 = vmatpush1.bf16.msra.mxu0 %v5325_v58  ;;  %5422 = vmatpush1.bf16.msra.mxu1 %v5421_v57  ;;  %v1400_v58 = vld [vmem:[%s9367_s3 + $0x1190] sm:$0xff]  ;;  %v5333_v18 = vpack.c.bf16 %v1410_v47, %v1398_v8 }
 0x211   : > { %v3413_v53 = vmax.f32 %v5528_v39, 0.0  ;;  %v1711_v51 = vpop.f32.mrb[34].mxu0  ;;  %v8370_v46 = vpop.f32.mrb[18].mxu1  ;;  %5328 = vmatprep.subr.bf16.mxu0 %v5327_v1  ;;  %5424 = vmatprep.subr.bf16.mxu1 %v5423_v0  ;;  %v1412_v57 = vld [vmem:[%s9367_s3 + $0x11f0] sm:$0xff] }
 0x212   : > { %v5497_v41 = vadd.f32 %v1711_v51, %v8315_v38  ;;  %v8382_v24 = vpop.f32.mrb[35].mxu0  ;;  %v2035_v1 = vpop.f32.mrb[19].mxu1  ;;  %2867 = vmatmul.mubr.f32.gmra.mrb[108].mxu0 %v6807_v55  ;;  %3189 = vmatmul.mubr.f32.gmra.mrb[92].mxu1 %v6807_v55  ;;  %v5429_v40 = vpack.c.bf16 %v1412_v57, %v1400_v58 }
 0x213   : > { %v8386_v0 = vmax.f32 %v3410_v29, %v3413_v53  ;;  %v5530_v21 = vadd.f32 %v2035_v1, %v8331_v54  ;;  %2872 = vmatprep.mubr.f32.mxu0 %v6837_v22  ;;  %3194 = vmatprep.mubr.f32.mxu1 %v6837_v22 }
 0x214   : > { %v3422_v11 = vmax.f32 %v5497_v41, 0.0  ;;  %5330 = vmatpush1.bf16.msra.mxu0 %v5329_v28  ;;  %5426 = vmatpush1.bf16.msra.mxu1 %v5425_v42 }
 0x215   : > { %v3425_v48 = vmax.f32 %v5530_v21, 0.0  ;;  %v1717_v7 = vpop.f32.mrb[36].mxu0  ;;  %v8391_v49 = vpop.f32.mrb[20].mxu1  ;;  %5332 = vmatprep.subr.bf16.mxu0 %v5331_v35  ;;  %5428 = vmatprep.subr.bf16.mxu1 %v5427_v26 }
 0x216   : > { %v5499_v55 = vadd.f32 %v1717_v7, %v8315_v38  ;;  %v8394_v39 = vpop.f32.mrb[37].mxu0  ;;  %v2041_v29 = vpop.f32.mrb[21].mxu1  ;;  %2873 = vmatmul.mubr.f32.gmra.mrb[110].mxu0 %v6839_v31  ;;  %3195 = vmatmul.mubr.f32.gmra.mrb[94].mxu1 %v6839_v31 }
 0x217   : > { %v8398_v22 = vmax.f32 %v3422_v11, %v3425_v48  ;;  %v5532_v28 = vadd.f32 %v2041_v29, %v8331_v54  ;;  %2878 = vmatprep.mubr.f32.mxu0 %v6851_v44  ;;  %3200 = vmatprep.mubr.f32.mxu1 %v6851_v44 }
 0x218   : > { %v3434_v42 = vmax.f32 %v5499_v55, 0.0  ;;  %5334 = vmatpush1.bf16.msra.mxu0 %v5333_v18  ;;  %5430 = vmatpush1.bf16.msra.mxu1 %v5429_v40 }
 0x219   : > { %v3437_v26 = vmax.f32 %v5532_v28, 0.0  ;;  %v1723_v8 = vpop.f32.mrb[38].mxu0  ;;  %v8403_v53 = vpop.f32.mrb[22].mxu1 }
 0x21a   : > { %v5501_v51 = vadd.f32 %v1723_v8, %v8315_v38  ;;  %v8406_v35 = vpop.f32.mrb[39].mxu0  ;;  %v2047_v31 = vpop.f32.mrb[23].mxu1  ;;  %2879 = vmatmul.mubr.f32.gmra.mrb[112].mxu0 %v6853_v30  ;;  %3201 = vmatmul.mubr.f32.gmra.mrb[96].mxu1 %v6853_v30 }
 0x21b   : > { %v8410_v47 = vmax.f32 %v3434_v42, %v3437_v26  ;;  %v5534_v44 = vadd.f32 %v2047_v31, %v8331_v54  ;;  %2884 = vmatprep.mubr.f32.mxu0 %v6861_v56  ;;  %3206 = vmatprep.mubr.f32.mxu1 %v6861_v56 }
 0x21c   : > { %v3446_v58 = vmax.f32 %v5501_v51, 0.0 }
 0x21d   : > { %9410 = vst [vmem:[#allocation9_spill] sm:$0xff] %v8410_v47  ;;  %v3449_v57 = vmax.f32 %v5534_v44, 0.0  ;;  %v1729_v41 = vpop.f32.mrb[40].mxu0  ;;  %v8415_v1 = vpop.f32.mrb[24].mxu1 }
 0x21e   : > { %v5503_v21 = vadd.f32 %v1729_v41, %v8315_v38  ;;  %v8418_v11 = vpop.f32.mrb[41].mxu0  ;;  %v2053_v18 = vpop.f32.mrb[25].mxu1  ;;  %2885 = vmatmul.mubr.f32.gmra.mrb[114].mxu0 %v6863_v60  ;;  %3207 = vmatmul.mubr.f32.gmra.mrb[98].mxu1 %v6863_v60 }
 0x21f   : > { %v8422_v30 = vmax.f32 %v3446_v58, %v3449_v57  ;;  %v5536_v40 = vadd.f32 %v2053_v18, %v8331_v54  ;;  %2890 = vmatprep.mubr.f32.mxu0 %v6871_v10  ;;  %3212 = vmatprep.mubr.f32.mxu1 %v6871_v10 }
 0x220   : > { %v3458_v56 = vmax.f32 %v5503_v21, 0.0 }
 0x221   : > { %9411 = vst [vmem:[#allocation10_spill] sm:$0xff] %v8422_v30  ;;  %v3461_v48 = vmax.f32 %v5536_v40, 0.0  ;;  %v1735_v7 = vpop.f32.mrb[42].mxu0  ;;  %v8427_v55 = vpop.f32.mrb[26].mxu1 }
 0x222   : > { %v5505_v29 = vadd.f32 %v1735_v7, %v8315_v38  ;;  %v8430_v28 = vpop.f32.mrb[43].mxu0  ;;  %v2059_v42 = vpop.f32.mrb[27].mxu1  ;;  %2891 = vmatmul.mubr.f32.gmra.mrb[116].mxu0 %v6873_v14  ;;  %3213 = vmatmul.mubr.f32.gmra.mrb[100].mxu1 %v6873_v14 }
 0x223   : > { %v8434_v60 = vmax.f32 %v3458_v56, %v3461_v48  ;;  %v5538_v26 = vadd.f32 %v2059_v42, %v8331_v54  ;;  %2896 = vmatprep.mubr.f32.mxu0 %v6881_v13  ;;  %3218 = vmatprep.mubr.f32.mxu1 %v6881_v13 }
 0x224   : > { %v3470_v10 = vmax.f32 %v5505_v29, 0.0 }
 0x225   : > { %9412 = vst [vmem:[#allocation7_spill] sm:$0xff] %v8434_v60  ;;  %v3473_v8 = vmax.f32 %v5538_v26, 0.0  ;;  %v1741_v51 = vpop.f32.mrb[44].mxu0  ;;  %v8439_v31 = vpop.f32.mrb[28].mxu1 }
 0x226   : > { %v5507_v44 = vadd.f32 %v1741_v51, %v8315_v38  ;;  %v8442_v58 = vpop.f32.mrb[45].mxu0  ;;  %v2065_v57 = vpop.f32.mrb[29].mxu1  ;;  %2897 = vmatmul.mubr.f32.gmra.mrb[118].mxu0 %v6883_v33  ;;  %3219 = vmatmul.mubr.f32.gmra.mrb[102].mxu1 %v6883_v33 }
 0x227   : > { %v8446_v14 = vmax.f32 %v3470_v10, %v3473_v8  ;;  %v5540_v41 = vadd.f32 %v2065_v57, %v8331_v54  ;;  %2902 = vmatprep.mubr.f32.mxu0 %v6891_v16  ;;  %3224 = vmatprep.mubr.f32.mxu1 %v6891_v16 }
 0x228   : > { %v3482_v13 = vmax.f32 %v5507_v44, 0.0 }
 0x229   : > { %9413 = vst [vmem:[#allocation4_spill] sm:$0xff] %v8446_v14  ;;  %v3485_v21 = vmax.f32 %v5540_v41, 0.0  ;;  %v1747_v18 = vpop.f32.mrb[46].mxu0  ;;  %v8451_v40 = vpop.f32.mrb[30].mxu1 }
 0x22a   : > { %v5509_v56 = vadd.f32 %v1747_v18, %v8315_v38  ;;  %v8454_v48 = vpop.f32.mrb[47].mxu0  ;;  %v2071_v7 = vpop.f32.mrb[31].mxu1  ;;  %2903 = vmatmul.mubr.f32.gmra.mrb[120].mxu0 %v6893_v50  ;;  %3225 = vmatmul.mubr.f32.gmra.mrb[104].mxu1 %v6893_v50 }
 0x22b   : > { %v8458_v33 = vmax.f32 %v3482_v13, %v3485_v21  ;;  %v5542_v29 = vadd.f32 %v2071_v7, %v8331_v54  ;;  %2908 = vmatprep.mubr.f32.mxu0 %v6904_v63  ;;  %3230 = vmatprep.mubr.f32.mxu1 %v6904_v63 }
 0x22c   : > { %v3494_v16 = vmax.f32 %v5509_v56, 0.0 }
 0x22d   : > { %9414 = vst [vmem:[#allocation13_spill] sm:$0xff] %v8458_v33  ;;  %v3497_v42 = vmax.f32 %v5542_v29, 0.0  ;;  %v1753_v26 = vpop.f32.mrb[48].mxu0  ;;  %v8463_v10 = vpop.f32.mrb[32].mxu1 }
 0x22e   : > { %v5511_v8 = vadd.f32 %v1753_v26, %v8315_v38  ;;  %v8466_v51 = vpop.f32.mrb[49].mxu0  ;;  %v2077_v44 = vpop.f32.mrb[33].mxu1  ;;  %2909 = vmatmul.mubr.f32.gmra.mrb[122].mxu0 %v6906_v12  ;;  %3231 = vmatmul.mubr.f32.gmra.mrb[106].mxu1 %v6906_v12 }
 0x22f   : > { %v8470_v50 = vmax.f32 %v3494_v16, %v3497_v42  ;;  %v5544_v57 = vadd.f32 %v2077_v44, %v8331_v54  ;;  %2914 = vmatprep.mubr.f32.mxu0 %v6918_v34  ;;  %3236 = vmatprep.mubr.f32.mxu1 %v6918_v34 }
 0x230   : > { %v3506_v63 = vmax.f32 %v5511_v8, 0.0 }
 0x231   : > { %9415 = vst [vmem:[#allocation14_spill] sm:$0xff] %v8470_v50  ;;  %v3509_v41 = vmax.f32 %v5544_v57, 0.0  ;;  %v1759_v13 = vpop.f32.mrb[50].mxu0  ;;  %v8475_v21 = vpop.f32.mrb[34].mxu1 }
 0x232   : > { %v5513_v18 = vadd.f32 %v1759_v13, %v8315_v38  ;;  %v8478_v56 = vpop.f32.mrb[51].mxu0  ;;  %v2083_v7 = vpop.f32.mrb[35].mxu1  ;;  %2915 = vmatmul.mubr.f32.gmra.mrb[124].mxu0 %v6920_v37  ;;  %3237 = vmatmul.mubr.f32.gmra.mrb[108].mxu1 %v6920_v37 }
 0x233   : > { %v8482_v12 = vmax.f32 %v3506_v63, %v3509_v41  ;;  %v5546_v29 = vadd.f32 %v2083_v7, %v8331_v54  ;;  %2920 = vmatprep.mubr.f32.mxu0 %v9404_v17  ;;  %3242 = vmatprep.mubr.f32.mxu1 %v9404_v17 }
 0x234   : > { %v3518_v34 = vmax.f32 %v5513_v18, 0.0 }
 0x235   : > { %9416 = vst [vmem:[#allocation15_spill] sm:$0xff] %v8482_v12  ;;  %v3521_v16 = vmax.f32 %v5546_v29, 0.0  ;;  %v1765_v42 = vpop.f32.mrb[52].mxu0  ;;  %v8487_v26 = vpop.f32.mrb[36].mxu1  ;;  %v9418_v12 = vld [vmem:[#allocation11_spill] sm:$0xff] }
 0x236   : > { %v5515_v8 = vadd.f32 %v1765_v42, %v8315_v38  ;;  %v8490_v44 = vpop.f32.mrb[53].mxu0  ;;  %v2089_v57 = vpop.f32.mrb[37].mxu1  ;;  %2921 = vmatmul.mubr.f32.gmra.mrb[126].mxu0 %v9405_v43  ;;  %3243 = vmatmul.mubr.f32.gmra.mrb[110].mxu1 %v9405_v43 }
 0x237   : > { %v8494_v37 = vmax.f32 %v3518_v34, %v3521_v16  ;;  %v5548_v63 = vadd.f32 %v2089_v57, %v8331_v54  ;;  %2991 = vmatprep.mubr.f32.mxu0 %v9402_v6  ;;  %3313 = vmatprep.mubr.f32.mxu1 %v9402_v6 }
 0x238   : > { %v3530_v17 = vmax.f32 %v5515_v8, 0.0 }
 0x239   : > { %9417 = vst [vmem:[#allocation16_spill] sm:$0xff] %v8494_v37  ;;  %v3533_v41 = vmax.f32 %v5548_v63, 0.0  ;;  %v1771_v13 = vpop.f32.mrb[54].mxu0  ;;  %v8499_v18 = vpop.f32.mrb[38].mxu1 }
 0x23a   : > { %v5517_v7 = vadd.f32 %v1771_v13, %v8315_v38  ;;  %v8502_v29 = vpop.f32.mrb[55].mxu0  ;;  %v2095_v42 = vpop.f32.mrb[39].mxu1  ;;  %2992 = vmatmul.mubr.f32.vlgmr.msra.gmra.mrb[96].mxu0 %v9418_v12  ;;  %3314 = vmatmul.mubr.f32.vlgmr.msra.gmra.mrb[80].mxu1 %v9418_v12 }
 0x23b   : > { %v8506_v43 = vmax.f32 %v3530_v17, %v3533_v41  ;;  %v5550_v34 = vadd.f32 %v2095_v42, %v8331_v54  ;;  %2997 = vmatprep.mubr.f32.mxu0 %v9402_v6  ;;  %3319 = vmatprep.mubr.f32.mxu1 %v9402_v6 }
 0x23c   : > { %v3542_v16 = vmax.f32 %v5517_v7, 0.0 }
 0x23d   : > { %9419 = vst [vmem:[#allocation11_spill] sm:$0xff] %v8506_v43  ;;  %v3545_v8 = vmax.f32 %v5550_v34, 0.0  ;;  %v1777_v57 = vpop.f32.mrb[56].mxu0  ;;  %v8511_v63 = vpop.f32.mrb[40].mxu1 }
 0x23e   : > { %v5519_v13 = vadd.f32 %v1777_v57, %v8315_v38  ;;  %v8514_v37 = vpop.f32.mrb[57].mxu0  ;;  %v2101_v50 = vpop.f32.mrb[41].mxu1  ;;  %2998 = vmatmul.mubr.f32.gmra.mrb[98].mxu0 %v6999_v25  ;;  %3320 = vmatmul.mubr.f32.gmra.mrb[82].mxu1 %v6999_v25 }
 0x23f   : > { %v8518_v12 = vmax.f32 %v3542_v16, %v3545_v8  ;;  %v5552_v17 = vadd.f32 %v2101_v50, %v8331_v54  ;;  %3003 = vmatprep.mubr.f32.mxu0 %v9402_v6  ;;  %3325 = vmatprep.mubr.f32.mxu1 %v9402_v6 }
 0x240   : > { %v3554_v41 = vmax.f32 %v5519_v13, 0.0 }
 0x241   : > { %9420 = vst [vmem:[#allocation17_spill] sm:$0xff] %v8518_v12  ;;  %v3557_v7 = vmax.f32 %v5552_v17, 0.0  ;;  %v1783_v42 = vpop.f32.mrb[58].mxu0  ;;  %v8523_v34 = vpop.f32.mrb[42].mxu1 }
 0x242   : > { %v5521_v57 = vadd.f32 %v1783_v42, %v8315_v38  ;;  %v8526_v43 = vpop.f32.mrb[59].mxu0  ;;  %v2107_v33 = vpop.f32.mrb[43].mxu1  ;;  %3004 = vmatmul.mubr.f32.gmra.mrb[100].mxu0 %v7015_v62  ;;  %3326 = vmatmul.mubr.f32.gmra.mrb[84].mxu1 %v7015_v62 }
 0x243   : > { %v8530_v25 = vmax.f32 %v3554_v41, %v3557_v7  ;;  %v5554_v50 = vadd.f32 %v2107_v33, %v8331_v54  ;;  %3009 = vmatprep.mubr.f32.mxu0 %v9402_v6  ;;  %3331 = vmatprep.mubr.f32.mxu1 %v9402_v6 }
 0x244   : > { %v3566_v16 = vmax.f32 %v5521_v57, 0.0 }
 0x245   : > { %9421 = vst [vmem:[#allocation18_spill] sm:$0xff] %v8530_v25  ;;  %v3569_v8 = vmax.f32 %v5554_v50, 0.0  ;;  %v1789_v13 = vpop.f32.mrb[60].mxu0  ;;  %v8535_v17 = vpop.f32.mrb[44].mxu1 }
 0x246   : > { %v5523_v42 = vadd.f32 %v1789_v13, %v8315_v38  ;;  %v8538_v12 = vpop.f32.mrb[61].mxu0  ;;  %v2113_v14 = vpop.f32.mrb[45].mxu1  ;;  %3010 = vmatmul.mubr.f32.gmra.mrb[102].mxu0 %v7063_v5  ;;  %3332 = vmatmul.mubr.f32.gmra.mrb[86].mxu1 %v7063_v5 }
 0x247   : > { %v8542_v62 = vmax.f32 %v3566_v16, %v3569_v8  ;;  %v5556_v33 = vadd.f32 %v2113_v14, %v8331_v54  ;;  %3015 = vmatprep.mubr.f32.mxu0 %v9402_v6  ;;  %3337 = vmatprep.mubr.f32.mxu1 %v9402_v6 }
 0x248   : > { %v3578_v41 = vmax.f32 %v5523_v42, 0.0 }
 0x249   : > { %9422 = vst [vmem:[#allocation19_spill] sm:$0xff] %v8542_v62  ;;  %v3581_v7 = vmax.f32 %v5556_v33, 0.0  ;;  %v1795_v57 = vpop.f32.mrb[62].mxu0  ;;  %v8547_v50 = vpop.f32.mrb[46].mxu1 }
 0x24a   : > { %v5525_v13 = vadd.f32 %v1795_v57, %v8315_v38  ;;  %v8550_v25 = vpop.f32.mrb[63].mxu0  ;;  %v2119_v60 = vpop.f32.mrb[47].mxu1  ;;  %3016 = vmatmul.mubr.f32.gmra.mrb[104].mxu0 %v7079_v59  ;;  %3338 = vmatmul.mubr.f32.gmra.mrb[88].mxu1 %v7079_v59  ;;  %v4146_v59 = vld [vmem:[%s9369_s5 + $0x80] sm:$0xff]  ;;  %v4132_v57 = vld [vmem:[%s9369_s5 + $0x10] sm:$0xff] }
 0x24b   : > { %v8554_v5 = vmax.f32 %v3578_v41, %v3581_v7  ;;  %v5558_v14 = vadd.f32 %v2119_v60, %v8331_v54  ;;  %3021 = vmatprep.mubr.f32.mxu0 %v9402_v6  ;;  %3343 = vmatprep.mubr.f32.mxu1 %v9402_v6  ;;  %v4147_v54 = vld [vmem:[%s9369_s5 + $0x88] sm:$0xff]  ;;  %v4130_v60 = vld [vmem:[%s9369_s5] sm:$0xff]  ;;  %v4148_v41 = vld [vmem:[%s9369_s5 + $0x90] sm:$0xff] }
 0x24c   : > { %v3590_v16 = vmax.f32 %v5525_v13, 0.0  ;;  %v5431_v42 = vpack.c.bf16 %v4147_v54, %v4146_v59  ;;  %v4149_v7 = vld [vmem:[%s9369_s5 + $0x98] sm:$0xff]  ;;  %v4162_v59 = vld [vmem:[%s9369_s5 + $0x100] sm:$0xff] }
 0x24d   : > { %9423 = vst [vmem:[#allocation20_spill] sm:$0xff] %v8554_v5  ;;  %v3593_v8 = vmax.f32 %v5558_v14, 0.0  ;;  %v4133_v13 = vld [vmem:[%s9369_s5 + $0x18] sm:$0xff]  ;;  %v5435_v14 = vpack.c.bf16 %v4149_v7, %v4148_v41  ;;  %v4134_v54 = vld [vmem:[%s9369_s5 + $0x20] sm:$0xff] }
 0x24e   : > { %3022 = vmatmul.mubr.f32.gmra.mrb[106].mxu0 %v7127_v52  ;;  %3344 = vmatmul.mubr.f32.gmra.mrb[90].mxu1 %v7127_v52  ;;  %v4131_v52 = vld [vmem:[%s9369_s5 + $0x8] sm:$0xff]  ;;  %v4165_v41 = vld [vmem:[%s9369_s5 + $0x118] sm:$0xff] }
 0x24f   : > { %v8561_v38 = vmax.f32 %v3590_v16, %v3593_v8  ;;  %3027 = vmatprep.mubr.f32.mxu0 %v9402_v6  ;;  %3349 = vmatprep.mubr.f32.mxu1 %v9402_v6  ;;  %v5433_v33 = vpack.c.bf16 %v4131_v52, %v4130_v60  ;;  %v5437_v16 = vpack.c.bf16 %v4133_v13, %v4132_v57  ;;  %v4151_v8 = vld [vmem:[%s9369_s5 + $0xa8] sm:$0xff]  ;;  %v4152_v57 = vld [vmem:[%s9369_s5 + $0xb0] sm:$0xff]  ;;  %v4153_v13 = vld [vmem:[%s9369_s5 + $0xb8] sm:$0xff] }
 0x250   : > { %5432 = vmatprep.subr.bf16.mxu0 %v5431_v42  ;;  %v4135_v60 = vld [vmem:[%s9369_s5 + $0x28] sm:$0xff] }
 0x251   : > { %9424 = vst [vmem:[#allocation21_spill] sm:$0xff] %v8561_v38  ;;  %5434 = vmatpush3.bf16.msra.mxu0 %v5433_v33  ;;  %v4163_v42 = vld [vmem:[%s9369_s5 + $0x108] sm:$0xff]  ;;  %v5441_v7 = vpack.c.bf16 %v4135_v60, %v4134_v54  ;;  %v5443_v54 = vpack.c.bf16 %v4153_v13, %v4152_v57  ;;  %v4154_v60 = vld [vmem:[%s9369_s5 + $0xc0] sm:$0xff]  ;;  %v4156_v13 = vld [vmem:[%s9369_s5 + $0xd0] sm:$0xff] }
 0x252   : > { %3028 = vmatmul.mubr.f32.gmra.mrb[108].mxu0 %v7143_v61  ;;  %3350 = vmatmul.mubr.f32.gmra.mrb[92].mxu1 %v7143_v61  ;;  %v4150_v61 = vld [vmem:[%s9369_s5 + $0xa0] sm:$0xff]  ;;  %v5463_v52 = vpack.c.bf16 %v4163_v42, %v4162_v59  ;;  %v4136_v59 = vld [vmem:[%s9369_s5 + $0x30] sm:$0xff]  ;;  %v4155_v42 = vld [vmem:[%s9369_s5 + $0xc8] sm:$0xff] }
 0x253   : > { %3033 = vmatprep.mubr.f32.mxu0 %v9402_v6  ;;  %3355 = vmatprep.mubr.f32.mxu1 %v9402_v6  ;;  %v5439_v33 = vpack.c.bf16 %v4151_v8, %v4150_v61  ;;  %v4166_v61 = vld [vmem:[%s9369_s5 + $0x120] sm:$0xff]  ;;  %v4167_v8 = vld [vmem:[%s9369_s5 + $0x128] sm:$0xff]  ;;  %v5447_v57 = vpack.c.bf16 %v4155_v42, %v4154_v60 }
 0x254   : > { %5436 = vmatprep.subr.bf16.mxu0 %v5435_v14  ;;  %5464 = vmatprep.subr.bf16.mxu1 %v5463_v52  ;;  %v4158_v60 = vld [vmem:[%s9369_s5 + $0xe0] sm:$0xff]  ;;  %v4159_v42 = vld [vmem:[%s9369_s5 + $0xe8] sm:$0xff] }
 0x255   : > { %5438 = vmatpush3.bf16.msra.mxu0 %v5437_v16  ;;  %v4137_v16 = vld [vmem:[%s9369_s5 + $0x38] sm:$0xff]  ;;  %5466 = vmatpush3.bf16.msra.mxu1 %v5463_v52  ;;  %v4139_v52 = vld [vmem:[%s9369_s5 + $0x48] sm:$0xff] }
 0x256   : > { %3034 = vmatmul.mubr.f32.gmra.mrb[110].mxu0 %v7191_v23  ;;  %3356 = vmatmul.mubr.f32.gmra.mrb[94].mxu1 %v7191_v23  ;;  %v4164_v23 = vld [vmem:[%s9369_s5 + $0x110] sm:$0xff] }
 0x257   : > { %3039 = vmatprep.mubr.f32.mxu0 %v9402_v6  ;;  %3361 = vmatprep.mubr.f32.mxu1 %v9402_v6  ;;  %v5467_v14 = vpack.c.bf16 %v4165_v41, %v4164_v23  ;;  %v4138_v23 = vld [vmem:[%s9369_s5 + $0x40] sm:$0xff]  ;;  %v5471_v41 = vpack.c.bf16 %v4167_v8, %v4166_v61 }
 0x258   : > { %5440 = vmatprep.subr.bf16.mxu0 %v5439_v33  ;;  %v4168_v33 = vld [vmem:[%s9369_s5 + $0x130] sm:$0xff]  ;;  %v4170_v8 = vld [vmem:[%s9369_s5 + $0x140] sm:$0xff] }
 0x259   : > { %5442 = vmatpush3.bf16.msra.mxu0 %v5441_v7  ;;  %5468 = vmatprep.subr.bf16.mxu1 %v5467_v14  ;;  %v4169_v7 = vld [vmem:[%s9369_s5 + $0x138] sm:$0xff] }
 0x25a   : > { %3040 = vmatmul.mubr.f32.gmra.mrb[112].mxu0 %v7207_v36  ;;  %3362 = vmatmul.mubr.f32.gmra.mrb[96].mxu1 %v7207_v36  ;;  %v5445_v36 = vpack.c.bf16 %v4137_v16, %v4136_v59  ;;  %v4157_v59 = vld [vmem:[%s9369_s5 + $0xd8] sm:$0xff]  ;;  %v4140_v16 = vld [vmem:[%s9369_s5 + $0x50] sm:$0xff]  ;;  %v5475_v61 = vpack.c.bf16 %v4169_v7, %v4168_v33  ;;  %v5455_v33 = vpack.c.bf16 %v4159_v42, %v4158_v60 }
 0x25b   : > { %3045 = vmatprep.mubr.f32.mxu0 %v9402_v6  ;;  %3367 = vmatprep.mubr.f32.mxu1 %v9402_v6 }
 0x25c   : > { %5444 = vmatprep.subr.bf16.mxu0 %v5443_v54  ;;  %5470 = vmatpush3.bf16.msra.mxu1 %v5467_v14  ;;  %v4141_v14 = vld [vmem:[%s9369_s5 + $0x58] sm:$0xff]  ;;  %v4171_v54 = vld [vmem:[%s9369_s5 + $0x148] sm:$0xff] }
 0x25d   : > { %5446 = vmatpush3.bf16.msra.mxu0 %v5445_v36  ;;  %5472 = vmatprep.subr.bf16.mxu1 %v5471_v41  ;;  %v5451_v36 = vpack.c.bf16 %v4157_v59, %v4156_v13  ;;  %v9427_v13 = vld [vmem:[#allocation8_spill] sm:$0xff] }
 0x25e   : > { %3046 = vmatmul.mubr.f32.gmra.mrb[114].mxu0 %v7255_v27  ;;  %3368 = vmatmul.mubr.f32.gmra.mrb[98].mxu1 %v7255_v27  ;;  %v5449_v27 = vpack.c.bf16 %v4139_v52, %v4138_v23  ;;  %v5479_v23 = vpack.c.bf16 %v4171_v54, %v4170_v8  ;;  %v4143_v52 = vld [vmem:[%s9369_s5 + $0x68] sm:$0xff]  ;;  %v8725_v59 = vrot.slane %v8293_v32, %v9427_v13  ;;  %v4172_v54 = vld [vmem:[%s9369_s5 + $0x150] sm:$0xff] }
 0x25f   : > { %3051 = vmatprep.mubr.f32.mxu0 %v9402_v6  ;;  %3373 = vmatprep.mubr.f32.mxu1 %v9402_v6 }
 0x260   : > { %5448 = vmatprep.subr.bf16.mxu0 %v5447_v57  ;;  %5474 = vmatpush3.bf16.msra.mxu1 %v5471_v41  ;;  %v4142_v41 = vld [vmem:[%s9369_s5 + $0x60] sm:$0xff]  ;;  %v9426_v57 = vld [vmem:[#allocation6_spill] sm:$0xff]  ;;  %v5531_v62 = vadd.f32 %v8391_v49, %v8725_v59 }
 0x261   : > { %5450 = vmatpush3.bf16.msra.mxu0 %v5449_v27  ;;  %5476 = vmatprep.subr.bf16.mxu1 %v5475_v61  ;;  %v5457_v7 = vpack.c.bf16 %v4143_v52, %v4142_v41  ;;  %v8721_v27 = vrot.slane %v8293_v32, %v9426_v57 }
 0x262   : > { %3052 = vmatmul.mubr.f32.gmra.mrb[116].mxu0 %v7271_v3  ;;  %3374 = vmatmul.mubr.f32.gmra.mrb[100].mxu1 %v7271_v3  ;;  %v5453_v3 = vpack.c.bf16 %v4141_v14, %v4140_v16 }
 0x263   : > { %3057 = vmatprep.mubr.f32.mxu0 %v9402_v6  ;;  %3379 = vmatprep.mubr.f32.mxu1 %v9402_v6  ;;  %v5496_v16 = vadd.f32 %v8351_v20, %v8721_v27 }
 0x264   : > { %5452 = vmatprep.subr.bf16.mxu0 %v5451_v36  ;;  %5478 = vmatpush3.bf16.msra.mxu1 %v5475_v61  ;;  %v5527_v61 = vadd.f32 %v8339_v4, %v8725_v59  ;;  %v4173_v36 = vld [vmem:[%s9369_s5 + $0x158] sm:$0xff] }
 0x265   : > { %5454 = vmatpush3.bf16.msra.mxu0 %v5453_v3  ;;  %5480 = vmatprep.subr.bf16.mxu1 %v5479_v23  ;;  %v5483_v42 = vpack.c.bf16 %v4173_v36, %v4172_v54  ;;  %v3411_v4 = vmax.f32 %v5496_v16, 0.0  ;;  %v4161_v16 = vld [vmem:[%s9369_s5 + $0xf8] sm:$0xff]  ;;  %v4144_v36 = vld [vmem:[%s9369_s5 + $0x70] sm:$0xff] }
 0x266   : > { %3058 = vmatmul.mubr.f32.gmra.mrb[118].mxu0 %v7319_v15  ;;  %3380 = vmatmul.mubr.f32.gmra.mrb[102].mxu1 %v7319_v15  ;;  %v9425_v15 = vld [vmem:[#allocation12_spill] sm:$0xff]  ;;  %v3412_v52 = vmax.f32 %v5527_v61, 0.0 }
 0x267   : > { %3063 = vmatprep.mubr.f32.mxu0 %v9402_v6  ;;  %3385 = vmatprep.mubr.f32.mxu1 %v9402_v6 }
 0x268   : > { %5456 = vmatprep.subr.bf16.mxu0 %v5455_v33  ;;  %5482 = vmatpush3.bf16.msra.mxu1 %v5479_v23  ;;  %v5498_v23 = vadd.f32 %v8382_v24, %v8721_v27  ;;  %v5529_v33 = vadd.f32 %v8370_v46, %v8725_v59 }
 0x269   : > { %5458 = vmatpush3.bf16.msra.mxu0 %v5457_v7  ;;  %5484 = vmatprep.subr.bf16.mxu1 %v5483_v42 }
 0x26a   : > { %3064 = vmatmul.mubr.f32.gmra.mrb[120].mxu0 %v7335_v19  ;;  %3386 = vmatmul.mubr.f32.gmra.mrb[104].mxu1 %v7335_v19  ;;  %v1436_v19 = vsub.s32 4, %v9408_v9  ;;  %v3424_v5 = vmax.f32 %v5529_v33, 0.0 }
 0x26b   : > { %3069 = vmatprep.mubr.f32.mxu0 %v9402_v6  ;;  %3391 = vmatprep.mubr.f32.mxu1 %v9402_v6 }
 0x26c   : > { %5486 = vmatpush3.bf16.msra.mxu1 %v5483_v42 }
 0x26e   : > { %3070 = vmatmul.mubr.f32.gmra.mrb[122].mxu0 %v7383_v45  ;;  %3392 = vmatmul.mubr.f32.gmra.mrb[106].mxu1 %v7383_v45  ;;  %v1440_v45 = vsub.s32 5, %v9408_v9 }
 0x26f   : > { %3075 = vmatprep.mubr.f32.mxu0 %v9402_v6  ;;  %3397 = vmatprep.mubr.f32.mxu1 %v9402_v6 }
 0x272   : > { %3076 = vmatmul.mubr.f32.gmra.mrb[124].mxu0 %v7399_v2  ;;  %3398 = vmatmul.mubr.f32.gmra.mrb[108].mxu1 %v7399_v2  ;;  %v8728_v2 = vrot.slane %v8293_v32, %v1436_v19 }
 0x273   : > { %3081 = vmatprep.mubr.f32.mxu0 %v9402_v6  ;;  %3403 = vmatprep.mubr.f32.mxu1 %v9402_v6  ;;  %v8731_v6 = vrot.slane %v8293_v32, %v1440_v45  ;;  %v4160_v45 = vld [vmem:[%s9369_s5 + $0xf0] sm:$0xff] }
 0x274   : > { %v5459_v46 = vpack.c.bf16 %v4161_v16, %v4160_v45  ;;  %v3423_v45 = vmax.f32 %v5498_v23, 0.0  ;;  %v5500_v16 = vadd.f32 %v8394_v39, %v8721_v27  ;;  %v4177_v39 = vld [vmem:[%s9369_s5 + $0x178] sm:$0xff] }
 0x276   : > { %3082 = vmatmul.mubr.f32.gmra.mrb[126].mxu0 %v9425_v15  ;;  %3404 = vmatmul.mubr.f32.gmra.mrb[110].mxu1 %v9425_v15 }
 0x277   : > { %5460 = vmatprep.subr.bf16.mxu0 %v5459_v46 }
 0x28d   : > { %v2349_v14 = vpop.f32.mrb[64].mxu0  ;;  %v8737_v8 = vpop.f32.mrb[48].mxu1 }
 0x28e   : > { %v5559_v32 = vadd.f32 %v2349_v14, %v8728_v2  ;;  %v2351_v3 = vpop.f32.mrb[65].mxu0  ;;  %v8746_v60 = vpop.f32.mrb[49].mxu1 }
 0x28f   : > { %v5560_v20 = vadd.f32 %v2351_v3, %v8731_v6  ;;  %v4174_v3 = vld [vmem:[%s9369_s5 + $0x160] sm:$0xff] }
 0x290   : > { %v3414_v41 = vmax.f32 %v5559_v32, 0.0  ;;  %v4145_v32 = vld [vmem:[%s9369_s5 + $0x78] sm:$0xff] }
 0x291   : > { %v3415_v7 = vmax.f32 %v5560_v20, 0.0  ;;  %v2355_v15 = vpop.f32.mrb[66].mxu0  ;;  %v8753_v19 = vpop.f32.mrb[50].mxu1 }
 0x292   : > { %v8761_v14 = vmax.f32 %v3411_v4, %v3414_v41  ;;  %v5561_v24 = vadd.f32 %v2355_v15, %v8728_v2  ;;  %v2357_v61 = vpop.f32.mrb[67].mxu0  ;;  %v8764_v54 = vpop.f32.mrb[51].mxu1  ;;  %v5461_v41 = vpack.c.bf16 %v4145_v32, %v4144_v36  ;;  %v4175_v15 = vld [vmem:[%s9369_s5 + $0x168] sm:$0xff] }
 0x293   : > { %v8775_v20 = vmax.f32 %v3412_v52, %v3415_v7  ;;  %v5562_v4 = vadd.f32 %v2357_v61, %v8731_v6  ;;  %v5487_v42 = vpack.c.bf16 %v4175_v15, %v4174_v3  ;;  %v4176_v61 = vld [vmem:[%s9369_s5 + $0x170] sm:$0xff]  ;;  %v3435_v3 = vmax.f32 %v5500_v16, 0.0 }
 0x294   : > { %v3426_v38 = vmax.f32 %v5561_v24, 0.0  ;;  %5462 = vmatpush3.bf16.msra.mxu0 %v5461_v41  ;;  %v5491_v49 = vpack.c.bf16 %v4177_v39, %v4176_v61  ;;  %v5533_v15 = vadd.f32 %v8403_v53, %v8725_v59  ;;  %v5504_v53 = vadd.f32 %v8418_v11, %v8721_v27 }
 0x295   : > { %v3427_v52 = vmax.f32 %v5562_v4, 0.0  ;;  %v2361_v7 = vpop.f32.mrb[68].mxu0  ;;  %v8785_v30 = vpop.f32.mrb[52].mxu1  ;;  %5488 = vmatprep.subr.bf16.mxu1 %v5487_v42  ;;  %v5502_v4 = vadd.f32 %v8406_v35, %v8721_v27 }
 0x296   : > { %v8793_v23 = vmax.f32 %v3423_v45, %v3426_v38  ;;  %v5563_v33 = vadd.f32 %v2361_v7, %v8728_v2  ;;  %v2363_v24 = vpop.f32.mrb[69].mxu0  ;;  %v8796_v46 = vpop.f32.mrb[53].mxu1  ;;  %5490 = vmatpush3.bf16.msra.mxu1 %v5487_v42  ;;  %v3436_v38 = vmax.f32 %v5531_v62, 0.0 }
 0x297   : > { %v8798_v36 = vmax.f32 %v3424_v5, %v3427_v52  ;;  %v5564_v32 = vadd.f32 %v2363_v24, %v8731_v6  ;;  %5492 = vmatprep.subr.bf16.mxu1 %v5491_v49  ;;  %v3447_v62 = vmax.f32 %v5502_v4, 0.0  ;;  %v5535_v24 = vadd.f32 %v8415_v1, %v8725_v59 }
 0x298   : > { %v3438_v41 = vmax.f32 %v5563_v33, 0.0  ;;  %v3448_v33 = vmax.f32 %v5533_v15, 0.0  ;;  %v3459_v4 = vmax.f32 %v5504_v53, 0.0  ;;  %v5506_v15 = vadd.f32 %v8430_v28, %v8721_v27 }
 0x299   : > { %v3439_v45 = vmax.f32 %v5564_v32, 0.0  ;;  %v2367_v7 = vpop.f32.mrb[70].mxu0  ;;  %v8805_v47 = vpop.f32.mrb[54].mxu1 }
 0x29a   : > { %v8807_v61 = vmax.f32 %v3435_v3, %v3438_v41  ;;  %v5565_v5 = vadd.f32 %v2367_v7, %v8728_v2  ;;  %v2369_v52 = vpop.f32.mrb[71].mxu0  ;;  %v8810_v42 = vpop.f32.mrb[55].mxu1  ;;  %5494 = vmatpush3.bf16.msra.mxu1 %v5491_v49 }
 0x29b   : > { %v8812_v16 = vmax.f32 %v3436_v38, %v3439_v45  ;;  %v5566_v35 = vadd.f32 %v2369_v52, %v8731_v6 }
 0x29c   : > { %v3450_v39 = vmax.f32 %v5565_v5, 0.0  ;;  %v3460_v5 = vmax.f32 %v5535_v24, 0.0  ;;  %v5508_v24 = vadd.f32 %v8442_v58, %v8721_v27 }
 0x29d   : > { %v3451_v32 = vmax.f32 %v5566_v35, 0.0  ;;  %v2373_v3 = vpop.f32.mrb[72].mxu0  ;;  %v8819_v41 = vpop.f32.mrb[56].mxu1  ;;  %v5537_v35 = vadd.f32 %v8427_v55, %v8725_v59 }
 0x29e   : > { %v8821_v7 = vmax.f32 %v3447_v62, %v3450_v39  ;;  %v5567_v38 = vadd.f32 %v2373_v3, %v8728_v2  ;;  %v2375_v45 = vpop.f32.mrb[73].mxu0  ;;  %v8824_v52 = vpop.f32.mrb[57].mxu1 }
 0x29f   : > { %v8826_v49 = vmax.f32 %v3448_v33, %v3451_v32  ;;  %v5568_v11 = vadd.f32 %v2375_v45, %v8731_v6  ;;  %v3472_v45 = vmax.f32 %v5537_v35, 0.0  ;;  %v5510_v35 = vadd.f32 %v8454_v48, %v8721_v27 }
 0x2a0   : > { %9428 = vst [vmem:[#allocation12_spill] sm:$0xff] %v8821_v7  ;;  %v3462_v1 = vmax.f32 %v5567_v38, 0.0  ;;  %v3471_v38 = vmax.f32 %v5506_v15, 0.0 }
 0x2a1   : > { %9429 = vst [vmem:[#allocation6_spill] sm:$0xff] %v8826_v49  ;;  %v3463_v62 = vmax.f32 %v5568_v11, 0.0  ;;  %v2379_v39 = vpop.f32.mrb[74].mxu0  ;;  %v8833_v7 = vpop.f32.mrb[58].mxu1  ;;  %v5539_v11 = vadd.f32 %v8439_v31, %v8725_v59 }
 0x2a2   : > { %v8835_v3 = vmax.f32 %v3459_v4, %v3462_v1  ;;  %v5569_v33 = vadd.f32 %v2379_v39, %v8728_v2  ;;  %v2381_v32 = vpop.f32.mrb[75].mxu0  ;;  %v8838_v49 = vpop.f32.mrb[59].mxu1 }
 0x2a3   : > { %v8840_v53 = vmax.f32 %v3460_v5, %v3463_v62  ;;  %v5570_v28 = vadd.f32 %v2381_v32, %v8731_v6  ;;  %v3484_v32 = vmax.f32 %v5539_v11, 0.0  ;;  %v5512_v11 = vadd.f32 %v8466_v51, %v8721_v27 }
 0x2a4   : > { %9430 = vst [vmem:[#allocation8_spill] sm:$0xff] %v8835_v3  ;;  %v3474_v55 = vmax.f32 %v5569_v33, 0.0  ;;  %v3483_v33 = vmax.f32 %v5508_v24, 0.0 }
 0x2a5   : > { %9431 = vst [vmem:[#allocation22_spill] sm:$0xff] %v8840_v53  ;;  %v3475_v4 = vmax.f32 %v5570_v28, 0.0  ;;  %v2385_v1 = vpop.f32.mrb[76].mxu0  ;;  %v8847_v3 = vpop.f32.mrb[60].mxu1  ;;  %v5541_v28 = vadd.f32 %v8451_v40, %v8725_v59 }
 0x2a6   : > { %v8849_v39 = vmax.f32 %v3471_v38, %v3474_v55  ;;  %v5571_v5 = vadd.f32 %v2385_v1, %v8728_v2  ;;  %v2387_v62 = vpop.f32.mrb[77].mxu0  ;;  %v8852_v53 = vpop.f32.mrb[61].mxu1 }
 0x2a7   : > { %v8854_v15 = vmax.f32 %v3472_v45, %v3475_v4  ;;  %v5572_v58 = vadd.f32 %v2387_v62, %v8731_v6  ;;  %v3496_v62 = vmax.f32 %v5541_v28, 0.0  ;;  %v5514_v28 = vadd.f32 %v8478_v56, %v8721_v27 }
 0x2a8   : > { %9432 = vst [vmem:[#allocation23_spill] sm:$0xff] %v8849_v39  ;;  %v3486_v31 = vmax.f32 %v5571_v5, 0.0  ;;  %v3495_v5 = vmax.f32 %v5510_v35, 0.0 }
 0x2a9   : > { %9433 = vst [vmem:[#allocation24_spill] sm:$0xff] %v8854_v15  ;;  %v3487_v38 = vmax.f32 %v5572_v58, 0.0  ;;  %v2391_v55 = vpop.f32.mrb[78].mxu0  ;;  %v8861_v39 = vpop.f32.mrb[62].mxu1  ;;  %v5543_v58 = vadd.f32 %v8463_v10, %v8725_v59 }
 0x2aa   : > { %v8863_v1 = vmax.f32 %v3483_v33, %v3486_v31  ;;  %v5573_v45 = vadd.f32 %v2391_v55, %v8728_v2  ;;  %v2393_v4 = vpop.f32.mrb[79].mxu0  ;;  %v8866_v15 = vpop.f32.mrb[63].mxu1 }
 0x2ab   : > { %v8868_v24 = vmax.f32 %v3484_v32, %v3487_v38  ;;  %v5574_v48 = vadd.f32 %v2393_v4, %v8731_v6  ;;  %v3508_v4 = vmax.f32 %v5543_v58, 0.0  ;;  %v5516_v58 = vadd.f32 %v8490_v44, %v8721_v27 }
 0x2ac   : > { %9434 = vst [vmem:[#allocation25_spill] sm:$0xff] %v8863_v1  ;;  %v3498_v40 = vmax.f32 %v5573_v45, 0.0  ;;  %v3507_v45 = vmax.f32 %v5512_v11, 0.0 }
 0x2ad   : > { %9435 = vst [vmem:[#allocation26_spill] sm:$0xff] %v8868_v24  ;;  %v3499_v33 = vmax.f32 %v5574_v48, 0.0  ;;  %v2397_v31 = vpop.f32.mrb[80].mxu0  ;;  %v8875_v1 = vpop.f32.mrb[64].mxu1  ;;  %v5545_v48 = vadd.f32 %v8475_v21, %v8725_v59 }
 0x2ae   : > { %v8877_v55 = vmax.f32 %v3495_v5, %v3498_v40  ;;  %v5575_v32 = vadd.f32 %v2397_v31, %v8728_v2  ;;  %v2399_v38 = vpop.f32.mrb[81].mxu0  ;;  %v8880_v24 = vpop.f32.mrb[65].mxu1 }
 0x2af   : > { %v8882_v35 = vmax.f32 %v3496_v62, %v3499_v33  ;;  %v5576_v51 = vadd.f32 %v2399_v38, %v8731_v6  ;;  %v3520_v38 = vmax.f32 %v5545_v48, 0.0  ;;  %v5518_v48 = vadd.f32 %v8502_v29, %v8721_v27 }
 0x2b0   : > { %9436 = vst [vmem:[#allocation27_spill] sm:$0xff] %v8877_v55  ;;  %v3510_v10 = vmax.f32 %v5575_v32, 0.0  ;;  %v3519_v32 = vmax.f32 %v5514_v28, 0.0 }
 0x2b1   : > { %9437 = vst [vmem:[#allocation28_spill] sm:$0xff] %v8882_v35  ;;  %v3511_v5 = vmax.f32 %v5576_v51, 0.0  ;;  %v2403_v40 = vpop.f32.mrb[82].mxu0  ;;  %v8889_v55 = vpop.f32.mrb[66].mxu1  ;;  %v5547_v51 = vadd.f32 %v8487_v26, %v8725_v59 }
 0x2b2   : > { %v8891_v31 = vmax.f32 %v3507_v45, %v3510_v10  ;;  %v5577_v62 = vadd.f32 %v2403_v40, %v8728_v2  ;;  %v2405_v33 = vpop.f32.mrb[83].mxu0  ;;  %v8894_v35 = vpop.f32.mrb[67].mxu1 }
 0x2b3   : > { %v8896_v11 = vmax.f32 %v3508_v4, %v3511_v5  ;;  %v5578_v56 = vadd.f32 %v2405_v33, %v8731_v6  ;;  %v3532_v33 = vmax.f32 %v5547_v51, 0.0  ;;  %v5520_v51 = vadd.f32 %v8514_v37, %v8721_v27 }
 0x2b4   : > { %9438 = vst [vmem:[#allocation29_spill] sm:$0xff] %v8891_v31  ;;  %v3522_v21 = vmax.f32 %v5577_v62, 0.0  ;;  %v3531_v62 = vmax.f32 %v5516_v58, 0.0 }
 0x2b5   : > { %9439 = vst [vmem:[#allocation30_spill] sm:$0xff] %v8896_v11  ;;  %v3523_v45 = vmax.f32 %v5578_v56, 0.0  ;;  %v2409_v10 = vpop.f32.mrb[84].mxu0  ;;  %v8903_v31 = vpop.f32.mrb[68].mxu1  ;;  %v5549_v56 = vadd.f32 %v8499_v18, %v8725_v59 }
 0x2b6   : > { %v8905_v40 = vmax.f32 %v3519_v32, %v3522_v21  ;;  %v5579_v4 = vadd.f32 %v2409_v10, %v8728_v2  ;;  %v2411_v5 = vpop.f32.mrb[85].mxu0  ;;  %v8908_v11 = vpop.f32.mrb[69].mxu1 }
 0x2b7   : > { %v8910_v28 = vmax.f32 %v3520_v38, %v3523_v45  ;;  %v5580_v44 = vadd.f32 %v2411_v5, %v8731_v6  ;;  %v3544_v5 = vmax.f32 %v5549_v56, 0.0  ;;  %v5522_v56 = vadd.f32 %v8526_v43, %v8721_v27 }
 0x2b8   : > { %9440 = vst [vmem:[#allocation31_spill] sm:$0xff] %v8905_v40  ;;  %v3534_v26 = vmax.f32 %v5579_v4, 0.0  ;;  %v3543_v4 = vmax.f32 %v5518_v48, 0.0 }
 0x2b9   : > { %9441 = vst [vmem:[#allocation32_spill] sm:$0xff] %v8910_v28  ;;  %v3535_v32 = vmax.f32 %v5580_v44, 0.0  ;;  %v2415_v21 = vpop.f32.mrb[86].mxu0  ;;  %v8917_v40 = vpop.f32.mrb[70].mxu1  ;;  %v5551_v44 = vadd.f32 %v8511_v63, %v8725_v59 }
 0x2ba   : > { %v8919_v10 = vmax.f32 %v3531_v62, %v3534_v26  ;;  %v5581_v38 = vadd.f32 %v2415_v21, %v8728_v2  ;;  %v2417_v45 = vpop.f32.mrb[87].mxu0  ;;  %v8922_v28 = vpop.f32.mrb[71].mxu1 }
 0x2bb   : > { %v8924_v58 = vmax.f32 %v3532_v33, %v3535_v32  ;;  %v5582_v29 = vadd.f32 %v2417_v45, %v8731_v6  ;;  %v3556_v45 = vmax.f32 %v5551_v44, 0.0  ;;  %v5524_v44 = vadd.f32 %v8538_v12, %v8721_v27 }
 0x2bc   : > { %9442 = vst [vmem:[#allocation33_spill] sm:$0xff] %v8919_v10  ;;  %v3546_v18 = vmax.f32 %v5581_v38, 0.0  ;;  %v3555_v38 = vmax.f32 %v5520_v51, 0.0 }
 0x2bd   : > { %9443 = vst [vmem:[#allocation34_spill] sm:$0xff] %v8924_v58  ;;  %v3547_v62 = vmax.f32 %v5582_v29, 0.0  ;;  %v2421_v26 = vpop.f32.mrb[88].mxu0  ;;  %v8931_v10 = vpop.f32.mrb[72].mxu1  ;;  %v5553_v29 = vadd.f32 %v8523_v34, %v8725_v59 }
 0x2be   : > { %v8933_v21 = vmax.f32 %v3543_v4, %v3546_v18  ;;  %v5583_v33 = vadd.f32 %v2421_v26, %v8728_v2  ;;  %v2423_v32 = vpop.f32.mrb[89].mxu0  ;;  %v8936_v58 = vpop.f32.mrb[73].mxu1 }
 0x2bf   : > { %v8938_v48 = vmax.f32 %v3544_v5, %v3547_v62  ;;  %v5584_v37 = vadd.f32 %v2423_v32, %v8731_v6  ;;  %v3568_v32 = vmax.f32 %v5553_v29, 0.0  ;;  %v5526_v29 = vadd.f32 %v8550_v25, %v8721_v27 }
 0x2c0   : > { %9444 = vst [vmem:[#allocation35_spill] sm:$0xff] %v8933_v21  ;;  %v3558_v63 = vmax.f32 %v5583_v33, 0.0  ;;  %v3567_v33 = vmax.f32 %v5522_v56, 0.0 }
 0x2c1   : > { %9445 = vst [vmem:[#allocation36_spill] sm:$0xff] %v8938_v48  ;;  %v3559_v4 = vmax.f32 %v5584_v37, 0.0  ;;  %v2427_v18 = vpop.f32.mrb[90].mxu0  ;;  %v8945_v21 = vpop.f32.mrb[74].mxu1  ;;  %v5555_v37 = vadd.f32 %v8535_v17, %v8725_v59  ;;  %v3591_v27 = vmax.f32 %v5526_v29, 0.0 }
 0x2c2   : > { %v8947_v26 = vmax.f32 %v3555_v38, %v3558_v63  ;;  %v5585_v5 = vadd.f32 %v2427_v18, %v8728_v2  ;;  %v2429_v62 = vpop.f32.mrb[91].mxu0  ;;  %v8950_v48 = vpop.f32.mrb[75].mxu1 }
 0x2c3   : > { %v8952_v51 = vmax.f32 %v3556_v45, %v3559_v4  ;;  %v5586_v43 = vadd.f32 %v2429_v62, %v8731_v6  ;;  %v3580_v62 = vmax.f32 %v5555_v37, 0.0 }
 0x2c4   : > { %9446 = vst [vmem:[#allocation37_spill] sm:$0xff] %v8947_v26  ;;  %v3570_v34 = vmax.f32 %v5585_v5, 0.0  ;;  %v3579_v5 = vmax.f32 %v5524_v44, 0.0 }
 0x2c5   : > { %9447 = vst [vmem:[#allocation38_spill] sm:$0xff] %v8952_v51  ;;  %v3571_v38 = vmax.f32 %v5586_v43, 0.0  ;;  %v2433_v63 = vpop.f32.mrb[92].mxu0  ;;  %v8959_v26 = vpop.f32.mrb[76].mxu1  ;;  %v5557_v43 = vadd.f32 %v8547_v50, %v8725_v59 }
 0x2c6   : > { %v8961_v18 = vmax.f32 %v3567_v33, %v3570_v34  ;;  %v5587_v45 = vadd.f32 %v2433_v63, %v8728_v2  ;;  %v2435_v4 = vpop.f32.mrb[93].mxu0  ;;  %v8964_v51 = vpop.f32.mrb[77].mxu1 }
 0x2c7   : > { %9449 = vst [vmem:[#allocation40_spill] sm:$0xff] %v8964_v51  ;;  %v8966_v56 = vmax.f32 %v3568_v32, %v3571_v38  ;;  %v5588_v12 = vadd.f32 %v2435_v4, %v8731_v6 }
 0x2c8   : > { %9448 = vst [vmem:[#allocation39_spill] sm:$0xff] %v8961_v18  ;;  %v3582_v17 = vmax.f32 %v5587_v45, 0.0  ;;  %v3592_v45 = vmax.f32 %v5557_v43, 0.0 }
 0x2c9   : > { %9450 = vst [vmem:[#allocation41_spill] sm:$0xff] %v8966_v56  ;;  %v3583_v33 = vmax.f32 %v5588_v12, 0.0  ;;  %v2439_v34 = vpop.f32.mrb[94].mxu0  ;;  %v8973_v18 = vpop.f32.mrb[78].mxu1  ;;  %v1444_v12 = vsub.s32 6, %v9408_v9 }
 0x2ca   : > { %9451 = vst [vmem:[#allocation42_spill] sm:$0xff] %v8973_v18  ;;  %v8975_v63 = vmax.f32 %v3579_v5, %v3582_v17  ;;  %v5589_v32 = vadd.f32 %v2439_v34, %v8728_v2  ;;  %v2441_v38 = vpop.f32.mrb[95].mxu0  ;;  %v8978_v56 = vpop.f32.mrb[79].mxu1  ;;  %v1448_v5 = vsub.s32 7, %v9408_v9  ;;  %v5888_v2 = vld [vmem:[%s9368_s4] sm:$0xff] }
 0x2cb   : > { %9453 = vst [vmem:[#allocation44_spill] sm:$0xff] %v8978_v56  ;;  %v8980_v44 = vmax.f32 %v3580_v62, %v3583_v33  ;;  %v5590_v25 = vadd.f32 %v2441_v38, %v8731_v6  ;;  %v8992_v17 = vrot.slane %v5888_v2, %v1444_v12  ;;  %v1415_v6 = vld [vmem:[%s9368_s4 + $0x8] sm:$0xf] }
 0x2cc   : > { %9452 = vst [vmem:[#allocation43_spill] sm:$0xff] %v8975_v63  ;;  %v3594_v37 = vmax.f32 %v5589_v32, 0.0  ;;  %v8994_v62 = vrot.slane %v5888_v2, %v1448_v5  ;;  %v9457_v38 = vld [vmem:[#allocation5_spill] sm:$0xff] }
 0x2cd   : > { %9454 = vst [vmem:[#allocation45_spill] sm:$0xff] %v8980_v44  ;;  %v3595_v4 = vmax.f32 %v5590_v25, 0.0  ;;  %v5591_v29 = vadd.f32 %v8737_v8, %v8992_v17  ;;  %v9005_v33 = vadd.f32 %v8753_v19, %v8992_v17  ;;  %v9013_v32 = vadd.f32 %v8785_v30, %v8992_v17 }
 0x2ce   : > { %v8983_v50 = vmax.f32 %v3591_v27, %v3594_v37  ;;  %v5592_v43 = vadd.f32 %v8746_v60, %v8994_v62  ;;  %v9009_v34 = vadd.f32 %v8764_v54, %v8994_v62  ;;  %v9016_v25 = vrot.slane %v1415_v6, %v9457_v38 }
 0x2cf   : > { %v8985_v59 = vmax.f32 %v3592_v45, %v3595_v4  ;;  %v9020_v8 = vadd.f32 %v8796_v46, %v8994_v62  ;;  %v9024_v60 = vadd.f32 %v8805_v47, %v8992_v17  ;;  %v9028_v19 = vadd.f32 %v8810_v42, %v8994_v62 }
 0x2d0   : > { %9455 = vst [vmem:[#allocation46_spill] sm:$0xff] %v8983_v50  ;;  %v9031_v54 = vrot.slane %v1415_v6, %v9427_v13  ;;  %v9035_v30 = vadd.f32 %v8819_v41, %v8992_v17  ;;  %v9039_v27 = vadd.f32 %v8824_v52, %v8994_v62  ;;  %v9042_v46 = vrot.slane %v1415_v6, %v9426_v57 }
 0x2d1   : > { %9456 = vst [vmem:[#allocation47_spill] sm:$0xff] %v8985_v59  ;;  %v9458_v47 = vsub.s32 3, %v9408_v9  ;;  %v3416_v42 = vmax.f32 %v5591_v29, 0.0  ;;  %v3417_v45 = vmax.f32 %v5592_v43, 0.0  ;;  %v9051_v4 = vadd.f32 %v8833_v7, %v8992_v17 }
 0x2d2   : > { %v3429_v41 = vmax.f32 %v9009_v34, 0.0  ;;  %v9057_v57 = vadd.f32 %v8838_v49, %v8994_v62  ;;  %v9061_v9 = vadd.f32 %v8847_v3, %v8992_v17  ;;  %v9068_v7 = vadd.f32 %v8852_v53, %v8994_v62 }
 0x2d3   : > { %v9046_v37 = vrot.slane %v1415_v6, %v9458_v47  ;;  %v9074_v49 = vadd.f32 %v8861_v39, %v8992_v17  ;;  %v9078_v3 = vadd.f32 %v8866_v15, %v8994_v62  ;;  %v9083_v53 = vadd.f32 %v8875_v1, %v8992_v17 }
 0x2d4   : > { %v9094_v1 = vadd.f32 %v8880_v24, %v8994_v62 }
 0x30d   : > { %v2993_v43 = vpop.f32.mrb[96].mxu0  ;;  %v3315_v34 = vpop.f32.mrb[80].mxu1 }
 0x30e   : > { %v5623_v47 = vadd.f32 %v2993_v43, %v9016_v25  ;;  %v5655_v6 = vadd.f32 %v3315_v34, %v9031_v54  ;;  %v2995_v29 = vpop.f32.mrb[97].mxu0  ;;  %v3317_v5 = vpop.f32.mrb[81].mxu1 }
 0x30f   : > { %v5624_v15 = vadd.f32 %v2995_v29, %v9042_v46  ;;  %v5656_v52 = vadd.f32 %v3317_v5, %v9046_v37 }
 0x310   : > { %v3418_v12 = vmax.f32 %v5623_v47, 0.0  ;;  %v3420_v43 = vmax.f32 %v5655_v6, 0.0 }
 0x311   : > { %v3419_v59 = vmax.f32 %v5624_v15, 0.0  ;;  %v3421_v39 = vmax.f32 %v5656_v52, 0.0  ;;  %v2999_v50 = vpop.f32.mrb[98].mxu0  ;;  %v3321_v2 = vpop.f32.mrb[82].mxu1  ;;  %v3513_v15 = vmax.f32 %v9094_v1, 0.0 }
 0x312   : > { %v4035_v44 = vmax.f32 %v3417_v45, %v3420_v43  ;;  %v5625_v5 = vadd.f32 %v2999_v50, %v9016_v25  ;;  %v5657_v38 = vadd.f32 %v3321_v2, %v9031_v54  ;;  %v3001_v63 = vpop.f32.mrb[99].mxu0  ;;  %v3323_v24 = vpop.f32.mrb[83].mxu1 }
 0x313   : > { %v4034_v56 = vmax.f32 %v3416_v42, %v3419_v59  ;;  %v4036_v47 = vmax.f32 %v3418_v12, %v3421_v39  ;;  %v5626_v6 = vadd.f32 %v3001_v63, %v9042_v46  ;;  %v5658_v34 = vadd.f32 %v3323_v24, %v9046_v37 }
 0x314   : > { %v3430_v52 = vmax.f32 %v5625_v5, 0.0  ;;  %v3432_v13 = vmax.f32 %v5657_v38, 0.0  ;;  %v4083_v18 = vmax.f32 %v8761_v14, %v4035_v44  ;;  %v9109_v59 = vadd.f32 %v8889_v55, %v8992_v17 }
 0x315   : > { %v4082_v45 = vmax.f32 %v8386_v0, %v4034_v56  ;;  %v3431_v43 = vmax.f32 %v5626_v6, 0.0  ;;  %v3433_v50 = vmax.f32 %v5658_v34, 0.0  ;;  %v3005_v29 = vpop.f32.mrb[100].mxu0  ;;  %v3327_v2 = vpop.f32.mrb[84].mxu1  ;;  %v4084_v51 = vmax.f32 %v8775_v20, %v4036_v47 }
 0x316   : > { %v4038_v63 = vmax.f32 %v3429_v41, %v3432_v13  ;;  %v5627_v42 = vadd.f32 %v3005_v29, %v9016_v25  ;;  %v5659_v12 = vadd.f32 %v3327_v2, %v9031_v54  ;;  %v3007_v38 = vpop.f32.mrb[101].mxu0  ;;  %v3329_v39 = vpop.f32.mrb[85].mxu1  ;;  %4249 = vmatprep.mubr.f32.mxu0 %v4083_v18  ;;  %v9459_v0 = vmax.f32 %v9005_v33, 0.0 }
 0x317   : > { %v4039_v56 = vmax.f32 %v3430_v52, %v3433_v50  ;;  %v5628_v44 = vadd.f32 %v3007_v38, %v9042_v46  ;;  %v5660_v20 = vadd.f32 %v3329_v39, %v9046_v37  ;;  %4250 = vmatmul.mubr.f32.vlgmr.msra.gmra.mrb[128].mxu0 %v4082_v45  ;;  %v9119_v55 = vadd.f32 %v8894_v35, %v8994_v62 }
 0x318   : > { %v4037_v14 = vmax.f32 %v9459_v0, %v3431_v43  ;;  %v3442_v13 = vmax.f32 %v5627_v42, 0.0  ;;  %v3444_v41 = vmax.f32 %v5659_v12, 0.0  ;;  %4799 = vmatprep.mubr.f32.mxu1 %v4084_v51  ;;  %v4086_v34 = vmax.f32 %v8793_v23, %v4038_v63 }
 0x319   : > { %v4087_v18 = vmax.f32 %v8798_v36, %v4039_v56  ;;  %v3443_v29 = vmax.f32 %v5628_v44, 0.0  ;;  %v3445_v33 = vmax.f32 %v5660_v20, 0.0  ;;  %v3011_v5 = vpop.f32.mrb[102].mxu0  ;;  %v3333_v24 = vpop.f32.mrb[86].mxu1  ;;  %v3524_v6 = vmax.f32 %v9109_v59, 0.0  ;;  %v9462_v44 = vld [vmem:[#allocation9_spill] sm:$0xff] }
 0x31a   : > { %v4085_v47 = vmax.f32 %v8398_v22, %v4037_v14  ;;  %v9460_v52 = vmax.f32 %v9020_v8, 0.0  ;;  %v5629_v35 = vadd.f32 %v3011_v5, %v9016_v25  ;;  %v5661_v43 = vadd.f32 %v3333_v24, %v9031_v54  ;;  %v3013_v51 = vpop.f32.mrb[103].mxu0  ;;  %v3335_v50 = vpop.f32.mrb[87].mxu1  ;;  %4254 = vmatprep.mubr.f32.mxu0 %v4086_v34 }
 0x31b   : > { %v9461_v23 = vmax.f32 %v9013_v32, 0.0  ;;  %v4042_v2 = vmax.f32 %v3442_v13, %v3445_v33  ;;  %v5630_v63 = vadd.f32 %v3013_v51, %v9042_v46  ;;  %v5662_v22 = vadd.f32 %v3335_v50, %v9046_v37  ;;  %4800 = vmatmul.mubr.f32.vlgmr.msra.gmra.mrb[112].mxu1 %v4087_v18 }
 0x31c   : > { %v4041_v45 = vmax.f32 %v9460_v52, %v3444_v41  ;;  %4255 = vmatmul.mubr.f32.gmra.mrb[130].mxu0 %v4085_v47  ;;  %v3525_v42 = vmax.f32 %v9119_v55, 0.0  ;;  %v3454_v8 = vmax.f32 %v5629_v35, 0.0  ;;  %v3456_v12 = vmax.f32 %v5661_v43, 0.0  ;;  %v9465_v35 = vld [vmem:[#allocation12_spill] sm:$0xff] }
 0x31d   : > { %v4040_v36 = vmax.f32 %v9461_v23, %v3443_v29  ;;  %v3455_v39 = vmax.f32 %v5630_v63, 0.0  ;;  %v3457_v0 = vmax.f32 %v5662_v22, 0.0  ;;  %v3017_v14 = vpop.f32.mrb[104].mxu0  ;;  %v3339_v56 = vpop.f32.mrb[88].mxu1  ;;  %v4090_v20 = vmax.f32 %v8812_v16, %v4042_v2  ;;  %v9467_v63 = vld [vmem:[#allocation6_spill] sm:$0xff] }
 0x31e   : > { %v4089_v38 = vmax.f32 %v8807_v61, %v4041_v45  ;;  %v9139_v13 = vadd.f32 %v8903_v31, %v8992_v17  ;;  %v9463_v41 = vmax.f32 %v9028_v19, 0.0  ;;  %v5631_v29 = vadd.f32 %v3017_v14, %v9016_v25  ;;  %v3019_v61 = vpop.f32.mrb[105].mxu0  ;;  %v3341_v33 = vpop.f32.mrb[89].mxu1 }
 0x31f   : > { %v4088_v32 = vmax.f32 %v9462_v44, %v4040_v36  ;;  %v5663_v18 = vadd.f32 %v3339_v56, %v9031_v54  ;;  %v9464_v5 = vmax.f32 %v9024_v60, 0.0  ;;  %v4045_v47 = vmax.f32 %v3454_v8, %v3457_v0  ;;  %4802 = vmatprep.mubr.f32.mxu1 %v4090_v20  ;;  %v9466_v36 = vld [vmem:[#allocation10_spill] sm:$0xff] }
 0x320   : > { %v4044_v34 = vmax.f32 %v9463_v41, %v3456_v12  ;;  %4259 = vmatprep.mubr.f32.mxu0 %v4089_v38  ;;  %v5632_v16 = vadd.f32 %v3019_v61, %v9042_v46  ;;  %v5664_v52 = vadd.f32 %v3341_v33, %v9046_v37  ;;  %v9151_v31 = vadd.f32 %v8908_v11, %v8994_v62 }
 0x321   : > { %v4043_v24 = vmax.f32 %v9464_v5, %v3455_v39  ;;  %4260 = vmatmul.mubr.f32.gmra.mrb[132].mxu0 %v4088_v32  ;;  %v3466_v19 = vmax.f32 %v5631_v29, 0.0  ;;  %v3468_v45 = vmax.f32 %v5663_v18, 0.0  ;;  %v3023_v23 = vpop.f32.mrb[106].mxu0  ;;  %v3345_v60 = vpop.f32.mrb[90].mxu1  ;;  %v4093_v22 = vmax.f32 %v9467_v63, %v4045_v47  ;;  %v9470_v18 = vld [vmem:[#allocation8_spill] sm:$0xff] }
 0x322   : > { %v4092_v43 = vmax.f32 %v9465_v35, %v4044_v34  ;;  %v3467_v51 = vmax.f32 %v5632_v16, 0.0  ;;  %v3469_v50 = vmax.f32 %v5664_v52, 0.0  ;;  %v3536_v8 = vmax.f32 %v9139_v13, 0.0  ;;  %v3025_v0 = vpop.f32.mrb[107].mxu0  ;;  %v3347_v14 = vpop.f32.mrb[91].mxu1  ;;  %v9471_v16 = vld [vmem:[#allocation7_spill] sm:$0xff] }
 0x323   : > { %v4091_v2 = vmax.f32 %v9466_v36, %v4043_v24  ;;  %v9468_v12 = vmax.f32 %v9039_v27, 0.0  ;;  %v5633_v11 = vadd.f32 %v3023_v23, %v9016_v25  ;;  %v5665_v39 = vadd.f32 %v3345_v60, %v9031_v54  ;;  %4803 = vmatmul.mubr.f32.gmra.mrb[114].mxu1 %v4093_v22  ;;  %v9472_v52 = vld [vmem:[#allocation22_spill] sm:$0xff] }
 0x324   : > { %4264 = vmatprep.mubr.f32.mxu0 %v4092_v43  ;;  %v9469_v56 = vmax.f32 %v9035_v30, 0.0  ;;  %v4048_v32 = vmax.f32 %v3466_v19, %v3469_v50  ;;  %v5634_v20 = vadd.f32 %v3025_v0, %v9042_v46  ;;  %v5666_v41 = vadd.f32 %v3347_v14, %v9046_v37 }
 0x325   : > { %v4047_v38 = vmax.f32 %v9468_v12, %v3468_v45  ;;  %4265 = vmatmul.mubr.f32.gmra.mrb[134].mxu0 %v4091_v2  ;;  %v3537_v34 = vmax.f32 %v9151_v31, 0.0  ;;  %v3478_v27 = vmax.f32 %v5633_v11, 0.0  ;;  %v3480_v29 = vmax.f32 %v5665_v39, 0.0  ;;  %v3029_v24 = vpop.f32.mrb[108].mxu0  ;;  %v3351_v47 = vpop.f32.mrb[92].mxu1  ;;  %v9475_v11 = vld [vmem:[#allocation23_spill] sm:$0xff] }
 0x326   : > { %v4046_v44 = vmax.f32 %v9469_v56, %v3467_v51  ;;  %v3479_v33 = vmax.f32 %v5634_v20, 0.0  ;;  %v3481_v5 = vmax.f32 %v5666_v41, 0.0  ;;  %v4096_v19 = vmax.f32 %v9472_v52, %v4048_v32  ;;  %v3031_v23 = vpop.f32.mrb[109].mxu0  ;;  %v3353_v60 = vpop.f32.mrb[93].mxu1  ;;  %v9477_v20 = vld [vmem:[#allocation24_spill] sm:$0xff] }
 0x327   : > { %v4095_v61 = vmax.f32 %v9470_v18, %v4047_v38  ;;  %v9171_v45 = vadd.f32 %v8917_v40, %v8992_v17  ;;  %v9473_v35 = vmax.f32 %v9057_v57, 0.0  ;;  %v5635_v51 = vadd.f32 %v3029_v24, %v9016_v25 }
 0x328   : > { %v4094_v30 = vmax.f32 %v9471_v16, %v4046_v44  ;;  %v5667_v50 = vadd.f32 %v3351_v47, %v9031_v54  ;;  %v9474_v36 = vmax.f32 %v9051_v4, 0.0  ;;  %v4051_v63 = vmax.f32 %v3478_v27, %v3481_v5  ;;  %4805 = vmatprep.mubr.f32.mxu1 %v4096_v19  ;;  %v9476_v44 = vld [vmem:[#allocation4_spill] sm:$0xff] }
 0x329   : > { %v4050_v43 = vmax.f32 %v9473_v35, %v3480_v29  ;;  %4269 = vmatprep.mubr.f32.mxu0 %v4095_v61  ;;  %v5636_v22 = vadd.f32 %v3031_v23, %v9042_v46  ;;  %v5668_v12 = vadd.f32 %v3353_v60, %v9046_v37  ;;  %v9183_v40 = vadd.f32 %v8922_v28, %v8994_v62  ;;  %v3035_v56 = vpop.f32.mrb[110].mxu0  ;;  %v3357_v4 = vpop.f32.mrb[94].mxu1 }
 0x32a   : > { %v4049_v2 = vmax.f32 %v9474_v36, %v3479_v33  ;;  %4270 = vmatmul.mubr.f32.gmra.mrb[136].mxu0 %v4094_v30  ;;  %v3490_v57 = vmax.f32 %v5635_v51, 0.0  ;;  %v3492_v38 = vmax.f32 %v5667_v50, 0.0  ;;  %v4099_v41 = vmax.f32 %v9477_v20, %v4051_v63  ;;  %v3037_v33 = vpop.f32.mrb[111].mxu0  ;;  %v3359_v5 = vpop.f32.mrb[95].mxu1  ;;  %v9482_v63 = vld [vmem:[#allocation26_spill] sm:$0xff] }
 0x32b   : > { %v4098_v39 = vmax.f32 %v9475_v11, %v4050_v43  ;;  %v3491_v0 = vmax.f32 %v5636_v22, 0.0  ;;  %v3493_v14 = vmax.f32 %v5668_v12, 0.0  ;;  %v3548_v27 = vmax.f32 %v9171_v45, 0.0  ;;  %v9480_v43 = vld [vmem:[#allocation25_spill] sm:$0xff] }
 0x32c   : > { %v4097_v32 = vmax.f32 %v9476_v44, %v4049_v2  ;;  %v9478_v29 = vmax.f32 %v9068_v7, 0.0  ;;  %v5637_v28 = vadd.f32 %v3035_v56, %v9016_v25  ;;  %v5669_v61 = vadd.f32 %v3357_v4, %v9031_v54  ;;  %4806 = vmatmul.mubr.f32.gmra.mrb[116].mxu1 %v4099_v41  ;;  %v9481_v2 = vld [vmem:[#allocation13_spill] sm:$0xff] }
 0x32d   : > { %4274 = vmatprep.mubr.f32.mxu0 %v4098_v39  ;;  %v9479_v24 = vmax.f32 %v9061_v9, 0.0  ;;  %v4054_v16 = vmax.f32 %v3490_v57, %v3493_v14  ;;  %v5638_v30 = vadd.f32 %v3037_v33, %v9042_v46  ;;  %v5670_v52 = vadd.f32 %v3359_v5, %v9046_v37  ;;  %v3041_v60 = vpop.f32.mrb[112].mxu0  ;;  %v3363_v36 = vpop.f32.mrb[96].mxu1  ;;  %v9486_v5 = vld [vmem:[#allocation14_spill] sm:$0xff]  ;;  %v9500_v45 = vld [vmem:[#allocation17_spill] sm:$0xff] }
 0x32e   : > { %v4053_v18 = vmax.f32 %v9478_v29, %v3492_v38  ;;  %4275 = vmatmul.mubr.f32.gmra.mrb[138].mxu0 %v4097_v32  ;;  %v3549_v19 = vmax.f32 %v9183_v40, 0.0  ;;  %v3502_v7 = vmax.f32 %v5637_v28, 0.0  ;;  %v3504_v35 = vmax.f32 %v5669_v61, 0.0  ;;  %v3365_v14 = vpop.f32.mrb[97].mxu1  ;;  %v9485_v29 = vld [vmem:[#allocation27_spill] sm:$0xff] }
 0x32f   : > { %v4052_v47 = vmax.f32 %v9479_v24, %v3491_v0  ;;  %v3503_v50 = vmax.f32 %v5638_v30, 0.0  ;;  %v3505_v23 = vmax.f32 %v5670_v52, 0.0  ;;  %v4102_v22 = vmax.f32 %v9482_v63, %v4054_v16  ;;  %v3043_v0 = vpop.f32.mrb[113].mxu0 }
 0x330   : > { %v4101_v51 = vmax.f32 %v9480_v43, %v4053_v18  ;;  %v9203_v12 = vadd.f32 %v8931_v10, %v8992_v17  ;;  %v9483_v57 = vmax.f32 %v9078_v3, 0.0  ;;  %v5639_v11 = vadd.f32 %v3041_v60, %v9016_v25 }
 0x331   : > { %v4100_v9 = vmax.f32 %v9481_v2, %v4052_v47  ;;  %v5671_v39 = vadd.f32 %v3363_v36, %v9031_v54  ;;  %v9484_v56 = vmax.f32 %v9074_v49, 0.0  ;;  %v4057_v44 = vmax.f32 %v3502_v7, %v3505_v23  ;;  %4808 = vmatprep.mubr.f32.mxu1 %v4102_v22  ;;  %v3047_v33 = vpop.f32.mrb[114].mxu0  ;;  %v3369_v49 = vpop.f32.mrb[98].mxu1  ;;  %v9487_v47 = vld [vmem:[#allocation28_spill] sm:$0xff] }
 0x332   : > { %v4056_v38 = vmax.f32 %v9483_v57, %v3504_v35  ;;  %4279 = vmatprep.mubr.f32.mxu0 %v4101_v51  ;;  %v5640_v32 = vadd.f32 %v3043_v0, %v9042_v46  ;;  %v5672_v20 = vadd.f32 %v3365_v14, %v9046_v37  ;;  %v9215_v10 = vadd.f32 %v8936_v58, %v8994_v62  ;;  %v3049_v35 = vpop.f32.mrb[115].mxu0  ;;  %v3371_v43 = vpop.f32.mrb[99].mxu1  ;;  %v9491_v0 = vld [vmem:[#allocation30_spill] sm:$0xff] }
 0x333   : > { %v4055_v4 = vmax.f32 %v9484_v56, %v3503_v50  ;;  %4280 = vmatmul.mubr.f32.gmra.mrb[140].mxu0 %v4100_v9  ;;  %v3514_v3 = vmax.f32 %v5639_v11, 0.0  ;;  %v3516_v41 = vmax.f32 %v5671_v39, 0.0  ;;  %v4105_v16 = vmax.f32 %v9487_v47, %v4057_v44  ;;  %v9489_v9 = vld [vmem:[#allocation29_spill] sm:$0xff]  ;;  %v9490_v39 = vld [vmem:[#allocation15_spill] sm:$0xff] }
 0x334   : > { %v4104_v18 = vmax.f32 %v9485_v29, %v4056_v38  ;;  %v3515_v28 = vmax.f32 %v5640_v32, 0.0  ;;  %v3517_v61 = vmax.f32 %v5672_v20, 0.0  ;;  %v3560_v30 = vmax.f32 %v9203_v12, 0.0  ;;  %v9504_v12 = vld [vmem:[#allocation38_spill] sm:$0xff] }
 0x335   : > { %v4103_v24 = vmax.f32 %v9486_v5, %v4055_v4  ;;  %v4059_v52 = vmax.f32 %v3513_v15, %v3516_v41  ;;  %v5641_v58 = vadd.f32 %v3047_v33, %v9016_v25  ;;  %v5673_v7 = vadd.f32 %v3369_v49, %v9031_v54  ;;  %4809 = vmatmul.mubr.f32.gmra.mrb[118].mxu1 %v4105_v16  ;;  %v3053_v38 = vpop.f32.mrb[116].mxu0  ;;  %v3375_v11 = vpop.f32.mrb[100].mxu1  ;;  %v9494_v16 = vld [vmem:[#allocation32_spill] sm:$0xff] }
 0x336   : > { %4284 = vmatprep.mubr.f32.mxu0 %v4104_v18  ;;  %v9488_v51 = vmax.f32 %v9083_v53, 0.0  ;;  %v4060_v23 = vmax.f32 %v3514_v3, %v3517_v61  ;;  %v5642_v60 = vadd.f32 %v3049_v35, %v9042_v46  ;;  %v5674_v36 = vadd.f32 %v3371_v43, %v9046_v37  ;;  %v3055_v20 = vpop.f32.mrb[117].mxu0  ;;  %v3377_v3 = vpop.f32.mrb[101].mxu1  ;;  %v9492_v61 = vld [vmem:[#allocation31_spill] sm:$0xff] }
 0x337   : > { %4285 = vmatmul.mubr.f32.gmra.mrb[142].mxu0 %v4103_v24  ;;  %v3561_v2 = vmax.f32 %v9215_v10, 0.0  ;;  %v3526_v1 = vmax.f32 %v5641_v58, 0.0  ;;  %v3528_v15 = vmax.f32 %v5673_v7, 0.0  ;;  %v4107_v63 = vmax.f32 %v9489_v9, %v4059_v52 }
 0x338   : > { %v4058_v50 = vmax.f32 %v9488_v51, %v3515_v28  ;;  %v3527_v22 = vmax.f32 %v5642_v60, 0.0  ;;  %v3529_v57 = vmax.f32 %v5674_v36, 0.0  ;;  %v4108_v14 = vmax.f32 %v9491_v0, %v4060_v23 }
 0x339   : > { %v9235_v56 = vadd.f32 %v8945_v21, %v8992_v17  ;;  %v4062_v4 = vmax.f32 %v3525_v42, %v3528_v15  ;;  %v5643_v44 = vadd.f32 %v3053_v38, %v9016_v25  ;;  %v5675_v32 = vadd.f32 %v3375_v11, %v9031_v54  ;;  %4289 = vmatprep.mubr.f32.mxu0 %v4107_v63  ;;  %v3059_v24 = vpop.f32.mrb[118].mxu0  ;;  %v3381_v59 = vpop.f32.mrb[102].mxu1  ;;  %v9495_v15 = vld [vmem:[#allocation33_spill] sm:$0xff]  ;;  %v9496_v11 = vld [vmem:[#allocation11_spill] sm:$0xff] }
 0x33a   : > { %v4106_v53 = vmax.f32 %v9490_v39, %v4058_v50  ;;  %v4061_v41 = vmax.f32 %v3524_v6, %v3527_v22  ;;  %v4063_v29 = vmax.f32 %v3526_v1, %v3529_v57  ;;  %v5644_v18 = vadd.f32 %v3055_v20, %v9042_v46  ;;  %4811 = vmatprep.mubr.f32.mxu1 %v4108_v14  ;;  %v9493_v6 = vld [vmem:[#allocation16_spill] sm:$0xff]  ;;  %v3061_v43 = vpop.f32.mrb[119].mxu0  ;;  %v3383_v51 = vpop.f32.mrb[103].mxu1 }
 0x33b   : > { %v5676_v28 = vadd.f32 %v3377_v3, %v9046_v37  ;;  %v9247_v21 = vadd.f32 %v8950_v48, %v8994_v62  ;;  %v3538_v55 = vmax.f32 %v5643_v44, 0.0  ;;  %v3540_v42 = vmax.f32 %v5675_v32, 0.0 }
 0x33c   : > { %4290 = vmatmul.mubr.f32.gmra.mrb[144].mxu0 %v4106_v53  ;;  %v4110_v33 = vmax.f32 %v9492_v61, %v4062_v4  ;;  %v3539_v49 = vmax.f32 %v5644_v18, 0.0  ;;  %v4109_v47 = vmax.f32 %v9493_v6, %v4061_v41  ;;  %v4111_v52 = vmax.f32 %v9494_v16, %v4063_v29 }
 0x33d   : > { %v3541_v5 = vmax.f32 %v5676_v28, 0.0  ;;  %v3572_v58 = vmax.f32 %v9235_v56, 0.0  ;;  %v4065_v7 = vmax.f32 %v3537_v34, %v3540_v42  ;;  %v5645_v48 = vadd.f32 %v3059_v24, %v9016_v25  ;;  %v3065_v57 = vpop.f32.mrb[120].mxu0  ;;  %v3387_v38 = vpop.f32.mrb[104].mxu1  ;;  %v9499_v28 = vld [vmem:[#allocation35_spill] sm:$0xff] }
 0x33e   : > { %v5677_v35 = vadd.f32 %v3381_v59, %v9031_v54  ;;  %4294 = vmatprep.mubr.f32.mxu0 %v4110_v33  ;;  %v4064_v50 = vmax.f32 %v3536_v8, %v3539_v49  ;;  %v5646_v60 = vadd.f32 %v3061_v43, %v9042_v46  ;;  %v5678_v36 = vadd.f32 %v3383_v51, %v9046_v37  ;;  %v9497_v8 = vld [vmem:[#allocation34_spill] sm:$0xff]  ;;  %v3067_v44 = vpop.f32.mrb[121].mxu0  ;;  %v3389_v32 = vpop.f32.mrb[105].mxu1  ;;  %v9501_v49 = vld [vmem:[#allocation36_spill] sm:$0xff]  ;;  %v9508_v56 = vld [vmem:[#allocation19_spill] sm:$0xff] }
 0x33f   : > { %v4066_v23 = vmax.f32 %v3538_v55, %v3541_v5  ;;  %v3573_v1 = vmax.f32 %v9247_v21, 0.0  ;;  %v3550_v31 = vmax.f32 %v5645_v48, 0.0  ;;  %4812 = vmatmul.mubr.f32.gmra.mrb[120].mxu1 %v4111_v52  ;;  %v4113_v9 = vmax.f32 %v9495_v15, %v4065_v7  ;;  %v9503_v15 = vld [vmem:[#allocation18_spill] sm:$0xff] }
 0x340   : > { %4295 = vmatmul.mubr.f32.gmra.mrb[146].mxu0 %v4109_v47  ;;  %v3552_v34 = vmax.f32 %v5677_v35, 0.0  ;;  %v3551_v63 = vmax.f32 %v5646_v60, 0.0  ;;  %v3553_v22 = vmax.f32 %v5678_v36, 0.0  ;;  %v4112_v13 = vmax.f32 %v9496_v11, %v4064_v50 }
 0x341   : > { %v4114_v39 = vmax.f32 %v9497_v8, %v4066_v23  ;;  %v9267_v53 = vadd.f32 %v8959_v26, %v8992_v17  ;;  %v5647_v14 = vadd.f32 %v3065_v57, %v9016_v25  ;;  %v5679_v4 = vadd.f32 %v3387_v38, %v9031_v54  ;;  %4299 = vmatprep.mubr.f32.mxu0 %v4113_v9  ;;  %v9498_v26 = vld [vmem:[#allocation40_spill] sm:$0xff]  ;;  %v3071_v61 = vpop.f32.mrb[122].mxu0  ;;  %v3393_v33 = vpop.f32.mrb[106].mxu1 }
 0x342   : > { %v4068_v0 = vmax.f32 %v3549_v19, %v3552_v34  ;;  %v4067_v20 = vmax.f32 %v3548_v27, %v3551_v63  ;;  %v4069_v3 = vmax.f32 %v3550_v31, %v3553_v22  ;;  %v5648_v41 = vadd.f32 %v3067_v44, %v9042_v46  ;;  %v3073_v16 = vpop.f32.mrb[123].mxu0  ;;  %v3395_v52 = vpop.f32.mrb[107].mxu1  ;;  %v9505_v63 = vld [vmem:[#allocation42_spill] sm:$0xff] }
 0x343   : > { %v5680_v29 = vadd.f32 %v3389_v32, %v9046_v37  ;;  %v5620_v40 = vadd.f32 %v9498_v26, %v8994_v62  ;;  %v3562_v19 = vmax.f32 %v5647_v14, 0.0  ;;  %v3564_v18 = vmax.f32 %v5679_v4, 0.0  ;;  %4814 = vmatprep.mubr.f32.mxu1 %v4114_v39  ;;  %v9506_v4 = vld [vmem:[#allocation44_spill] sm:$0xff]  ;;  %v9507_v32 = vld [vmem:[#allocation39_spill] sm:$0xff] }
 0x344   : > { %4300 = vmatmul.mubr.f32.gmra.mrb[148].mxu0 %v4112_v13  ;;  %v4116_v21 = vmax.f32 %v9499_v28, %v4068_v0  ;;  %v3563_v55 = vmax.f32 %v5648_v41, 0.0  ;;  %v4115_v27 = vmax.f32 %v9500_v45, %v4067_v20  ;;  %v4117_v5 = vmax.f32 %v9501_v49, %v4069_v3 }
 0x345   : > { %v3565_v42 = vmax.f32 %v5680_v29, 0.0  ;;  %v3584_v24 = vmax.f32 %v9267_v53, 0.0  ;;  %v4071_v59 = vmax.f32 %v3561_v2, %v3564_v18  ;;  %v5649_v6 = vadd.f32 %v3071_v61, %v9016_v25  ;;  %v9502_v2 = vld [vmem:[#allocation37_spill] sm:$0xff]  ;;  %v3077_v31 = vpop.f32.mrb[124].mxu0  ;;  %v3399_v34 = vpop.f32.mrb[108].mxu1 }
 0x346   : > { %v5681_v47 = vadd.f32 %v3393_v33, %v9031_v54  ;;  %4304 = vmatprep.mubr.f32.mxu0 %v4116_v21  ;;  %v4070_v7 = vmax.f32 %v3560_v30, %v3563_v55  ;;  %v5650_v35 = vadd.f32 %v3073_v16, %v9042_v46  ;;  %v5682_v43 = vadd.f32 %v3395_v52, %v9046_v37  ;;  %v3079_v13 = vpop.f32.mrb[125].mxu0  ;;  %v3401_v8 = vpop.f32.mrb[109].mxu1  ;;  %v9511_v52 = vld [vmem:[#allocation20_spill] sm:$0xff] }
 0x347   : > { %v4072_v48 = vmax.f32 %v3562_v19, %v3565_v42  ;;  %v3585_v51 = vmax.f32 %v5620_v40, 0.0  ;;  %v3574_v50 = vmax.f32 %v5649_v6, 0.0  ;;  %4815 = vmatmul.mubr.f32.gmra.mrb[122].mxu1 %v4117_v5  ;;  %v4119_v23 = vmax.f32 %v9502_v2, %v4071_v59  ;;  %v9509_v40 = vld [vmem:[#allocation41_spill] sm:$0xff]  ;;  %v9510_v6 = vld [vmem:[#allocation43_spill] sm:$0xff] }
 0x348   : > { %4305 = vmatmul.mubr.f32.gmra.mrb[150].mxu0 %v4115_v27  ;;  %v3576_v10 = vmax.f32 %v5681_v47, 0.0  ;;  %v3575_v60 = vmax.f32 %v5650_v35, 0.0  ;;  %v3577_v36 = vmax.f32 %v5682_v43, 0.0  ;;  %v4118_v9 = vmax.f32 %v9503_v15, %v4070_v7  ;;  %v9512_v7 = vld [vmem:[#allocation45_spill] sm:$0xff] }
 0x349   : > { %v4120_v30 = vmax.f32 %v9504_v12, %v4072_v48  ;;  %v5621_v22 = vadd.f32 %v9505_v63, %v8992_v17  ;;  %v5651_v38 = vadd.f32 %v3077_v31, %v9016_v25  ;;  %v5683_v11 = vadd.f32 %v3399_v34, %v9031_v54  ;;  %4309 = vmatprep.mubr.f32.mxu0 %v4119_v23  ;;  %v3083_v29 = vpop.f32.mrb[126].mxu0  ;;  %v3405_v26 = vpop.f32.mrb[110].mxu1 }
 0x34a   : > { %v4074_v57 = vmax.f32 %v3573_v1, %v3576_v10  ;;  %v4073_v39 = vmax.f32 %v3572_v58, %v3575_v60  ;;  %v4075_v53 = vmax.f32 %v3574_v50, %v3577_v36  ;;  %v5652_v0 = vadd.f32 %v3079_v13, %v9042_v46  ;;  %v3407_v42 = vpop.f32.mrb[111].mxu1  ;;  %v9515_v10 = vld [vmem:[#allocation47_spill] sm:$0xff]  ;;  %v9320_v36 = vld [vmem:[%s9370_s6] ss:$0 sm:$0xff] }
 0x34b   : > { %v5684_v14 = vadd.f32 %v3401_v8, %v9046_v37  ;;  %v5622_v17 = vadd.f32 %v9506_v4, %v8994_v62  ;;  %v3586_v1 = vmax.f32 %v5651_v38, 0.0  ;;  %v3588_v44 = vmax.f32 %v5683_v11, 0.0  ;;  %4817 = vmatprep.mubr.f32.mxu1 %v4120_v30  ;;  %v3085_v62 = vpop.f32.mrb[127].mxu0 }
 0x34c   : > { %4310 = vmatmul.mubr.f32.gmra.mrb[152].mxu0 %v4118_v9  ;;  %v4122_v20 = vmax.f32 %v9507_v32, %v4074_v57  ;;  %v3587_v3 = vmax.f32 %v5652_v0, 0.0  ;;  %v4121_v58 = vmax.f32 %v9508_v56, %v4073_v39  ;;  %v4123_v19 = vmax.f32 %v9509_v40, %v4075_v53 }
 0x34d   : > { %v3589_v41 = vmax.f32 %v5684_v14, 0.0  ;;  %v3596_v18 = vmax.f32 %v5621_v22, 0.0  ;;  %v4077_v28 = vmax.f32 %v3585_v51, %v3588_v44  ;;  %v5653_v21 = vadd.f32 %v3083_v29, %v9016_v25  ;;  %v9514_v51 = vld [vmem:[#allocation21_spill] sm:$0xff] }
 0x34e   : > { %v5685_v55 = vadd.f32 %v3405_v26, %v9031_v54  ;;  %4314 = vmatprep.mubr.f32.mxu0 %v4122_v20  ;;  %v4076_v61 = vmax.f32 %v3584_v24, %v3587_v3  ;;  %v5654_v45 = vadd.f32 %v3085_v62, %v9042_v46  ;;  %v5686_v27 = vadd.f32 %v3407_v42, %v9046_v37  ;;  %v9513_v46 = vld [vmem:[#allocation46_spill] sm:$0xff] }
 0x34f   : > { %v4078_v33 = vmax.f32 %v3586_v1, %v3589_v41  ;;  %v3597_v49 = vmax.f32 %v5622_v17, 0.0  ;;  %v3598_v5 = vmax.f32 %v5653_v21, 0.0  ;;  %4818 = vmatmul.mubr.f32.gmra.mrb[124].mxu1 %v4123_v19  ;;  %v4125_v47 = vmax.f32 %v9510_v6, %v4077_v28 }
 0x350   : > { %4315 = vmatmul.mubr.f32.gmra.mrb[154].mxu0 %v4121_v58  ;;  %v3600_v59 = vmax.f32 %v5685_v55, 0.0  ;;  %v3599_v16 = vmax.f32 %v5654_v45, 0.0  ;;  %v3601_v25 = vmax.f32 %v5686_v27, 0.0  ;;  %v4124_v54 = vmax.f32 %v9511_v52, %v4076_v61 }
 0x351   : > { %v4126_v48 = vmax.f32 %v9512_v7, %v4078_v33  ;;  %4319 = vmatprep.mubr.f32.mxu0 %v4125_v47 }
 0x352   : > { %v4080_v35 = vmax.f32 %v3597_v49, %v3600_v59  ;;  %v4079_v24 = vmax.f32 %v3596_v18, %v3599_v16  ;;  %v4081_v43 = vmax.f32 %v3598_v5, %v3601_v25 }
 0x353   : > { %4820 = vmatprep.mubr.f32.mxu1 %v4126_v48 }
 0x354   : > { %4320 = vmatmul.mubr.f32.gmra.mrb[156].mxu0 %v4124_v54  ;;  %v4128_v37 = vmax.f32 %v9513_v46, %v4080_v35  ;;  %v4127_v50 = vmax.f32 %v9514_v51, %v4079_v24  ;;  %v4129_v2 = vmax.f32 %v9515_v10, %v4081_v43 }
 0x356   : > { %4324 = vmatprep.mubr.f32.mxu0 %v4128_v37  ;;  %4821 = vmatmul.mubr.f32.gmra.mrb[126].mxu1 %v4129_v2 }
 0x358   : > { %4325 = vmatmul.mubr.f32.gmra.mrb[158].mxu0 %v4127_v50 }
 0x3ea   : > { %v4647_v23 = vpop.f32.mrb[128].mxu0 }
 0x3eb   : > { %v4648_v60 = vpop.f32.mrb[129].mxu0 }
 0x3ec   : > { %v4649_v31 = vadd.f32 %v4648_v60, %v4647_v23 }
 0x3ee   : > { %v4252_v15 = vadd.f32 %v4649_v31, %v9320_v36  ;;  %v4801_v9 = vpop.f32.mrb[112].mxu1 }
 0x3ef   : > { %v4650_v34 = vpop.f32.mrb[130].mxu0  ;;  %v4396_v63 = vpop.f32.mrb[113].mxu1 }
 0x3f0   : > { %v4651_v12 = vpop.f32.mrb[131].mxu0  ;;  %v4397_v22 = vadd.f32 %v4396_v63, %v4252_v15 }
 0x3f1   : > { %v4652_v30 = vadd.f32 %v4651_v12, %v4650_v34 }
 0x3f2   : > { %4475 = vst [vmem:[%s9328_s23] sm:$0xff] %v4397_v22 }
 0x3f3   : > { %v4257_v57 = vadd.f32 %v4652_v30, %v9320_v36 }
 0x3f4   : > { %v4653_v38 = vpop.f32.mrb[132].mxu0 }
 0x3f5   : > { %v4654_v11 = vpop.f32.mrb[133].mxu0  ;;  %v4402_v13 = vadd.f32 %v4801_v9, %v4257_v57 }
 0x3f6   : > { %v4655_v8 = vadd.f32 %v4654_v11, %v4653_v38  ;;  %v4804_v0 = vpop.f32.mrb[114].mxu1 }
 0x3f7   : > { %4476 = vst [vmem:[%s9328_s23 + $0x8] sm:$0xff] %v4402_v13  ;;  %v4406_v17 = vpop.f32.mrb[115].mxu1 }
 0x3f8   : > { %v4656_v39 = vpop.f32.mrb[134].mxu0  ;;  %v4262_v53 = vadd.f32 %v4655_v8, %v9320_v36 }
 0x3f9   : > { %v4657_v14 = vpop.f32.mrb[135].mxu0 }
 0x3fa   : > { %v4658_v4 = vadd.f32 %v4657_v14, %v4656_v39  ;;  %v4407_v1 = vadd.f32 %v4406_v17, %v4262_v53 }
 0x3fc   : > { %v4267_v44 = vadd.f32 %v4658_v4, %v9320_v36  ;;  %4477 = vst [vmem:[%s9328_s23 + $0x10] sm:$0xff] %v4407_v1 }
 0x3fd   : > { %v4659_v32 = vpop.f32.mrb[136].mxu0 }
 0x3fe   : > { %v4660_v20 = vpop.f32.mrb[137].mxu0  ;;  %v4412_v3 = vadd.f32 %v4804_v0, %v4267_v44 }
 0x3ff   : > { %v4661_v41 = vadd.f32 %v4660_v20, %v4659_v32  ;;  %v4807_v56 = vpop.f32.mrb[116].mxu1 }
 0x400   : > { %4478 = vst [vmem:[%s9328_s23 + $0x18] sm:$0xff] %v4412_v3  ;;  %v4416_v19 = vpop.f32.mrb[117].mxu1 }
 0x401   : > { %v4662_v29 = vpop.f32.mrb[138].mxu0  ;;  %v4272_v26 = vadd.f32 %v4661_v41, %v9320_v36 }
 0x402   : > { %v4663_v58 = vpop.f32.mrb[139].mxu0 }
 0x403   : > { %v4664_v40 = vadd.f32 %v4663_v58, %v4662_v29  ;;  %v4417_v18 = vadd.f32 %v4416_v19, %v4272_v26 }
 0x405   : > { %v4277_v28 = vadd.f32 %v4664_v40, %v9320_v36  ;;  %4479 = vst [vmem:[%s9328_s23 + $0x20] sm:$0xff] %v4417_v18 }
 0x406   : > { %v4665_v21 = vpop.f32.mrb[140].mxu0 }
 0x407   : > { %v4666_v55 = vpop.f32.mrb[141].mxu0  ;;  %v4422_v62 = vadd.f32 %v4807_v56, %v4277_v28 }
 0x408   : > { %v4667_v42 = vadd.f32 %v4666_v55, %v4665_v21  ;;  %v4810_v45 = vpop.f32.mrb[118].mxu1 }
 0x409   : > { %4480 = vst [vmem:[%s9328_s23 + $0x28] sm:$0xff] %v4422_v62  ;;  %v4426_v5 = vpop.f32.mrb[119].mxu1 }
 0x40a   : > { %v4668_v61 = vpop.f32.mrb[142].mxu0  ;;  %v4282_v33 = vadd.f32 %v4667_v42, %v9320_v36 }
 0x40b   : > { %v4669_v27 = vpop.f32.mrb[143].mxu0 }
 0x40c   : > { %v4670_v49 = vadd.f32 %v4669_v27, %v4668_v61  ;;  %v4427_v59 = vadd.f32 %v4426_v5, %v4282_v33 }
 0x40e   : > { %v4287_v6 = vadd.f32 %v4670_v49, %v9320_v36  ;;  %4481 = vst [vmem:[%s9328_s23 + $0x30] sm:$0xff] %v4427_v59 }
 0x40f   : > { %v4671_v47 = vpop.f32.mrb[144].mxu0 }
 0x410   : > { %v4672_v16 = vpop.f32.mrb[145].mxu0  ;;  %v4432_v25 = vadd.f32 %v4810_v45, %v4287_v6 }
 0x411   : > { %v4673_v52 = vadd.f32 %v4672_v16, %v4671_v47 }
 0x412   : > { %4482 = vst [vmem:[%s9328_s23 + $0x38] sm:$0xff] %v4432_v25  ;;  %v4813_v48 = vpop.f32.mrb[120].mxu1 }
 0x413   : > { %v4674_v54 = vpop.f32.mrb[146].mxu0  ;;  %v4292_v7 = vadd.f32 %v4673_v52, %v9320_v36  ;;  %v4436_v43 = vpop.f32.mrb[121].mxu1 }
 0x414   : > { %v4675_v35 = vpop.f32.mrb[147].mxu0 }
 0x415   : > { %v4676_v24 = vadd.f32 %v4675_v35, %v4674_v54  ;;  %v4437_v46 = vadd.f32 %v4436_v43, %v4292_v7 }
 0x417   : > { %v4297_v37 = vadd.f32 %v4676_v24, %v9320_v36  ;;  %v4677_v51 = vpop.f32.mrb[148].mxu0  ;;  %4483 = vst [vmem:[%s9328_s23 + $0x40] sm:$0xff] %v4437_v46 }
 0x418   : > { %v4678_v50 = vpop.f32.mrb[149].mxu0 }
 0x419   : > { %v4442_v10 = vadd.f32 %v4813_v48, %v4297_v37  ;;  %v4679_v2 = vadd.f32 %v4678_v50, %v4677_v51 }
 0x41a   : > { %v4816_v31 = vpop.f32.mrb[122].mxu1 }
 0x41b   : > { %4484 = vst [vmem:[%s9328_s23 + $0x48] sm:$0xff] %v4442_v10  ;;  %v4680_v23 = vpop.f32.mrb[150].mxu0  ;;  %v4302_v60 = vadd.f32 %v4679_v2, %v9320_v36  ;;  %v4446_v9 = vpop.f32.mrb[123].mxu1 }
 0x41c   : > { %v4681_v34 = vpop.f32.mrb[151].mxu0 }
 0x41d   : > { %v4682_v15 = vadd.f32 %v4681_v34, %v4680_v23  ;;  %v4447_v12 = vadd.f32 %v4446_v9, %v4302_v60 }
 0x41f   : > { %v4307_v30 = vadd.f32 %v4682_v15, %v9320_v36  ;;  %v4683_v63 = vpop.f32.mrb[152].mxu0  ;;  %4485 = vst [vmem:[%s9328_s23 + $0x50] sm:$0xff] %v4447_v12 }
 0x420   : > { %v4684_v22 = vpop.f32.mrb[153].mxu0 }
 0x421   : > { %v4452_v57 = vadd.f32 %v4816_v31, %v4307_v30  ;;  %v4685_v38 = vadd.f32 %v4684_v22, %v4683_v63 }
 0x422   : > { %v4819_v8 = vpop.f32.mrb[124].mxu1 }
 0x423   : > { %4486 = vst [vmem:[%s9328_s23 + $0x58] sm:$0xff] %v4452_v57  ;;  %v4686_v11 = vpop.f32.mrb[154].mxu0  ;;  %v4312_v13 = vadd.f32 %v4685_v38, %v9320_v36  ;;  %v4456_v0 = vpop.f32.mrb[125].mxu1 }
 0x424   : > { %v4687_v39 = vpop.f32.mrb[155].mxu0 }
 0x425   : > { %v4688_v53 = vadd.f32 %v4687_v39, %v4686_v11  ;;  %v4457_v14 = vadd.f32 %v4456_v0, %v4312_v13 }
 0x427   : > { %v4317_v4 = vadd.f32 %v4688_v53, %v9320_v36  ;;  %v4689_v17 = vpop.f32.mrb[156].mxu0  ;;  %4487 = vst [vmem:[%s9328_s23 + $0x60] sm:$0xff] %v4457_v14 }
 0x428   : > { %v4690_v1 = vpop.f32.mrb[157].mxu0 }
 0x429   : > { %v4462_v44 = vadd.f32 %v4819_v8, %v4317_v4  ;;  %v4691_v32 = vadd.f32 %v4690_v1, %v4689_v17  ;;  %v4822_v3 = vpop.f32.mrb[126].mxu1 }
 0x42a   : > { %v4466_v26 = vpop.f32.mrb[127].mxu1 }
 0x42b   : > { %4488 = vst [vmem:[%s9328_s23 + $0x68] sm:$0xff] %v4462_v44  ;;  %v4692_v20 = vpop.f32.mrb[158].mxu0  ;;  %v4322_v41 = vadd.f32 %v4691_v32, %v9320_v36 }
 0x42c   : > { %v4693_v29 = vpop.f32.mrb[159].mxu0 }
 0x42d   : > { %v4694_v56 = vadd.f32 %v4693_v29, %v4692_v20  ;;  %v4467_v58 = vadd.f32 %v4466_v26, %v4322_v41 }
 0x42f   : > { %v4327_v40 = vadd.f32 %v4694_v56, %v9320_v36  ;;  %4489 = vst [vmem:[%s9328_s23 + $0x70] sm:$0xff] %v4467_v58 }
 0x431   : > { %v4472_v19 = vadd.f32 %v4822_v3, %v4327_v40 }
 0x433   : > { %4490 = vst [vmem:[%s9328_s23 + $0x78] sm:$0xff] %v4472_v19 }
 0x434 PF: > { %s17_s24 = sadd.s32 1, %s5895_s24  }
 0x435   : > { %p14_p4 = scmp.ge.s32.totalorder %s17_s24, 4  }
 0x437   :  { %16 = sbr.rel (!%p14_p4) target bundleno = 1 (0x1), region = 78 }

</bundles_post_ra>
